<compile_context>
chip_gen: v6e
topology: v6e:2x2x1
jax: 0.10.0
libtpu: 0.0.40
codegen_flags: <defaults>
</compile_context>

<pallas_src>
import functools
import math

import jax
import jax.numpy as jnp
from jax.experimental import pallas as pl
from jax.experimental.pallas import tpu as pltpu  # noqa: F401  (TPU backend)


# ----------------------------------------------------------------------------
# Fused whole-forward kernel
# ----------------------------------------------------------------------------

def _fused_decoder_kernel(
    # activations (batch-first)
    tgt_ref, mem_ref,
    # stacked per-layer weights (leading dim = num_layers), pre-transposed
    w_in_s_ref, b_in_s_ref, w_out_s_ref, b_out_s_ref,
    w_in_c_ref, b_in_c_ref, w_out_c_ref, b_out_c_ref,
    g1_ref, be1_ref, g2_ref, be2_ref,
    w1_ref, b1_ref, w2_ref, b2_ref,
    # final norm
    gf_ref, bf_ref,
    # output
    o_ref,
    *, num_layers, num_heads,
):
    N, L, E = tgt_ref.shape
    S = mem_ref.shape[1]
    H = num_heads
    dh = E // H

    # Keep 2D (rows = batch*seq, lanes = d_model) for all linears / layernorms.
    x2 = tgt_ref[...].reshape(N * L, E)          # (N*L, E) f32
    m2 = mem_ref[...].reshape(N * S, E)          # (N*S, E) f32

    def layer_norm(y2, g, b):
        mu = jnp.mean(y2, axis=-1, keepdims=True)
        var = jnp.mean((y2 - mu) ** 2, axis=-1, keepdims=True)
        return (y2 - mu) * jax.lax.rsqrt(var + 1e-5) * g + b

    def mha(xq2, xkv2, Lq, Skv, w_in, b_in, w_out, b_out, fuse_qkv):
        # xq2: (N*Lq, E); xkv2: (N*Skv, E)
        # w_in: (E, 3E) pre-transposed, Q part pre-scaled by 1/sqrt(dh)
        if fuse_qkv:
            qkv = jnp.dot(xq2, w_in, preferred_element_type=jnp.float32) + b_in
            q2 = qkv[:, :E]
            kv2 = qkv[:, E:]
        else:
            q2 = (jnp.dot(xq2, w_in[:, :E],
                          preferred_element_type=jnp.float32) + b_in[:, :E])
            kv2 = (jnp.dot(xkv2, w_in[:, E:],
                           preferred_element_type=jnp.float32) + b_in[:, E:])
        q3 = q2.reshape(N, Lq, E)
        k3 = kv2[:, :E].reshape(N, Skv, E)
        v3 = kv2[:, E:].reshape(N, Skv, E)

        head_outs = []
        for h in range(H):                       # unrolled, H is tiny
            lo = h * dh
            qh = q3[:, :, lo:lo + dh]            # (N, Lq, dh)
            kh = k3[:, :, lo:lo + dh]            # (N, Skv, dh)
            vh = v3[:, :, lo:lo + dh]            # (N, Skv, dh)
            # contract over dh directly (no explicit K transpose)
            s = jnp.einsum("nld,nsd->nls", qh, kh,
                           preferred_element_type=jnp.float32)
            s = s - jnp.max(s, axis=-1, keepdims=True)
            p = jnp.exp(s)
            p = p * pl.reciprocal(jnp.sum(p, axis=-1, keepdims=True),
                                  approx=True)
            oh = jnp.einsum("nls,nsd->nld", p, vh,
                            preferred_element_type=jnp.float32)
            head_outs.append(oh.reshape(N * Lq, dh))
        o2 = jnp.concatenate(head_outs, axis=-1)             # (N*Lq, E)
        return jnp.dot(o2, w_out, preferred_element_type=jnp.float32) + b_out

    for l in range(num_layers):                  # unrolled, num_layers = 2
        # ---- self-attention + residual + norm1 ----
        a2 = mha(x2, x2, L, L,
                 w_in_s_ref[l], b_in_s_ref[l],
                 w_out_s_ref[l], b_out_s_ref[l], fuse_qkv=True)
        x2 = layer_norm(x2 + a2, g1_ref[l], be1_ref[l])
        # ---- cross-attention + residual + norm2 ----
        a2 = mha(x2, m2, L, S,
                 w_in_c_ref[l], b_in_c_ref[l],
                 w_out_c_ref[l], b_out_c_ref[l], fuse_qkv=False)
        x2 = layer_norm(x2 + a2, g2_ref[l], be2_ref[l])
        # ---- feed-forward + residual (reference layer has NO norm here) ----
        h2 = jnp.maximum(
            jnp.dot(x2, w1_ref[l], preferred_element_type=jnp.float32)
            + b1_ref[l], 0.0)
        x2 = x2 + (jnp.dot(h2, w2_ref[l], preferred_element_type=jnp.float32)
                   + b2_ref[l])

    # final decoder LayerNorm
    x2 = layer_norm(x2, gf_ref[...], bf_ref[...])
    o_ref[...] = x2.reshape(N, L, E).astype(o_ref.dtype)


# ----------------------------------------------------------------------------
# Wrapper
# ----------------------------------------------------------------------------

_PREP_KEYS = (
    "w_in_self", "b_in_self", "w_out_self", "b_out_self",
    "w_in_cross", "b_in_cross", "w_out_cross", "b_out_cross",
    "norm1_g", "norm1_b", "norm2_g", "norm2_b",
    "w_fc1", "b_fc1", "w_fc2", "b_fc2",
)


def performer_decoder(tgt, memory, prepped, *, num_heads):
    """tgt: (L, N, E); memory: (S, N, E) — PyTorch seq-first layout."""
    L, N, E = tgt.shape
    S = memory.shape[0]
    num_layers = prepped["w_in_self"].shape[0]
    d_ff = prepped["w_fc1"].shape[-1]

    tgt_bf = jnp.transpose(tgt, (1, 0, 2))       # (N, L, E)
    mem_bf = jnp.transpose(memory, (1, 0, 2))    # (N, S, E)

    operands = [tgt_bf, mem_bf] + [prepped[k] for k in _PREP_KEYS] + [
        prepped["normf_g"], prepped["normf_b"]]

    # Advisory cost hint for the single fused custom call.
    M, Ms = N * L, N * S
    flops = num_layers * (
        2 * M * E * (3 * E)            # self-attn fused QKV
        + 4 * N * L * L * E            # self-attn scores + AV
        + 2 * M * E * E                # self-attn out proj
        + 2 * M * E * E                # cross-attn Q proj
        + 2 * Ms * E * (2 * E)         # cross-attn KV proj
        + 4 * N * L * S * E            # cross-attn scores + AV
        + 2 * M * E * E                # cross-attn out proj
        + 4 * M * E * d_ff             # FFN fc1 + fc2
    )
    transcendentals = num_layers * (num_heads * N * L * (L + S) + 4 * M)
    bytes_accessed = (sum(int(a.size) * a.dtype.itemsize for a in operands)
                      + N * L * E * 4)
    cost = pl.CostEstimate(flops=flops, transcendentals=transcendentals,
                           bytes_accessed=bytes_accessed)

    kernel = functools.partial(_fused_decoder_kernel,
                               num_layers=num_layers, num_heads=num_heads)

    out_bf = pl.pallas_call(
        kernel,
        out_shape=jax.ShapeDtypeStruct((N, L, E), tgt.dtype),
        cost_estimate=cost,
    )(*operands)

    return jnp.transpose(out_bf, (1, 0, 2))      # back to (L, N, E)


# ----------------------------------------------------------------------------
# Parameter init (torch layouts) + one-time preparation (transpose/stack/scale)
# ----------------------------------------------------------------------------

def _init_mha(key, d_model):
    k1, k2, k3, k4 = jax.random.split(key, 4)
    s = 1.0 / math.sqrt(d_model)
    return {
        "in_proj_weight": jax.random.normal(k1, (3 * d_model, d_model), jnp.float32) * s,
        "in_proj_bias": jax.random.normal(k2, (3 * d_model,), jnp.float32) * s,
        "out_proj_weight": jax.random.normal(k3, (d_model, d_model), jnp.float32) * s,
        "out_proj_bias": jax.random.normal(k4, (d_model,), jnp.float32) * s,
    }


def init_params(key, num_layers, d_model, d_ff):
    layers = []
    for i in range(num_layers):
        lk = jax.random.fold_in(key, i)
        k_sa, k_ca, k_f1w, k_f1b, k_f2w, k_f2b = jax.random.split(lk, 6)
        layers.append({
            "self_attn": _init_mha(k_sa, d_model),
            "cross_attn": _init_mha(k_ca, d_model),
            "fc1_w": jax.random.normal(k_f1w, (d_ff, d_model), jnp.float32) / math.sqrt(d_model),
            "fc1_b": jax.random.normal(k_f1b, (d_ff,), jnp.float32) * 0.01,
            "fc2_w": jax.random.normal(k_f2w, (d_model, d_ff), jnp.float32) / math.sqrt(d_ff),
            "fc2_b": jax.random.normal(k_f2b, (d_model,), jnp.float32) * 0.01,
            "norm1_gamma": jnp.ones((d_model,), jnp.float32),
            "norm1_beta": jnp.zeros((d_model,), jnp.float32),
            "norm2_gamma": jnp.ones((d_model,), jnp.float32),
            "norm2_beta": jnp.zeros((d_model,), jnp.float32),
        })
        # TODO(synk): random_features / projection Linears exist in __init__ but
        # are unused in forward(), so they are intentionally omitted.
    return {
        "layers": layers,
        "norm_gamma": jnp.ones((d_model,), jnp.float32),
        "norm_beta": jnp.zeros((d_model,), jnp.float32),
    }


def prepare_params(params, num_heads):
    """One-time: transpose weights, reshape biases, fold 1/sqrt(dh) into Q."""
    d_model = params["norm_gamma"].shape[0]
    dh = d_model // num_heads
    scale = 1.0 / math.sqrt(dh)

    def prep_mha(p):
        w_q, w_k, w_v = jnp.split(p["in_proj_weight"], 3, axis=0)
        b_q, b_k, b_v = jnp.split(p["in_proj_bias"], 3, axis=0)
        w_in_t = jnp.concatenate([w_q.T * scale, w_k.T, w_v.T], axis=1)  # (E,3E)
        b_in = jnp.concatenate([b_q * scale, b_k, b_v]).reshape(1, -1)   # (1,3E)
        return (w_in_t, b_in,
                p["out_proj_weight"].T, p["out_proj_bias"].reshape(1, -1))

    stacks = {k: [] for k in _PREP_KEYS}
    for lp in params["layers"]:
        wi, bi, wo, bo = prep_mha(lp["self_attn"])
        stacks["w_in_self"].append(wi); stacks["b_in_self"].append(bi)
        stacks["w_out_self"].append(wo); stacks["b_out_self"].append(bo)
        wi, bi, wo, bo = prep_mha(lp["cross_attn"])
        stacks["w_in_cross"].append(wi); stacks["b_in_cross"].append(bi)
        stacks["w_out_cross"].append(wo); stacks["b_out_cross"].append(bo)
        stacks["norm1_g"].append(lp["norm1_gamma"].reshape(1, -1))
        stacks["norm1_b"].append(lp["norm1_beta"].reshape(1, -1))
        stacks["norm2_g"].append(lp["norm2_gamma"].reshape(1, -1))
        stacks["norm2_b"].append(lp["norm2_beta"].reshape(1, -1))
        stacks["w_fc1"].append(lp["fc1_w"].T)
        stacks["b_fc1"].append(lp["fc1_b"].reshape(1, -1))
        stacks["w_fc2"].append(lp["fc2_w"].T)
        stacks["b_fc2"].append(lp["fc2_b"].reshape(1, -1))

    prepped = {k: jnp.stack(v, axis=0) for k, v in stacks.items()}
    prepped["normf_g"] = params["norm_gamma"].reshape(1, -1)
    prepped["normf_b"] = params["norm_beta"].reshape(1, -1)
    return prepped


# ----------------------------------------------------------------------------
# Main
# ----------------------------------------------------------------------------

if __name__ == "__main__":
    num_layers, d_model, num_heads, d_ff, dropout = 2, 32, 4, 64, 0.1
    L, S, N = 8, 8, 2   # tgt seq, memory seq, batch

    params = init_params(jax.random.PRNGKey(0), num_layers, d_model, d_ff)
    prepped = prepare_params(params, num_heads)

    kt, km = jax.random.split(jax.random.PRNGKey(0), 2)
    tgt = jax.random.normal(kt, (L, N, d_model), jnp.float32)
    memory = jax.random.normal(km, (S, N, d_model), jnp.float32)

    fwd = jax.jit(functools.partial(performer_decoder, num_heads=num_heads))
    out = fwd(tgt, memory, prepped)
    out = jax.block_until_ready(out)

    assert out.shape == (L, N, d_model)
    assert bool(jnp.all(jnp.isfinite(out)))
    print("KERNEL_OK")
</pallas_src>

<mosaic_0001>
module attributes {stable_mosaic.version = 11 : i64} {
  func.func @_fused_decoder_kernel(%arg0: memref<2x8x32xf32, #tpu.memory_space<vmem>>, %arg1: memref<2x8x32xf32, #tpu.memory_space<vmem>>, %arg2: memref<2x32x96xf32, #tpu.memory_space<vmem>>, %arg3: memref<2x1x96xf32, #tpu.memory_space<vmem>>, %arg4: memref<2x32x32xf32, #tpu.memory_space<vmem>>, %arg5: memref<2x1x32xf32, #tpu.memory_space<vmem>>, %arg6: memref<2x32x96xf32, #tpu.memory_space<vmem>>, %arg7: memref<2x1x96xf32, #tpu.memory_space<vmem>>, %arg8: memref<2x32x32xf32, #tpu.memory_space<vmem>>, %arg9: memref<2x1x32xf32, #tpu.memory_space<vmem>>, %arg10: memref<2x1x32xf32, #tpu.memory_space<vmem>>, %arg11: memref<2x1x32xf32, #tpu.memory_space<vmem>>, %arg12: memref<2x1x32xf32, #tpu.memory_space<vmem>>, %arg13: memref<2x1x32xf32, #tpu.memory_space<vmem>>, %arg14: memref<2x32x64xf32, #tpu.memory_space<vmem>>, %arg15: memref<2x1x64xf32, #tpu.memory_space<vmem>>, %arg16: memref<2x64x32xf32, #tpu.memory_space<vmem>>, %arg17: memref<2x1x32xf32, #tpu.memory_space<vmem>>, %arg18: memref<1x32xf32, #tpu.memory_space<vmem>>, %arg19: memref<1x32xf32, #tpu.memory_space<vmem>>, %arg20: memref<2x8x32xf32, #tpu.memory_space<vmem>>) attributes {dimension_semantics = [], scalar_prefetch = 0 : i64, scratch_operands = 0 : i64, tpu.core_type = #tpu.core_type<tc>} {
    %c0 = arith.constant 0 : index
    %c0_0 = arith.constant 0 : index
    %c0_1 = arith.constant 0 : index
    %0 = vector.load %arg0[%c0, %c0_0, %c0_1] : memref<2x8x32xf32, #tpu.memory_space<vmem>>, vector<2x8x32xf32>
    %1 = vector.shape_cast %0 : vector<2x8x32xf32> to vector<16x32xf32>
    %c0_2 = arith.constant 0 : index
    %c0_3 = arith.constant 0 : index
    %c0_4 = arith.constant 0 : index
    %2 = vector.load %arg1[%c0_2, %c0_3, %c0_4] : memref<2x8x32xf32, #tpu.memory_space<vmem>>, vector<2x8x32xf32>
    %3 = vector.shape_cast %2 : vector<2x8x32xf32> to vector<16x32xf32>
    %c0_5 = arith.constant 0 : index
    %c0_6 = arith.constant 0 : index
    %c0_7 = arith.constant 0 : index
    %4 = vector.load %arg2[%c0_5, %c0_6, %c0_7] : memref<2x32x96xf32, #tpu.memory_space<vmem>>, vector<1x32x96xf32>
    %5 = vector.shape_cast %4 : vector<1x32x96xf32> to vector<32x96xf32>
    %c0_8 = arith.constant 0 : index
    %c0_9 = arith.constant 0 : index
    %c0_10 = arith.constant 0 : index
    %6 = vector.load %arg3[%c0_8, %c0_9, %c0_10] : memref<2x1x96xf32, #tpu.memory_space<vmem>>, vector<1x1x96xf32>
    %7 = vector.shape_cast %6 : vector<1x1x96xf32> to vector<1x96xf32>
    %c0_11 = arith.constant 0 : index
    %c0_12 = arith.constant 0 : index
    %c0_13 = arith.constant 0 : index
    %8 = vector.load %arg4[%c0_11, %c0_12, %c0_13] : memref<2x32x32xf32, #tpu.memory_space<vmem>>, vector<1x32x32xf32>
    %9 = vector.shape_cast %8 : vector<1x32x32xf32> to vector<32x32xf32>
    %c0_14 = arith.constant 0 : index
    %c0_15 = arith.constant 0 : index
    %c0_16 = arith.constant 0 : index
    %10 = vector.load %arg5[%c0_14, %c0_15, %c0_16] : memref<2x1x32xf32, #tpu.memory_space<vmem>>, vector<1x1x32xf32>
    %11 = vector.shape_cast %10 : vector<1x1x32xf32> to vector<1x32xf32>
    %cst = arith.constant dense<0.000000e+00> : vector<16x96xf32>
    %12 = tpu.matmul %1, %5, %cst {dimension_numbers = #tpu.dot_dimension_numbers<[1], [0], [0], [1], [0, 0, 1, 1], [], []>} : vector<16x32xf32>, vector<32x96xf32>, vector<16x96xf32> -> vector<16x96xf32>
    %13 = vector.broadcast %7 : vector<1x96xf32> to vector<16x96xf32>
    %14 = arith.addf %12, %13 : vector<16x96xf32>
    %15 = vector.extract_strided_slice %14 {offsets = [0, 0], sizes = [16, 32], strides = [1, 1]} : vector<16x96xf32> to vector<16x32xf32>
    %16 = vector.extract_strided_slice %14 {offsets = [0, 32], sizes = [16, 64], strides = [1, 1]} : vector<16x96xf32> to vector<16x64xf32>
    %17 = vector.shape_cast %15 : vector<16x32xf32> to vector<2x8x32xf32>
    %18 = vector.extract_strided_slice %16 {offsets = [0, 0], sizes = [16, 32], strides = [1, 1]} : vector<16x64xf32> to vector<16x32xf32>
    %19 = vector.shape_cast %18 : vector<16x32xf32> to vector<2x8x32xf32>
    %20 = vector.extract_strided_slice %16 {offsets = [0, 32], sizes = [16, 32], strides = [1, 1]} : vector<16x64xf32> to vector<16x32xf32>
    %21 = vector.shape_cast %20 : vector<16x32xf32> to vector<2x8x32xf32>
    %22 = vector.extract_strided_slice %17 {offsets = [0, 0, 0], sizes = [2, 8, 8], strides = [1, 1, 1]} : vector<2x8x32xf32> to vector<2x8x8xf32>
    %23 = vector.extract_strided_slice %19 {offsets = [0, 0, 0], sizes = [2, 8, 8], strides = [1, 1, 1]} : vector<2x8x32xf32> to vector<2x8x8xf32>
    %24 = vector.extract_strided_slice %21 {offsets = [0, 0, 0], sizes = [2, 8, 8], strides = [1, 1, 1]} : vector<2x8x32xf32> to vector<2x8x8xf32>
    "tpu.trace_start"() <{level = 10 : i32, message = "nld,nsd->nls"}> : () -> ()
    %cst_17 = arith.constant dense<0.000000e+00> : vector<2x8x8xf32>
    %25 = tpu.matmul %22, %23, %cst_17 {dimension_numbers = #tpu.dot_dimension_numbers<[2], [2], [1], [1], [0, 0, 0, 1, 1, 1], [0], [0]>} : vector<2x8x8xf32>, vector<2x8x8xf32>, vector<2x8x8xf32> -> vector<2x8x8xf32>
    "tpu.trace_stop"() : () -> ()
    %cst_18 = arith.constant dense<0xFF800000> : vector<2x8xf32>
    %26 = vector.multi_reduction <maximumf>, %25, %cst_18 [2] : vector<2x8x8xf32> to vector<2x8xf32>
    %27 = vector.shape_cast %26 : vector<2x8xf32> to vector<2x8x1xf32>
    %28 = vector.broadcast %27 : vector<2x8x1xf32> to vector<2x8x8xf32>
    %29 = arith.subf %25, %28 : vector<2x8x8xf32>
    %30 = math.exp %29 : vector<2x8x8xf32>
    %cst_19 = arith.constant dense<0.000000e+00> : vector<2x8xf32>
    %31 = vector.multi_reduction <add>, %30, %cst_19 [2] : vector<2x8x8xf32> to vector<2x8xf32>
    %32 = vector.shape_cast %31 : vector<2x8xf32> to vector<2x8x1xf32>
    %33 = tpu.reciprocal %32 {approx = true} : vector<2x8x1xf32> -> vector<2x8x1xf32>
    %34 = vector.broadcast %33 : vector<2x8x1xf32> to vector<2x8x8xf32>
    %35 = arith.mulf %30, %34 : vector<2x8x8xf32>
    "tpu.trace_start"() <{level = 10 : i32, message = "nls,nsd->nld"}> : () -> ()
    %cst_20 = arith.constant dense<0.000000e+00> : vector<2x8x8xf32>
    %36 = tpu.matmul %35, %24, %cst_20 {dimension_numbers = #tpu.dot_dimension_numbers<[2], [1], [1], [2], [0, 0, 0, 1, 1, 2], [0], [0]>} : vector<2x8x8xf32>, vector<2x8x8xf32>, vector<2x8x8xf32> -> vector<2x8x8xf32>
    "tpu.trace_stop"() : () -> ()
    %37 = vector.shape_cast %36 : vector<2x8x8xf32> to vector<16x8xf32>
    %38 = vector.extract_strided_slice %17 {offsets = [0, 0, 8], sizes = [2, 8, 8], strides = [1, 1, 1]} : vector<2x8x32xf32> to vector<2x8x8xf32>
    %39 = vector.extract_strided_slice %19 {offsets = [0, 0, 8], sizes = [2, 8, 8], strides = [1, 1, 1]} : vector<2x8x32xf32> to vector<2x8x8xf32>
    %40 = vector.extract_strided_slice %21 {offsets = [0, 0, 8], sizes = [2, 8, 8], strides = [1, 1, 1]} : vector<2x8x32xf32> to vector<2x8x8xf32>
    "tpu.trace_start"() <{level = 10 : i32, message = "nld,nsd->nls"}> : () -> ()
    %cst_21 = arith.constant dense<0.000000e+00> : vector<2x8x8xf32>
    %41 = tpu.matmul %38, %39, %cst_21 {dimension_numbers = #tpu.dot_dimension_numbers<[2], [2], [1], [1], [0, 0, 0, 1, 1, 1], [0], [0]>} : vector<2x8x8xf32>, vector<2x8x8xf32>, vector<2x8x8xf32> -> vector<2x8x8xf32>
    "tpu.trace_stop"() : () -> ()
    %cst_22 = arith.constant dense<0xFF800000> : vector<2x8xf32>
    %42 = vector.multi_reduction <maximumf>, %41, %cst_22 [2] : vector<2x8x8xf32> to vector<2x8xf32>
    %43 = vector.shape_cast %42 : vector<2x8xf32> to vector<2x8x1xf32>
    %44 = vector.broadcast %43 : vector<2x8x1xf32> to vector<2x8x8xf32>
    %45 = arith.subf %41, %44 : vector<2x8x8xf32>
    %46 = math.exp %45 : vector<2x8x8xf32>
    %cst_23 = arith.constant dense<0.000000e+00> : vector<2x8xf32>
    %47 = vector.multi_reduction <add>, %46, %cst_23 [2] : vector<2x8x8xf32> to vector<2x8xf32>
    %48 = vector.shape_cast %47 : vector<2x8xf32> to vector<2x8x1xf32>
    %49 = tpu.reciprocal %48 {approx = true} : vector<2x8x1xf32> -> vector<2x8x1xf32>
    %50 = vector.broadcast %49 : vector<2x8x1xf32> to vector<2x8x8xf32>
    %51 = arith.mulf %46, %50 : vector<2x8x8xf32>
    "tpu.trace_start"() <{level = 10 : i32, message = "nls,nsd->nld"}> : () -> ()
    %cst_24 = arith.constant dense<0.000000e+00> : vector<2x8x8xf32>
    %52 = tpu.matmul %51, %40, %cst_24 {dimension_numbers = #tpu.dot_dimension_numbers<[2], [1], [1], [2], [0, 0, 0, 1, 1, 2], [0], [0]>} : vector<2x8x8xf32>, vector<2x8x8xf32>, vector<2x8x8xf32> -> vector<2x8x8xf32>
    "tpu.trace_stop"() : () -> ()
    %53 = vector.shape_cast %52 : vector<2x8x8xf32> to vector<16x8xf32>
    %54 = vector.extract_strided_slice %17 {offsets = [0, 0, 16], sizes = [2, 8, 8], strides = [1, 1, 1]} : vector<2x8x32xf32> to vector<2x8x8xf32>
    %55 = vector.extract_strided_slice %19 {offsets = [0, 0, 16], sizes = [2, 8, 8], strides = [1, 1, 1]} : vector<2x8x32xf32> to vector<2x8x8xf32>
    %56 = vector.extract_strided_slice %21 {offsets = [0, 0, 16], sizes = [2, 8, 8], strides = [1, 1, 1]} : vector<2x8x32xf32> to vector<2x8x8xf32>
    "tpu.trace_start"() <{level = 10 : i32, message = "nld,nsd->nls"}> : () -> ()
    %cst_25 = arith.constant dense<0.000000e+00> : vector<2x8x8xf32>
    %57 = tpu.matmul %54, %55, %cst_25 {dimension_numbers = #tpu.dot_dimension_numbers<[2], [2], [1], [1], [0, 0, 0, 1, 1, 1], [0], [0]>} : vector<2x8x8xf32>, vector<2x8x8xf32>, vector<2x8x8xf32> -> vector<2x8x8xf32>
    "tpu.trace_stop"() : () -> ()
    %cst_26 = arith.constant dense<0xFF800000> : vector<2x8xf32>
    %58 = vector.multi_reduction <maximumf>, %57, %cst_26 [2] : vector<2x8x8xf32> to vector<2x8xf32>
    %59 = vector.shape_cast %58 : vector<2x8xf32> to vector<2x8x1xf32>
    %60 = vector.broadcast %59 : vector<2x8x1xf32> to vector<2x8x8xf32>
    %61 = arith.subf %57, %60 : vector<2x8x8xf32>
    %62 = math.exp %61 : vector<2x8x8xf32>
    %cst_27 = arith.constant dense<0.000000e+00> : vector<2x8xf32>
    %63 = vector.multi_reduction <add>, %62, %cst_27 [2] : vector<2x8x8xf32> to vector<2x8xf32>
    %64 = vector.shape_cast %63 : vector<2x8xf32> to vector<2x8x1xf32>
    %65 = tpu.reciprocal %64 {approx = true} : vector<2x8x1xf32> -> vector<2x8x1xf32>
    %66 = vector.broadcast %65 : vector<2x8x1xf32> to vector<2x8x8xf32>
    %67 = arith.mulf %62, %66 : vector<2x8x8xf32>
    "tpu.trace_start"() <{level = 10 : i32, message = "nls,nsd->nld"}> : () -> ()
    %cst_28 = arith.constant dense<0.000000e+00> : vector<2x8x8xf32>
    %68 = tpu.matmul %67, %56, %cst_28 {dimension_numbers = #tpu.dot_dimension_numbers<[2], [1], [1], [2], [0, 0, 0, 1, 1, 2], [0], [0]>} : vector<2x8x8xf32>, vector<2x8x8xf32>, vector<2x8x8xf32> -> vector<2x8x8xf32>
    "tpu.trace_stop"() : () -> ()
    %69 = vector.shape_cast %68 : vector<2x8x8xf32> to vector<16x8xf32>
    %70 = vector.extract_strided_slice %17 {offsets = [0, 0, 24], sizes = [2, 8, 8], strides = [1, 1, 1]} : vector<2x8x32xf32> to vector<2x8x8xf32>
    %71 = vector.extract_strided_slice %19 {offsets = [0, 0, 24], sizes = [2, 8, 8], strides = [1, 1, 1]} : vector<2x8x32xf32> to vector<2x8x8xf32>
    %72 = vector.extract_strided_slice %21 {offsets = [0, 0, 24], sizes = [2, 8, 8], strides = [1, 1, 1]} : vector<2x8x32xf32> to vector<2x8x8xf32>
    "tpu.trace_start"() <{level = 10 : i32, message = "nld,nsd->nls"}> : () -> ()
    %cst_29 = arith.constant dense<0.000000e+00> : vector<2x8x8xf32>
    %73 = tpu.matmul %70, %71, %cst_29 {dimension_numbers = #tpu.dot_dimension_numbers<[2], [2], [1], [1], [0, 0, 0, 1, 1, 1], [0], [0]>} : vector<2x8x8xf32>, vector<2x8x8xf32>, vector<2x8x8xf32> -> vector<2x8x8xf32>
    "tpu.trace_stop"() : () -> ()
    %cst_30 = arith.constant dense<0xFF800000> : vector<2x8xf32>
    %74 = vector.multi_reduction <maximumf>, %73, %cst_30 [2] : vector<2x8x8xf32> to vector<2x8xf32>
    %75 = vector.shape_cast %74 : vector<2x8xf32> to vector<2x8x1xf32>
    %76 = vector.broadcast %75 : vector<2x8x1xf32> to vector<2x8x8xf32>
    %77 = arith.subf %73, %76 : vector<2x8x8xf32>
    %78 = math.exp %77 : vector<2x8x8xf32>
    %cst_31 = arith.constant dense<0.000000e+00> : vector<2x8xf32>
    %79 = vector.multi_reduction <add>, %78, %cst_31 [2] : vector<2x8x8xf32> to vector<2x8xf32>
    %80 = vector.shape_cast %79 : vector<2x8xf32> to vector<2x8x1xf32>
    %81 = tpu.reciprocal %80 {approx = true} : vector<2x8x1xf32> -> vector<2x8x1xf32>
    %82 = vector.broadcast %81 : vector<2x8x1xf32> to vector<2x8x8xf32>
    %83 = arith.mulf %78, %82 : vector<2x8x8xf32>
    "tpu.trace_start"() <{level = 10 : i32, message = "nls,nsd->nld"}> : () -> ()
    %cst_32 = arith.constant dense<0.000000e+00> : vector<2x8x8xf32>
    %84 = tpu.matmul %83, %72, %cst_32 {dimension_numbers = #tpu.dot_dimension_numbers<[2], [1], [1], [2], [0, 0, 0, 1, 1, 2], [0], [0]>} : vector<2x8x8xf32>, vector<2x8x8xf32>, vector<2x8x8xf32> -> vector<2x8x8xf32>
    "tpu.trace_stop"() : () -> ()
    %85 = vector.shape_cast %84 : vector<2x8x8xf32> to vector<16x8xf32>
    %86 = tpu.concatenate %37, %53, %69, %85 in 1 : vector<16x8xf32>, vector<16x8xf32>, vector<16x8xf32>, vector<16x8xf32> -> vector<16x32xf32>
    %cst_33 = arith.constant dense<0.000000e+00> : vector<16x32xf32>
    %87 = tpu.matmul %86, %9, %cst_33 {dimension_numbers = #tpu.dot_dimension_numbers<[1], [0], [0], [1], [0, 0, 1, 1], [], []>} : vector<16x32xf32>, vector<32x32xf32>, vector<16x32xf32> -> vector<16x32xf32>
    %88 = vector.broadcast %11 : vector<1x32xf32> to vector<16x32xf32>
    %89 = arith.addf %87, %88 : vector<16x32xf32>
    %90 = arith.addf %1, %89 : vector<16x32xf32>
    %c0_34 = arith.constant 0 : index
    %c0_35 = arith.constant 0 : index
    %c0_36 = arith.constant 0 : index
    %91 = vector.load %arg10[%c0_34, %c0_35, %c0_36] : memref<2x1x32xf32, #tpu.memory_space<vmem>>, vector<1x1x32xf32>
    %92 = vector.shape_cast %91 : vector<1x1x32xf32> to vector<1x32xf32>
    %c0_37 = arith.constant 0 : index
    %c0_38 = arith.constant 0 : index
    %c0_39 = arith.constant 0 : index
    %93 = vector.load %arg11[%c0_37, %c0_38, %c0_39] : memref<2x1x32xf32, #tpu.memory_space<vmem>>, vector<1x1x32xf32>
    %94 = vector.shape_cast %93 : vector<1x1x32xf32> to vector<1x32xf32>
    %cst_40 = arith.constant dense<0.000000e+00> : vector<16xf32>
    %95 = vector.multi_reduction <add>, %90, %cst_40 [1] : vector<16x32xf32> to vector<16xf32>
    %96 = vector.shape_cast %95 : vector<16xf32> to vector<16x1xf32>
    %cst_41 = arith.constant 3.200000e+01 : f32
    %97 = vector.broadcast %cst_41 : f32 to vector<16x1xf32>
    %98 = arith.divf %96, %97 : vector<16x1xf32>
    %99 = vector.broadcast %98 : vector<16x1xf32> to vector<16x32xf32>
    %100 = arith.subf %90, %99 : vector<16x32xf32>
    %101 = arith.mulf %100, %100 : vector<16x32xf32>
    %cst_42 = arith.constant dense<0.000000e+00> : vector<16xf32>
    %102 = vector.multi_reduction <add>, %101, %cst_42 [1] : vector<16x32xf32> to vector<16xf32>
    %103 = vector.shape_cast %102 : vector<16xf32> to vector<16x1xf32>
    %cst_43 = arith.constant 3.200000e+01 : f32
    %104 = vector.broadcast %cst_43 : f32 to vector<16x1xf32>
    %105 = arith.divf %103, %104 : vector<16x1xf32>
    %106 = vector.broadcast %98 : vector<16x1xf32> to vector<16x32xf32>
    %107 = arith.subf %90, %106 : vector<16x32xf32>
    %cst_44 = arith.constant 9.99999974E-6 : f32
    %108 = vector.broadcast %cst_44 : f32 to vector<16x1xf32>
    %109 = arith.addf %105, %108 : vector<16x1xf32>
    %110 = math.rsqrt %109 : vector<16x1xf32>
    %111 = vector.broadcast %110 : vector<16x1xf32> to vector<16x32xf32>
    %112 = arith.mulf %107, %111 : vector<16x32xf32>
    %113 = vector.broadcast %92 : vector<1x32xf32> to vector<16x32xf32>
    %114 = arith.mulf %112, %113 : vector<16x32xf32>
    %115 = vector.broadcast %94 : vector<1x32xf32> to vector<16x32xf32>
    %116 = arith.addf %114, %115 : vector<16x32xf32>
    %c0_45 = arith.constant 0 : index
    %c0_46 = arith.constant 0 : index
    %c0_47 = arith.constant 0 : index
    %117 = vector.load %arg6[%c0_45, %c0_46, %c0_47] : memref<2x32x96xf32, #tpu.memory_space<vmem>>, vector<1x32x96xf32>
    %118 = vector.shape_cast %117 : vector<1x32x96xf32> to vector<32x96xf32>
    %c0_48 = arith.constant 0 : index
    %c0_49 = arith.constant 0 : index
    %c0_50 = arith.constant 0 : index
    %119 = vector.load %arg7[%c0_48, %c0_49, %c0_50] : memref<2x1x96xf32, #tpu.memory_space<vmem>>, vector<1x1x96xf32>
    %120 = vector.shape_cast %119 : vector<1x1x96xf32> to vector<1x96xf32>
    %c0_51 = arith.constant 0 : index
    %c0_52 = arith.constant 0 : index
    %c0_53 = arith.constant 0 : index
    %121 = vector.load %arg8[%c0_51, %c0_52, %c0_53] : memref<2x32x32xf32, #tpu.memory_space<vmem>>, vector<1x32x32xf32>
    %122 = vector.shape_cast %121 : vector<1x32x32xf32> to vector<32x32xf32>
    %c0_54 = arith.constant 0 : index
    %c0_55 = arith.constant 0 : index
    %c0_56 = arith.constant 0 : index
    %123 = vector.load %arg9[%c0_54, %c0_55, %c0_56] : memref<2x1x32xf32, #tpu.memory_space<vmem>>, vector<1x1x32xf32>
    %124 = vector.shape_cast %123 : vector<1x1x32xf32> to vector<1x32xf32>
    %125 = vector.extract_strided_slice %118 {offsets = [0, 0], sizes = [32, 32], strides = [1, 1]} : vector<32x96xf32> to vector<32x32xf32>
    %cst_57 = arith.constant dense<0.000000e+00> : vector<16x32xf32>
    %126 = tpu.matmul %116, %125, %cst_57 {dimension_numbers = #tpu.dot_dimension_numbers<[1], [0], [0], [1], [0, 0, 1, 1], [], []>} : vector<16x32xf32>, vector<32x32xf32>, vector<16x32xf32> -> vector<16x32xf32>
    %127 = vector.extract_strided_slice %120 {offsets = [0, 0], sizes = [1, 32], strides = [1, 1]} : vector<1x96xf32> to vector<1x32xf32>
    %128 = vector.broadcast %127 : vector<1x32xf32> to vector<16x32xf32>
    %129 = arith.addf %126, %128 : vector<16x32xf32>
    %130 = vector.extract_strided_slice %118 {offsets = [0, 32], sizes = [32, 64], strides = [1, 1]} : vector<32x96xf32> to vector<32x64xf32>
    %cst_58 = arith.constant dense<0.000000e+00> : vector<16x64xf32>
    %131 = tpu.matmul %3, %130, %cst_58 {dimension_numbers = #tpu.dot_dimension_numbers<[1], [0], [0], [1], [0, 0, 1, 1], [], []>} : vector<16x32xf32>, vector<32x64xf32>, vector<16x64xf32> -> vector<16x64xf32>
    %132 = vector.extract_strided_slice %120 {offsets = [0, 32], sizes = [1, 64], strides = [1, 1]} : vector<1x96xf32> to vector<1x64xf32>
    %133 = vector.broadcast %132 : vector<1x64xf32> to vector<16x64xf32>
    %134 = arith.addf %131, %133 : vector<16x64xf32>
    %135 = vector.shape_cast %129 : vector<16x32xf32> to vector<2x8x32xf32>
    %136 = vector.extract_strided_slice %134 {offsets = [0, 0], sizes = [16, 32], strides = [1, 1]} : vector<16x64xf32> to vector<16x32xf32>
    %137 = vector.shape_cast %136 : vector<16x32xf32> to vector<2x8x32xf32>
    %138 = vector.extract_strided_slice %134 {offsets = [0, 32], sizes = [16, 32], strides = [1, 1]} : vector<16x64xf32> to vector<16x32xf32>
    %139 = vector.shape_cast %138 : vector<16x32xf32> to vector<2x8x32xf32>
    %140 = vector.extract_strided_slice %135 {offsets = [0, 0, 0], sizes = [2, 8, 8], strides = [1, 1, 1]} : vector<2x8x32xf32> to vector<2x8x8xf32>
    %141 = vector.extract_strided_slice %137 {offsets = [0, 0, 0], sizes = [2, 8, 8], strides = [1, 1, 1]} : vector<2x8x32xf32> to vector<2x8x8xf32>
    %142 = vector.extract_strided_slice %139 {offsets = [0, 0, 0], sizes = [2, 8, 8], strides = [1, 1, 1]} : vector<2x8x32xf32> to vector<2x8x8xf32>
    "tpu.trace_start"() <{level = 10 : i32, message = "nld,nsd->nls"}> : () -> ()
    %cst_59 = arith.constant dense<0.000000e+00> : vector<2x8x8xf32>
    %143 = tpu.matmul %140, %141, %cst_59 {dimension_numbers = #tpu.dot_dimension_numbers<[2], [2], [1], [1], [0, 0, 0, 1, 1, 1], [0], [0]>} : vector<2x8x8xf32>, vector<2x8x8xf32>, vector<2x8x8xf32> -> vector<2x8x8xf32>
    "tpu.trace_stop"() : () -> ()
    %cst_60 = arith.constant dense<0xFF800000> : vector<2x8xf32>
    %144 = vector.multi_reduction <maximumf>, %143, %cst_60 [2] : vector<2x8x8xf32> to vector<2x8xf32>
    %145 = vector.shape_cast %144 : vector<2x8xf32> to vector<2x8x1xf32>
    %146 = vector.broadcast %145 : vector<2x8x1xf32> to vector<2x8x8xf32>
    %147 = arith.subf %143, %146 : vector<2x8x8xf32>
    %148 = math.exp %147 : vector<2x8x8xf32>
    %cst_61 = arith.constant dense<0.000000e+00> : vector<2x8xf32>
    %149 = vector.multi_reduction <add>, %148, %cst_61 [2] : vector<2x8x8xf32> to vector<2x8xf32>
    %150 = vector.shape_cast %149 : vector<2x8xf32> to vector<2x8x1xf32>
    %151 = tpu.reciprocal %150 {approx = true} : vector<2x8x1xf32> -> vector<2x8x1xf32>
    %152 = vector.broadcast %151 : vector<2x8x1xf32> to vector<2x8x8xf32>
    %153 = arith.mulf %148, %152 : vector<2x8x8xf32>
    "tpu.trace_start"() <{level = 10 : i32, message = "nls,nsd->nld"}> : () -> ()
    %cst_62 = arith.constant dense<0.000000e+00> : vector<2x8x8xf32>
    %154 = tpu.matmul %153, %142, %cst_62 {dimension_numbers = #tpu.dot_dimension_numbers<[2], [1], [1], [2], [0, 0, 0, 1, 1, 2], [0], [0]>} : vector<2x8x8xf32>, vector<2x8x8xf32>, vector<2x8x8xf32> -> vector<2x8x8xf32>
    "tpu.trace_stop"() : () -> ()
    %155 = vector.shape_cast %154 : vector<2x8x8xf32> to vector<16x8xf32>
    %156 = vector.extract_strided_slice %135 {offsets = [0, 0, 8], sizes = [2, 8, 8], strides = [1, 1, 1]} : vector<2x8x32xf32> to vector<2x8x8xf32>
    %157 = vector.extract_strided_slice %137 {offsets = [0, 0, 8], sizes = [2, 8, 8], strides = [1, 1, 1]} : vector<2x8x32xf32> to vector<2x8x8xf32>
    %158 = vector.extract_strided_slice %139 {offsets = [0, 0, 8], sizes = [2, 8, 8], strides = [1, 1, 1]} : vector<2x8x32xf32> to vector<2x8x8xf32>
    "tpu.trace_start"() <{level = 10 : i32, message = "nld,nsd->nls"}> : () -> ()
    %cst_63 = arith.constant dense<0.000000e+00> : vector<2x8x8xf32>
    %159 = tpu.matmul %156, %157, %cst_63 {dimension_numbers = #tpu.dot_dimension_numbers<[2], [2], [1], [1], [0, 0, 0, 1, 1, 1], [0], [0]>} : vector<2x8x8xf32>, vector<2x8x8xf32>, vector<2x8x8xf32> -> vector<2x8x8xf32>
    "tpu.trace_stop"() : () -> ()
    %cst_64 = arith.constant dense<0xFF800000> : vector<2x8xf32>
    %160 = vector.multi_reduction <maximumf>, %159, %cst_64 [2] : vector<2x8x8xf32> to vector<2x8xf32>
    %161 = vector.shape_cast %160 : vector<2x8xf32> to vector<2x8x1xf32>
    %162 = vector.broadcast %161 : vector<2x8x1xf32> to vector<2x8x8xf32>
    %163 = arith.subf %159, %162 : vector<2x8x8xf32>
    %164 = math.exp %163 : vector<2x8x8xf32>
    %cst_65 = arith.constant dense<0.000000e+00> : vector<2x8xf32>
    %165 = vector.multi_reduction <add>, %164, %cst_65 [2] : vector<2x8x8xf32> to vector<2x8xf32>
    %166 = vector.shape_cast %165 : vector<2x8xf32> to vector<2x8x1xf32>
    %167 = tpu.reciprocal %166 {approx = true} : vector<2x8x1xf32> -> vector<2x8x1xf32>
    %168 = vector.broadcast %167 : vector<2x8x1xf32> to vector<2x8x8xf32>
    %169 = arith.mulf %164, %168 : vector<2x8x8xf32>
    "tpu.trace_start"() <{level = 10 : i32, message = "nls,nsd->nld"}> : () -> ()
    %cst_66 = arith.constant dense<0.000000e+00> : vector<2x8x8xf32>
    %170 = tpu.matmul %169, %158, %cst_66 {dimension_numbers = #tpu.dot_dimension_numbers<[2], [1], [1], [2], [0, 0, 0, 1, 1, 2], [0], [0]>} : vector<2x8x8xf32>, vector<2x8x8xf32>, vector<2x8x8xf32> -> vector<2x8x8xf32>
    "tpu.trace_stop"() : () -> ()
    %171 = vector.shape_cast %170 : vector<2x8x8xf32> to vector<16x8xf32>
    %172 = vector.extract_strided_slice %135 {offsets = [0, 0, 16], sizes = [2, 8, 8], strides = [1, 1, 1]} : vector<2x8x32xf32> to vector<2x8x8xf32>
    %173 = vector.extract_strided_slice %137 {offsets = [0, 0, 16], sizes = [2, 8, 8], strides = [1, 1, 1]} : vector<2x8x32xf32> to vector<2x8x8xf32>
    %174 = vector.extract_strided_slice %139 {offsets = [0, 0, 16], sizes = [2, 8, 8], strides = [1, 1, 1]} : vector<2x8x32xf32> to vector<2x8x8xf32>
    "tpu.trace_start"() <{level = 10 : i32, message = "nld,nsd->nls"}> : () -> ()
    %cst_67 = arith.constant dense<0.000000e+00> : vector<2x8x8xf32>
    %175 = tpu.matmul %172, %173, %cst_67 {dimension_numbers = #tpu.dot_dimension_numbers<[2], [2], [1], [1], [0, 0, 0, 1, 1, 1], [0], [0]>} : vector<2x8x8xf32>, vector<2x8x8xf32>, vector<2x8x8xf32> -> vector<2x8x8xf32>
    "tpu.trace_stop"() : () -> ()
    %cst_68 = arith.constant dense<0xFF800000> : vector<2x8xf32>
    %176 = vector.multi_reduction <maximumf>, %175, %cst_68 [2] : vector<2x8x8xf32> to vector<2x8xf32>
    %177 = vector.shape_cast %176 : vector<2x8xf32> to vector<2x8x1xf32>
    %178 = vector.broadcast %177 : vector<2x8x1xf32> to vector<2x8x8xf32>
    %179 = arith.subf %175, %178 : vector<2x8x8xf32>
    %180 = math.exp %179 : vector<2x8x8xf32>
    %cst_69 = arith.constant dense<0.000000e+00> : vector<2x8xf32>
    %181 = vector.multi_reduction <add>, %180, %cst_69 [2] : vector<2x8x8xf32> to vector<2x8xf32>
    %182 = vector.shape_cast %181 : vector<2x8xf32> to vector<2x8x1xf32>
    %183 = tpu.reciprocal %182 {approx = true} : vector<2x8x1xf32> -> vector<2x8x1xf32>
    %184 = vector.broadcast %183 : vector<2x8x1xf32> to vector<2x8x8xf32>
    %185 = arith.mulf %180, %184 : vector<2x8x8xf32>
    "tpu.trace_start"() <{level = 10 : i32, message = "nls,nsd->nld"}> : () -> ()
    %cst_70 = arith.constant dense<0.000000e+00> : vector<2x8x8xf32>
    %186 = tpu.matmul %185, %174, %cst_70 {dimension_numbers = #tpu.dot_dimension_numbers<[2], [1], [1], [2], [0, 0, 0, 1, 1, 2], [0], [0]>} : vector<2x8x8xf32>, vector<2x8x8xf32>, vector<2x8x8xf32> -> vector<2x8x8xf32>
    "tpu.trace_stop"() : () -> ()
    %187 = vector.shape_cast %186 : vector<2x8x8xf32> to vector<16x8xf32>
    %188 = vector.extract_strided_slice %135 {offsets = [0, 0, 24], sizes = [2, 8, 8], strides = [1, 1, 1]} : vector<2x8x32xf32> to vector<2x8x8xf32>
    %189 = vector.extract_strided_slice %137 {offsets = [0, 0, 24], sizes = [2, 8, 8], strides = [1, 1, 1]} : vector<2x8x32xf32> to vector<2x8x8xf32>
    %190 = vector.extract_strided_slice %139 {offsets = [0, 0, 24], sizes = [2, 8, 8], strides = [1, 1, 1]} : vector<2x8x32xf32> to vector<2x8x8xf32>
    "tpu.trace_start"() <{level = 10 : i32, message = "nld,nsd->nls"}> : () -> ()
    %cst_71 = arith.constant dense<0.000000e+00> : vector<2x8x8xf32>
    %191 = tpu.matmul %188, %189, %cst_71 {dimension_numbers = #tpu.dot_dimension_numbers<[2], [2], [1], [1], [0, 0, 0, 1, 1, 1], [0], [0]>} : vector<2x8x8xf32>, vector<2x8x8xf32>, vector<2x8x8xf32> -> vector<2x8x8xf32>
    "tpu.trace_stop"() : () -> ()
    %cst_72 = arith.constant dense<0xFF800000> : vector<2x8xf32>
    %192 = vector.multi_reduction <maximumf>, %191, %cst_72 [2] : vector<2x8x8xf32> to vector<2x8xf32>
    %193 = vector.shape_cast %192 : vector<2x8xf32> to vector<2x8x1xf32>
    %194 = vector.broadcast %193 : vector<2x8x1xf32> to vector<2x8x8xf32>
    %195 = arith.subf %191, %194 : vector<2x8x8xf32>
    %196 = math.exp %195 : vector<2x8x8xf32>
    %cst_73 = arith.constant dense<0.000000e+00> : vector<2x8xf32>
    %197 = vector.multi_reduction <add>, %196, %cst_73 [2] : vector<2x8x8xf32> to vector<2x8xf32>
    %198 = vector.shape_cast %197 : vector<2x8xf32> to vector<2x8x1xf32>
    %199 = tpu.reciprocal %198 {approx = true} : vector<2x8x1xf32> -> vector<2x8x1xf32>
    %200 = vector.broadcast %199 : vector<2x8x1xf32> to vector<2x8x8xf32>
    %201 = arith.mulf %196, %200 : vector<2x8x8xf32>
    "tpu.trace_start"() <{level = 10 : i32, message = "nls,nsd->nld"}> : () -> ()
    %cst_74 = arith.constant dense<0.000000e+00> : vector<2x8x8xf32>
    %202 = tpu.matmul %201, %190, %cst_74 {dimension_numbers = #tpu.dot_dimension_numbers<[2], [1], [1], [2], [0, 0, 0, 1, 1, 2], [0], [0]>} : vector<2x8x8xf32>, vector<2x8x8xf32>, vector<2x8x8xf32> -> vector<2x8x8xf32>
    "tpu.trace_stop"() : () -> ()
    %203 = vector.shape_cast %202 : vector<2x8x8xf32> to vector<16x8xf32>
    %204 = tpu.concatenate %155, %171, %187, %203 in 1 : vector<16x8xf32>, vector<16x8xf32>, vector<16x8xf32>, vector<16x8xf32> -> vector<16x32xf32>
    %cst_75 = arith.constant dense<0.000000e+00> : vector<16x32xf32>
    %205 = tpu.matmul %204, %122, %cst_75 {dimension_numbers = #tpu.dot_dimension_numbers<[1], [0], [0], [1], [0, 0, 1, 1], [], []>} : vector<16x32xf32>, vector<32x32xf32>, vector<16x32xf32> -> vector<16x32xf32>
    %206 = vector.broadcast %124 : vector<1x32xf32> to vector<16x32xf32>
    %207 = arith.addf %205, %206 : vector<16x32xf32>
    %208 = arith.addf %116, %207 : vector<16x32xf32>
    %c0_76 = arith.constant 0 : index
    %c0_77 = arith.constant 0 : index
    %c0_78 = arith.constant 0 : index
    %209 = vector.load %arg12[%c0_76, %c0_77, %c0_78] : memref<2x1x32xf32, #tpu.memory_space<vmem>>, vector<1x1x32xf32>
    %210 = vector.shape_cast %209 : vector<1x1x32xf32> to vector<1x32xf32>
    %c0_79 = arith.constant 0 : index
    %c0_80 = arith.constant 0 : index
    %c0_81 = arith.constant 0 : index
    %211 = vector.load %arg13[%c0_79, %c0_80, %c0_81] : memref<2x1x32xf32, #tpu.memory_space<vmem>>, vector<1x1x32xf32>
    %212 = vector.shape_cast %211 : vector<1x1x32xf32> to vector<1x32xf32>
    %cst_82 = arith.constant dense<0.000000e+00> : vector<16xf32>
    %213 = vector.multi_reduction <add>, %208, %cst_82 [1] : vector<16x32xf32> to vector<16xf32>
    %214 = vector.shape_cast %213 : vector<16xf32> to vector<16x1xf32>
    %cst_83 = arith.constant 3.200000e+01 : f32
    %215 = vector.broadcast %cst_83 : f32 to vector<16x1xf32>
    %216 = arith.divf %214, %215 : vector<16x1xf32>
    %217 = vector.broadcast %216 : vector<16x1xf32> to vector<16x32xf32>
    %218 = arith.subf %208, %217 : vector<16x32xf32>
    %219 = arith.mulf %218, %218 : vector<16x32xf32>
    %cst_84 = arith.constant dense<0.000000e+00> : vector<16xf32>
    %220 = vector.multi_reduction <add>, %219, %cst_84 [1] : vector<16x32xf32> to vector<16xf32>
    %221 = vector.shape_cast %220 : vector<16xf32> to vector<16x1xf32>
    %cst_85 = arith.constant 3.200000e+01 : f32
    %222 = vector.broadcast %cst_85 : f32 to vector<16x1xf32>
    %223 = arith.divf %221, %222 : vector<16x1xf32>
    %224 = vector.broadcast %216 : vector<16x1xf32> to vector<16x32xf32>
    %225 = arith.subf %208, %224 : vector<16x32xf32>
    %cst_86 = arith.constant 9.99999974E-6 : f32
    %226 = vector.broadcast %cst_86 : f32 to vector<16x1xf32>
    %227 = arith.addf %223, %226 : vector<16x1xf32>
    %228 = math.rsqrt %227 : vector<16x1xf32>
    %229 = vector.broadcast %228 : vector<16x1xf32> to vector<16x32xf32>
    %230 = arith.mulf %225, %229 : vector<16x32xf32>
    %231 = vector.broadcast %210 : vector<1x32xf32> to vector<16x32xf32>
    %232 = arith.mulf %230, %231 : vector<16x32xf32>
    %233 = vector.broadcast %212 : vector<1x32xf32> to vector<16x32xf32>
    %234 = arith.addf %232, %233 : vector<16x32xf32>
    %c0_87 = arith.constant 0 : index
    %c0_88 = arith.constant 0 : index
    %c0_89 = arith.constant 0 : index
    %235 = vector.load %arg14[%c0_87, %c0_88, %c0_89] : memref<2x32x64xf32, #tpu.memory_space<vmem>>, vector<1x32x64xf32>
    %236 = vector.shape_cast %235 : vector<1x32x64xf32> to vector<32x64xf32>
    %cst_90 = arith.constant dense<0.000000e+00> : vector<16x64xf32>
    %237 = tpu.matmul %234, %236, %cst_90 {dimension_numbers = #tpu.dot_dimension_numbers<[1], [0], [0], [1], [0, 0, 1, 1], [], []>} : vector<16x32xf32>, vector<32x64xf32>, vector<16x64xf32> -> vector<16x64xf32>
    %c0_91 = arith.constant 0 : index
    %c0_92 = arith.constant 0 : index
    %c0_93 = arith.constant 0 : index
    %238 = vector.load %arg15[%c0_91, %c0_92, %c0_93] : memref<2x1x64xf32, #tpu.memory_space<vmem>>, vector<1x1x64xf32>
    %239 = vector.shape_cast %238 : vector<1x1x64xf32> to vector<1x64xf32>
    %240 = vector.broadcast %239 : vector<1x64xf32> to vector<16x64xf32>
    %241 = arith.addf %237, %240 : vector<16x64xf32>
    %cst_94 = arith.constant 0.000000e+00 : f32
    %242 = vector.broadcast %cst_94 : f32 to vector<16x64xf32>
    %243 = arith.maximumf %241, %242 : vector<16x64xf32>
    %c0_95 = arith.constant 0 : index
    %c0_96 = arith.constant 0 : index
    %c0_97 = arith.constant 0 : index
    %244 = vector.load %arg16[%c0_95, %c0_96, %c0_97] : memref<2x64x32xf32, #tpu.memory_space<vmem>>, vector<1x64x32xf32>
    %245 = vector.shape_cast %244 : vector<1x64x32xf32> to vector<64x32xf32>
    %cst_98 = arith.constant dense<0.000000e+00> : vector<16x32xf32>
    %246 = tpu.matmul %243, %245, %cst_98 {dimension_numbers = #tpu.dot_dimension_numbers<[1], [0], [0], [1], [0, 0, 1, 1], [], []>} : vector<16x64xf32>, vector<64x32xf32>, vector<16x32xf32> -> vector<16x32xf32>
    %c0_99 = arith.constant 0 : index
    %c0_100 = arith.constant 0 : index
    %c0_101 = arith.constant 0 : index
    %247 = vector.load %arg17[%c0_99, %c0_100, %c0_101] : memref<2x1x32xf32, #tpu.memory_space<vmem>>, vector<1x1x32xf32>
    %248 = vector.shape_cast %247 : vector<1x1x32xf32> to vector<1x32xf32>
    %249 = vector.broadcast %248 : vector<1x32xf32> to vector<16x32xf32>
    %250 = arith.addf %246, %249 : vector<16x32xf32>
    %251 = arith.addf %234, %250 : vector<16x32xf32>
    %c1 = arith.constant 1 : index
    %c0_102 = arith.constant 0 : index
    %c0_103 = arith.constant 0 : index
    %252 = vector.load %arg2[%c1, %c0_102, %c0_103] : memref<2x32x96xf32, #tpu.memory_space<vmem>>, vector<1x32x96xf32>
    %253 = vector.shape_cast %252 : vector<1x32x96xf32> to vector<32x96xf32>
    %c1_104 = arith.constant 1 : index
    %c0_105 = arith.constant 0 : index
    %c0_106 = arith.constant 0 : index
    %254 = vector.load %arg3[%c1_104, %c0_105, %c0_106] : memref<2x1x96xf32, #tpu.memory_space<vmem>>, vector<1x1x96xf32>
    %255 = vector.shape_cast %254 : vector<1x1x96xf32> to vector<1x96xf32>
    %c1_107 = arith.constant 1 : index
    %c0_108 = arith.constant 0 : index
    %c0_109 = arith.constant 0 : index
    %256 = vector.load %arg4[%c1_107, %c0_108, %c0_109] : memref<2x32x32xf32, #tpu.memory_space<vmem>>, vector<1x32x32xf32>
    %257 = vector.shape_cast %256 : vector<1x32x32xf32> to vector<32x32xf32>
    %c1_110 = arith.constant 1 : index
    %c0_111 = arith.constant 0 : index
    %c0_112 = arith.constant 0 : index
    %258 = vector.load %arg5[%c1_110, %c0_111, %c0_112] : memref<2x1x32xf32, #tpu.memory_space<vmem>>, vector<1x1x32xf32>
    %259 = vector.shape_cast %258 : vector<1x1x32xf32> to vector<1x32xf32>
    %cst_113 = arith.constant dense<0.000000e+00> : vector<16x96xf32>
    %260 = tpu.matmul %251, %253, %cst_113 {dimension_numbers = #tpu.dot_dimension_numbers<[1], [0], [0], [1], [0, 0, 1, 1], [], []>} : vector<16x32xf32>, vector<32x96xf32>, vector<16x96xf32> -> vector<16x96xf32>
    %261 = vector.broadcast %255 : vector<1x96xf32> to vector<16x96xf32>
    %262 = arith.addf %260, %261 : vector<16x96xf32>
    %263 = vector.extract_strided_slice %262 {offsets = [0, 0], sizes = [16, 32], strides = [1, 1]} : vector<16x96xf32> to vector<16x32xf32>
    %264 = vector.extract_strided_slice %262 {offsets = [0, 32], sizes = [16, 64], strides = [1, 1]} : vector<16x96xf32> to vector<16x64xf32>
    %265 = vector.shape_cast %263 : vector<16x32xf32> to vector<2x8x32xf32>
    %266 = vector.extract_strided_slice %264 {offsets = [0, 0], sizes = [16, 32], strides = [1, 1]} : vector<16x64xf32> to vector<16x32xf32>
    %267 = vector.shape_cast %266 : vector<16x32xf32> to vector<2x8x32xf32>
    %268 = vector.extract_strided_slice %264 {offsets = [0, 32], sizes = [16, 32], strides = [1, 1]} : vector<16x64xf32> to vector<16x32xf32>
    %269 = vector.shape_cast %268 : vector<16x32xf32> to vector<2x8x32xf32>
    %270 = vector.extract_strided_slice %265 {offsets = [0, 0, 0], sizes = [2, 8, 8], strides = [1, 1, 1]} : vector<2x8x32xf32> to vector<2x8x8xf32>
    %271 = vector.extract_strided_slice %267 {offsets = [0, 0, 0], sizes = [2, 8, 8], strides = [1, 1, 1]} : vector<2x8x32xf32> to vector<2x8x8xf32>
    %272 = vector.extract_strided_slice %269 {offsets = [0, 0, 0], sizes = [2, 8, 8], strides = [1, 1, 1]} : vector<2x8x32xf32> to vector<2x8x8xf32>
    "tpu.trace_start"() <{level = 10 : i32, message = "nld,nsd->nls"}> : () -> ()
    %cst_114 = arith.constant dense<0.000000e+00> : vector<2x8x8xf32>
    %273 = tpu.matmul %270, %271, %cst_114 {dimension_numbers = #tpu.dot_dimension_numbers<[2], [2], [1], [1], [0, 0, 0, 1, 1, 1], [0], [0]>} : vector<2x8x8xf32>, vector<2x8x8xf32>, vector<2x8x8xf32> -> vector<2x8x8xf32>
    "tpu.trace_stop"() : () -> ()
    %cst_115 = arith.constant dense<0xFF800000> : vector<2x8xf32>
    %274 = vector.multi_reduction <maximumf>, %273, %cst_115 [2] : vector<2x8x8xf32> to vector<2x8xf32>
    %275 = vector.shape_cast %274 : vector<2x8xf32> to vector<2x8x1xf32>
    %276 = vector.broadcast %275 : vector<2x8x1xf32> to vector<2x8x8xf32>
    %277 = arith.subf %273, %276 : vector<2x8x8xf32>
    %278 = math.exp %277 : vector<2x8x8xf32>
    %cst_116 = arith.constant dense<0.000000e+00> : vector<2x8xf32>
    %279 = vector.multi_reduction <add>, %278, %cst_116 [2] : vector<2x8x8xf32> to vector<2x8xf32>
    %280 = vector.shape_cast %279 : vector<2x8xf32> to vector<2x8x1xf32>
    %281 = tpu.reciprocal %280 {approx = true} : vector<2x8x1xf32> -> vector<2x8x1xf32>
    %282 = vector.broadcast %281 : vector<2x8x1xf32> to vector<2x8x8xf32>
    %283 = arith.mulf %278, %282 : vector<2x8x8xf32>
    "tpu.trace_start"() <{level = 10 : i32, message = "nls,nsd->nld"}> : () -> ()
    %cst_117 = arith.constant dense<0.000000e+00> : vector<2x8x8xf32>
    %284 = tpu.matmul %283, %272, %cst_117 {dimension_numbers = #tpu.dot_dimension_numbers<[2], [1], [1], [2], [0, 0, 0, 1, 1, 2], [0], [0]>} : vector<2x8x8xf32>, vector<2x8x8xf32>, vector<2x8x8xf32> -> vector<2x8x8xf32>
    "tpu.trace_stop"() : () -> ()
    %285 = vector.shape_cast %284 : vector<2x8x8xf32> to vector<16x8xf32>
    %286 = vector.extract_strided_slice %265 {offsets = [0, 0, 8], sizes = [2, 8, 8], strides = [1, 1, 1]} : vector<2x8x32xf32> to vector<2x8x8xf32>
    %287 = vector.extract_strided_slice %267 {offsets = [0, 0, 8], sizes = [2, 8, 8], strides = [1, 1, 1]} : vector<2x8x32xf32> to vector<2x8x8xf32>
    %288 = vector.extract_strided_slice %269 {offsets = [0, 0, 8], sizes = [2, 8, 8], strides = [1, 1, 1]} : vector<2x8x32xf32> to vector<2x8x8xf32>
    "tpu.trace_start"() <{level = 10 : i32, message = "nld,nsd->nls"}> : () -> ()
    %cst_118 = arith.constant dense<0.000000e+00> : vector<2x8x8xf32>
    %289 = tpu.matmul %286, %287, %cst_118 {dimension_numbers = #tpu.dot_dimension_numbers<[2], [2], [1], [1], [0, 0, 0, 1, 1, 1], [0], [0]>} : vector<2x8x8xf32>, vector<2x8x8xf32>, vector<2x8x8xf32> -> vector<2x8x8xf32>
    "tpu.trace_stop"() : () -> ()
    %cst_119 = arith.constant dense<0xFF800000> : vector<2x8xf32>
    %290 = vector.multi_reduction <maximumf>, %289, %cst_119 [2] : vector<2x8x8xf32> to vector<2x8xf32>
    %291 = vector.shape_cast %290 : vector<2x8xf32> to vector<2x8x1xf32>
    %292 = vector.broadcast %291 : vector<2x8x1xf32> to vector<2x8x8xf32>
    %293 = arith.subf %289, %292 : vector<2x8x8xf32>
    %294 = math.exp %293 : vector<2x8x8xf32>
    %cst_120 = arith.constant dense<0.000000e+00> : vector<2x8xf32>
    %295 = vector.multi_reduction <add>, %294, %cst_120 [2] : vector<2x8x8xf32> to vector<2x8xf32>
    %296 = vector.shape_cast %295 : vector<2x8xf32> to vector<2x8x1xf32>
    %297 = tpu.reciprocal %296 {approx = true} : vector<2x8x1xf32> -> vector<2x8x1xf32>
    %298 = vector.broadcast %297 : vector<2x8x1xf32> to vector<2x8x8xf32>
    %299 = arith.mulf %294, %298 : vector<2x8x8xf32>
    "tpu.trace_start"() <{level = 10 : i32, message = "nls,nsd->nld"}> : () -> ()
    %cst_121 = arith.constant dense<0.000000e+00> : vector<2x8x8xf32>
    %300 = tpu.matmul %299, %288, %cst_121 {dimension_numbers = #tpu.dot_dimension_numbers<[2], [1], [1], [2], [0, 0, 0, 1, 1, 2], [0], [0]>} : vector<2x8x8xf32>, vector<2x8x8xf32>, vector<2x8x8xf32> -> vector<2x8x8xf32>
    "tpu.trace_stop"() : () -> ()
    %301 = vector.shape_cast %300 : vector<2x8x8xf32> to vector<16x8xf32>
    %302 = vector.extract_strided_slice %265 {offsets = [0, 0, 16], sizes = [2, 8, 8], strides = [1, 1, 1]} : vector<2x8x32xf32> to vector<2x8x8xf32>
    %303 = vector.extract_strided_slice %267 {offsets = [0, 0, 16], sizes = [2, 8, 8], strides = [1, 1, 1]} : vector<2x8x32xf32> to vector<2x8x8xf32>
    %304 = vector.extract_strided_slice %269 {offsets = [0, 0, 16], sizes = [2, 8, 8], strides = [1, 1, 1]} : vector<2x8x32xf32> to vector<2x8x8xf32>
    "tpu.trace_start"() <{level = 10 : i32, message = "nld,nsd->nls"}> : () -> ()
    %cst_122 = arith.constant dense<0.000000e+00> : vector<2x8x8xf32>
    %305 = tpu.matmul %302, %303, %cst_122 {dimension_numbers = #tpu.dot_dimension_numbers<[2], [2], [1], [1], [0, 0, 0, 1, 1, 1], [0], [0]>} : vector<2x8x8xf32>, vector<2x8x8xf32>, vector<2x8x8xf32> -> vector<2x8x8xf32>
    "tpu.trace_stop"() : () -> ()
    %cst_123 = arith.constant dense<0xFF800000> : vector<2x8xf32>
    %306 = vector.multi_reduction <maximumf>, %305, %cst_123 [2] : vector<2x8x8xf32> to vector<2x8xf32>
    %307 = vector.shape_cast %306 : vector<2x8xf32> to vector<2x8x1xf32>
    %308 = vector.broadcast %307 : vector<2x8x1xf32> to vector<2x8x8xf32>
    %309 = arith.subf %305, %308 : vector<2x8x8xf32>
    %310 = math.exp %309 : vector<2x8x8xf32>
    %cst_124 = arith.constant dense<0.000000e+00> : vector<2x8xf32>
    %311 = vector.multi_reduction <add>, %310, %cst_124 [2] : vector<2x8x8xf32> to vector<2x8xf32>
    %312 = vector.shape_cast %311 : vector<2x8xf32> to vector<2x8x1xf32>
    %313 = tpu.reciprocal %312 {approx = true} : vector<2x8x1xf32> -> vector<2x8x1xf32>
    %314 = vector.broadcast %313 : vector<2x8x1xf32> to vector<2x8x8xf32>
    %315 = arith.mulf %310, %314 : vector<2x8x8xf32>
    "tpu.trace_start"() <{level = 10 : i32, message = "nls,nsd->nld"}> : () -> ()
    %cst_125 = arith.constant dense<0.000000e+00> : vector<2x8x8xf32>
    %316 = tpu.matmul %315, %304, %cst_125 {dimension_numbers = #tpu.dot_dimension_numbers<[2], [1], [1], [2], [0, 0, 0, 1, 1, 2], [0], [0]>} : vector<2x8x8xf32>, vector<2x8x8xf32>, vector<2x8x8xf32> -> vector<2x8x8xf32>
    "tpu.trace_stop"() : () -> ()
    %317 = vector.shape_cast %316 : vector<2x8x8xf32> to vector<16x8xf32>
    %318 = vector.extract_strided_slice %265 {offsets = [0, 0, 24], sizes = [2, 8, 8], strides = [1, 1, 1]} : vector<2x8x32xf32> to vector<2x8x8xf32>
    %319 = vector.extract_strided_slice %267 {offsets = [0, 0, 24], sizes = [2, 8, 8], strides = [1, 1, 1]} : vector<2x8x32xf32> to vector<2x8x8xf32>
    %320 = vector.extract_strided_slice %269 {offsets = [0, 0, 24], sizes = [2, 8, 8], strides = [1, 1, 1]} : vector<2x8x32xf32> to vector<2x8x8xf32>
    "tpu.trace_start"() <{level = 10 : i32, message = "nld,nsd->nls"}> : () -> ()
    %cst_126 = arith.constant dense<0.000000e+00> : vector<2x8x8xf32>
    %321 = tpu.matmul %318, %319, %cst_126 {dimension_numbers = #tpu.dot_dimension_numbers<[2], [2], [1], [1], [0, 0, 0, 1, 1, 1], [0], [0]>} : vector<2x8x8xf32>, vector<2x8x8xf32>, vector<2x8x8xf32> -> vector<2x8x8xf32>
    "tpu.trace_stop"() : () -> ()
    %cst_127 = arith.constant dense<0xFF800000> : vector<2x8xf32>
    %322 = vector.multi_reduction <maximumf>, %321, %cst_127 [2] : vector<2x8x8xf32> to vector<2x8xf32>
    %323 = vector.shape_cast %322 : vector<2x8xf32> to vector<2x8x1xf32>
    %324 = vector.broadcast %323 : vector<2x8x1xf32> to vector<2x8x8xf32>
    %325 = arith.subf %321, %324 : vector<2x8x8xf32>
    %326 = math.exp %325 : vector<2x8x8xf32>
    %cst_128 = arith.constant dense<0.000000e+00> : vector<2x8xf32>
    %327 = vector.multi_reduction <add>, %326, %cst_128 [2] : vector<2x8x8xf32> to vector<2x8xf32>
    %328 = vector.shape_cast %327 : vector<2x8xf32> to vector<2x8x1xf32>
    %329 = tpu.reciprocal %328 {approx = true} : vector<2x8x1xf32> -> vector<2x8x1xf32>
    %330 = vector.broadcast %329 : vector<2x8x1xf32> to vector<2x8x8xf32>
    %331 = arith.mulf %326, %330 : vector<2x8x8xf32>
    "tpu.trace_start"() <{level = 10 : i32, message = "nls,nsd->nld"}> : () -> ()
    %cst_129 = arith.constant dense<0.000000e+00> : vector<2x8x8xf32>
    %332 = tpu.matmul %331, %320, %cst_129 {dimension_numbers = #tpu.dot_dimension_numbers<[2], [1], [1], [2], [0, 0, 0, 1, 1, 2], [0], [0]>} : vector<2x8x8xf32>, vector<2x8x8xf32>, vector<2x8x8xf32> -> vector<2x8x8xf32>
    "tpu.trace_stop"() : () -> ()
    %333 = vector.shape_cast %332 : vector<2x8x8xf32> to vector<16x8xf32>
    %334 = tpu.concatenate %285, %301, %317, %333 in 1 : vector<16x8xf32>, vector<16x8xf32>, vector<16x8xf32>, vector<16x8xf32> -> vector<16x32xf32>
    %cst_130 = arith.constant dense<0.000000e+00> : vector<16x32xf32>
    %335 = tpu.matmul %334, %257, %cst_130 {dimension_numbers = #tpu.dot_dimension_numbers<[1], [0], [0], [1], [0, 0, 1, 1], [], []>} : vector<16x32xf32>, vector<32x32xf32>, vector<16x32xf32> -> vector<16x32xf32>
    %336 = vector.broadcast %259 : vector<1x32xf32> to vector<16x32xf32>
    %337 = arith.addf %335, %336 : vector<16x32xf32>
    %338 = arith.addf %251, %337 : vector<16x32xf32>
    %c1_131 = arith.constant 1 : index
    %c0_132 = arith.constant 0 : index
    %c0_133 = arith.constant 0 : index
    %339 = vector.load %arg10[%c1_131, %c0_132, %c0_133] : memref<2x1x32xf32, #tpu.memory_space<vmem>>, vector<1x1x32xf32>
    %340 = vector.shape_cast %339 : vector<1x1x32xf32> to vector<1x32xf32>
    %c1_134 = arith.constant 1 : index
    %c0_135 = arith.constant 0 : index
    %c0_136 = arith.constant 0 : index
    %341 = vector.load %arg11[%c1_134, %c0_135, %c0_136] : memref<2x1x32xf32, #tpu.memory_space<vmem>>, vector<1x1x32xf32>
    %342 = vector.shape_cast %341 : vector<1x1x32xf32> to vector<1x32xf32>
    %cst_137 = arith.constant dense<0.000000e+00> : vector<16xf32>
    %343 = vector.multi_reduction <add>, %338, %cst_137 [1] : vector<16x32xf32> to vector<16xf32>
    %344 = vector.shape_cast %343 : vector<16xf32> to vector<16x1xf32>
    %cst_138 = arith.constant 3.200000e+01 : f32
    %345 = vector.broadcast %cst_138 : f32 to vector<16x1xf32>
    %346 = arith.divf %344, %345 : vector<16x1xf32>
    %347 = vector.broadcast %346 : vector<16x1xf32> to vector<16x32xf32>
    %348 = arith.subf %338, %347 : vector<16x32xf32>
    %349 = arith.mulf %348, %348 : vector<16x32xf32>
    %cst_139 = arith.constant dense<0.000000e+00> : vector<16xf32>
    %350 = vector.multi_reduction <add>, %349, %cst_139 [1] : vector<16x32xf32> to vector<16xf32>
    %351 = vector.shape_cast %350 : vector<16xf32> to vector<16x1xf32>
    %cst_140 = arith.constant 3.200000e+01 : f32
    %352 = vector.broadcast %cst_140 : f32 to vector<16x1xf32>
    %353 = arith.divf %351, %352 : vector<16x1xf32>
    %354 = vector.broadcast %346 : vector<16x1xf32> to vector<16x32xf32>
    %355 = arith.subf %338, %354 : vector<16x32xf32>
    %cst_141 = arith.constant 9.99999974E-6 : f32
    %356 = vector.broadcast %cst_141 : f32 to vector<16x1xf32>
    %357 = arith.addf %353, %356 : vector<16x1xf32>
    %358 = math.rsqrt %357 : vector<16x1xf32>
    %359 = vector.broadcast %358 : vector<16x1xf32> to vector<16x32xf32>
    %360 = arith.mulf %355, %359 : vector<16x32xf32>
    %361 = vector.broadcast %340 : vector<1x32xf32> to vector<16x32xf32>
    %362 = arith.mulf %360, %361 : vector<16x32xf32>
    %363 = vector.broadcast %342 : vector<1x32xf32> to vector<16x32xf32>
    %364 = arith.addf %362, %363 : vector<16x32xf32>
    %c1_142 = arith.constant 1 : index
    %c0_143 = arith.constant 0 : index
    %c0_144 = arith.constant 0 : index
    %365 = vector.load %arg6[%c1_142, %c0_143, %c0_144] : memref<2x32x96xf32, #tpu.memory_space<vmem>>, vector<1x32x96xf32>
    %366 = vector.shape_cast %365 : vector<1x32x96xf32> to vector<32x96xf32>
    %c1_145 = arith.constant 1 : index
    %c0_146 = arith.constant 0 : index
    %c0_147 = arith.constant 0 : index
    %367 = vector.load %arg7[%c1_145, %c0_146, %c0_147] : memref<2x1x96xf32, #tpu.memory_space<vmem>>, vector<1x1x96xf32>
    %368 = vector.shape_cast %367 : vector<1x1x96xf32> to vector<1x96xf32>
    %c1_148 = arith.constant 1 : index
    %c0_149 = arith.constant 0 : index
    %c0_150 = arith.constant 0 : index
    %369 = vector.load %arg8[%c1_148, %c0_149, %c0_150] : memref<2x32x32xf32, #tpu.memory_space<vmem>>, vector<1x32x32xf32>
    %370 = vector.shape_cast %369 : vector<1x32x32xf32> to vector<32x32xf32>
    %c1_151 = arith.constant 1 : index
    %c0_152 = arith.constant 0 : index
    %c0_153 = arith.constant 0 : index
    %371 = vector.load %arg9[%c1_151, %c0_152, %c0_153] : memref<2x1x32xf32, #tpu.memory_space<vmem>>, vector<1x1x32xf32>
    %372 = vector.shape_cast %371 : vector<1x1x32xf32> to vector<1x32xf32>
    %373 = vector.extract_strided_slice %366 {offsets = [0, 0], sizes = [32, 32], strides = [1, 1]} : vector<32x96xf32> to vector<32x32xf32>
    %cst_154 = arith.constant dense<0.000000e+00> : vector<16x32xf32>
    %374 = tpu.matmul %364, %373, %cst_154 {dimension_numbers = #tpu.dot_dimension_numbers<[1], [0], [0], [1], [0, 0, 1, 1], [], []>} : vector<16x32xf32>, vector<32x32xf32>, vector<16x32xf32> -> vector<16x32xf32>
    %375 = vector.extract_strided_slice %368 {offsets = [0, 0], sizes = [1, 32], strides = [1, 1]} : vector<1x96xf32> to vector<1x32xf32>
    %376 = vector.broadcast %375 : vector<1x32xf32> to vector<16x32xf32>
    %377 = arith.addf %374, %376 : vector<16x32xf32>
    %378 = vector.extract_strided_slice %366 {offsets = [0, 32], sizes = [32, 64], strides = [1, 1]} : vector<32x96xf32> to vector<32x64xf32>
    %cst_155 = arith.constant dense<0.000000e+00> : vector<16x64xf32>
    %379 = tpu.matmul %3, %378, %cst_155 {dimension_numbers = #tpu.dot_dimension_numbers<[1], [0], [0], [1], [0, 0, 1, 1], [], []>} : vector<16x32xf32>, vector<32x64xf32>, vector<16x64xf32> -> vector<16x64xf32>
    %380 = vector.extract_strided_slice %368 {offsets = [0, 32], sizes = [1, 64], strides = [1, 1]} : vector<1x96xf32> to vector<1x64xf32>
    %381 = vector.broadcast %380 : vector<1x64xf32> to vector<16x64xf32>
    %382 = arith.addf %379, %381 : vector<16x64xf32>
    %383 = vector.shape_cast %377 : vector<16x32xf32> to vector<2x8x32xf32>
    %384 = vector.extract_strided_slice %382 {offsets = [0, 0], sizes = [16, 32], strides = [1, 1]} : vector<16x64xf32> to vector<16x32xf32>
    %385 = vector.shape_cast %384 : vector<16x32xf32> to vector<2x8x32xf32>
    %386 = vector.extract_strided_slice %382 {offsets = [0, 32], sizes = [16, 32], strides = [1, 1]} : vector<16x64xf32> to vector<16x32xf32>
    %387 = vector.shape_cast %386 : vector<16x32xf32> to vector<2x8x32xf32>
    %388 = vector.extract_strided_slice %383 {offsets = [0, 0, 0], sizes = [2, 8, 8], strides = [1, 1, 1]} : vector<2x8x32xf32> to vector<2x8x8xf32>
    %389 = vector.extract_strided_slice %385 {offsets = [0, 0, 0], sizes = [2, 8, 8], strides = [1, 1, 1]} : vector<2x8x32xf32> to vector<2x8x8xf32>
    %390 = vector.extract_strided_slice %387 {offsets = [0, 0, 0], sizes = [2, 8, 8], strides = [1, 1, 1]} : vector<2x8x32xf32> to vector<2x8x8xf32>
    "tpu.trace_start"() <{level = 10 : i32, message = "nld,nsd->nls"}> : () -> ()
    %cst_156 = arith.constant dense<0.000000e+00> : vector<2x8x8xf32>
    %391 = tpu.matmul %388, %389, %cst_156 {dimension_numbers = #tpu.dot_dimension_numbers<[2], [2], [1], [1], [0, 0, 0, 1, 1, 1], [0], [0]>} : vector<2x8x8xf32>, vector<2x8x8xf32>, vector<2x8x8xf32> -> vector<2x8x8xf32>
    "tpu.trace_stop"() : () -> ()
    %cst_157 = arith.constant dense<0xFF800000> : vector<2x8xf32>
    %392 = vector.multi_reduction <maximumf>, %391, %cst_157 [2] : vector<2x8x8xf32> to vector<2x8xf32>
    %393 = vector.shape_cast %392 : vector<2x8xf32> to vector<2x8x1xf32>
    %394 = vector.broadcast %393 : vector<2x8x1xf32> to vector<2x8x8xf32>
    %395 = arith.subf %391, %394 : vector<2x8x8xf32>
    %396 = math.exp %395 : vector<2x8x8xf32>
    %cst_158 = arith.constant dense<0.000000e+00> : vector<2x8xf32>
    %397 = vector.multi_reduction <add>, %396, %cst_158 [2] : vector<2x8x8xf32> to vector<2x8xf32>
    %398 = vector.shape_cast %397 : vector<2x8xf32> to vector<2x8x1xf32>
    %399 = tpu.reciprocal %398 {approx = true} : vector<2x8x1xf32> -> vector<2x8x1xf32>
    %400 = vector.broadcast %399 : vector<2x8x1xf32> to vector<2x8x8xf32>
    %401 = arith.mulf %396, %400 : vector<2x8x8xf32>
    "tpu.trace_start"() <{level = 10 : i32, message = "nls,nsd->nld"}> : () -> ()
    %cst_159 = arith.constant dense<0.000000e+00> : vector<2x8x8xf32>
    %402 = tpu.matmul %401, %390, %cst_159 {dimension_numbers = #tpu.dot_dimension_numbers<[2], [1], [1], [2], [0, 0, 0, 1, 1, 2], [0], [0]>} : vector<2x8x8xf32>, vector<2x8x8xf32>, vector<2x8x8xf32> -> vector<2x8x8xf32>
    "tpu.trace_stop"() : () -> ()
    %403 = vector.shape_cast %402 : vector<2x8x8xf32> to vector<16x8xf32>
    %404 = vector.extract_strided_slice %383 {offsets = [0, 0, 8], sizes = [2, 8, 8], strides = [1, 1, 1]} : vector<2x8x32xf32> to vector<2x8x8xf32>
    %405 = vector.extract_strided_slice %385 {offsets = [0, 0, 8], sizes = [2, 8, 8], strides = [1, 1, 1]} : vector<2x8x32xf32> to vector<2x8x8xf32>
    %406 = vector.extract_strided_slice %387 {offsets = [0, 0, 8], sizes = [2, 8, 8], strides = [1, 1, 1]} : vector<2x8x32xf32> to vector<2x8x8xf32>
    "tpu.trace_start"() <{level = 10 : i32, message = "nld,nsd->nls"}> : () -> ()
    %cst_160 = arith.constant dense<0.000000e+00> : vector<2x8x8xf32>
    %407 = tpu.matmul %404, %405, %cst_160 {dimension_numbers = #tpu.dot_dimension_numbers<[2], [2], [1], [1], [0, 0, 0, 1, 1, 1], [0], [0]>} : vector<2x8x8xf32>, vector<2x8x8xf32>, vector<2x8x8xf32> -> vector<2x8x8xf32>
    "tpu.trace_stop"() : () -> ()
    %cst_161 = arith.constant dense<0xFF800000> : vector<2x8xf32>
    %408 = vector.multi_reduction <maximumf>, %407, %cst_161 [2] : vector<2x8x8xf32> to vector<2x8xf32>
    %409 = vector.shape_cast %408 : vector<2x8xf32> to vector<2x8x1xf32>
    %410 = vector.broadcast %409 : vector<2x8x1xf32> to vector<2x8x8xf32>
    %411 = arith.subf %407, %410 : vector<2x8x8xf32>
    %412 = math.exp %411 : vector<2x8x8xf32>
    %cst_162 = arith.constant dense<0.000000e+00> : vector<2x8xf32>
    %413 = vector.multi_reduction <add>, %412, %cst_162 [2] : vector<2x8x8xf32> to vector<2x8xf32>
    %414 = vector.shape_cast %413 : vector<2x8xf32> to vector<2x8x1xf32>
    %415 = tpu.reciprocal %414 {approx = true} : vector<2x8x1xf32> -> vector<2x8x1xf32>
    %416 = vector.broadcast %415 : vector<2x8x1xf32> to vector<2x8x8xf32>
    %417 = arith.mulf %412, %416 : vector<2x8x8xf32>
    "tpu.trace_start"() <{level = 10 : i32, message = "nls,nsd->nld"}> : () -> ()
    %cst_163 = arith.constant dense<0.000000e+00> : vector<2x8x8xf32>
    %418 = tpu.matmul %417, %406, %cst_163 {dimension_numbers = #tpu.dot_dimension_numbers<[2], [1], [1], [2], [0, 0, 0, 1, 1, 2], [0], [0]>} : vector<2x8x8xf32>, vector<2x8x8xf32>, vector<2x8x8xf32> -> vector<2x8x8xf32>
    "tpu.trace_stop"() : () -> ()
    %419 = vector.shape_cast %418 : vector<2x8x8xf32> to vector<16x8xf32>
    %420 = vector.extract_strided_slice %383 {offsets = [0, 0, 16], sizes = [2, 8, 8], strides = [1, 1, 1]} : vector<2x8x32xf32> to vector<2x8x8xf32>
    %421 = vector.extract_strided_slice %385 {offsets = [0, 0, 16], sizes = [2, 8, 8], strides = [1, 1, 1]} : vector<2x8x32xf32> to vector<2x8x8xf32>
    %422 = vector.extract_strided_slice %387 {offsets = [0, 0, 16], sizes = [2, 8, 8], strides = [1, 1, 1]} : vector<2x8x32xf32> to vector<2x8x8xf32>
    "tpu.trace_start"() <{level = 10 : i32, message = "nld,nsd->nls"}> : () -> ()
    %cst_164 = arith.constant dense<0.000000e+00> : vector<2x8x8xf32>
    %423 = tpu.matmul %420, %421, %cst_164 {dimension_numbers = #tpu.dot_dimension_numbers<[2], [2], [1], [1], [0, 0, 0, 1, 1, 1], [0], [0]>} : vector<2x8x8xf32>, vector<2x8x8xf32>, vector<2x8x8xf32> -> vector<2x8x8xf32>
    "tpu.trace_stop"() : () -> ()
    %cst_165 = arith.constant dense<0xFF800000> : vector<2x8xf32>
    %424 = vector.multi_reduction <maximumf>, %423, %cst_165 [2] : vector<2x8x8xf32> to vector<2x8xf32>
    %425 = vector.shape_cast %424 : vector<2x8xf32> to vector<2x8x1xf32>
    %426 = vector.broadcast %425 : vector<2x8x1xf32> to vector<2x8x8xf32>
    %427 = arith.subf %423, %426 : vector<2x8x8xf32>
    %428 = math.exp %427 : vector<2x8x8xf32>
    %cst_166 = arith.constant dense<0.000000e+00> : vector<2x8xf32>
    %429 = vector.multi_reduction <add>, %428, %cst_166 [2] : vector<2x8x8xf32> to vector<2x8xf32>
    %430 = vector.shape_cast %429 : vector<2x8xf32> to vector<2x8x1xf32>
    %431 = tpu.reciprocal %430 {approx = true} : vector<2x8x1xf32> -> vector<2x8x1xf32>
    %432 = vector.broadcast %431 : vector<2x8x1xf32> to vector<2x8x8xf32>
    %433 = arith.mulf %428, %432 : vector<2x8x8xf32>
    "tpu.trace_start"() <{level = 10 : i32, message = "nls,nsd->nld"}> : () -> ()
    %cst_167 = arith.constant dense<0.000000e+00> : vector<2x8x8xf32>
    %434 = tpu.matmul %433, %422, %cst_167 {dimension_numbers = #tpu.dot_dimension_numbers<[2], [1], [1], [2], [0, 0, 0, 1, 1, 2], [0], [0]>} : vector<2x8x8xf32>, vector<2x8x8xf32>, vector<2x8x8xf32> -> vector<2x8x8xf32>
    "tpu.trace_stop"() : () -> ()
    %435 = vector.shape_cast %434 : vector<2x8x8xf32> to vector<16x8xf32>
    %436 = vector.extract_strided_slice %383 {offsets = [0, 0, 24], sizes = [2, 8, 8], strides = [1, 1, 1]} : vector<2x8x32xf32> to vector<2x8x8xf32>
    %437 = vector.extract_strided_slice %385 {offsets = [0, 0, 24], sizes = [2, 8, 8], strides = [1, 1, 1]} : vector<2x8x32xf32> to vector<2x8x8xf32>
    %438 = vector.extract_strided_slice %387 {offsets = [0, 0, 24], sizes = [2, 8, 8], strides = [1, 1, 1]} : vector<2x8x32xf32> to vector<2x8x8xf32>
    "tpu.trace_start"() <{level = 10 : i32, message = "nld,nsd->nls"}> : () -> ()
    %cst_168 = arith.constant dense<0.000000e+00> : vector<2x8x8xf32>
    %439 = tpu.matmul %436, %437, %cst_168 {dimension_numbers = #tpu.dot_dimension_numbers<[2], [2], [1], [1], [0, 0, 0, 1, 1, 1], [0], [0]>} : vector<2x8x8xf32>, vector<2x8x8xf32>, vector<2x8x8xf32> -> vector<2x8x8xf32>
    "tpu.trace_stop"() : () -> ()
    %cst_169 = arith.constant dense<0xFF800000> : vector<2x8xf32>
    %440 = vector.multi_reduction <maximumf>, %439, %cst_169 [2] : vector<2x8x8xf32> to vector<2x8xf32>
    %441 = vector.shape_cast %440 : vector<2x8xf32> to vector<2x8x1xf32>
    %442 = vector.broadcast %441 : vector<2x8x1xf32> to vector<2x8x8xf32>
    %443 = arith.subf %439, %442 : vector<2x8x8xf32>
    %444 = math.exp %443 : vector<2x8x8xf32>
    %cst_170 = arith.constant dense<0.000000e+00> : vector<2x8xf32>
    %445 = vector.multi_reduction <add>, %444, %cst_170 [2] : vector<2x8x8xf32> to vector<2x8xf32>
    %446 = vector.shape_cast %445 : vector<2x8xf32> to vector<2x8x1xf32>
    %447 = tpu.reciprocal %446 {approx = true} : vector<2x8x1xf32> -> vector<2x8x1xf32>
    %448 = vector.broadcast %447 : vector<2x8x1xf32> to vector<2x8x8xf32>
    %449 = arith.mulf %444, %448 : vector<2x8x8xf32>
    "tpu.trace_start"() <{level = 10 : i32, message = "nls,nsd->nld"}> : () -> ()
    %cst_171 = arith.constant dense<0.000000e+00> : vector<2x8x8xf32>
    %450 = tpu.matmul %449, %438, %cst_171 {dimension_numbers = #tpu.dot_dimension_numbers<[2], [1], [1], [2], [0, 0, 0, 1, 1, 2], [0], [0]>} : vector<2x8x8xf32>, vector<2x8x8xf32>, vector<2x8x8xf32> -> vector<2x8x8xf32>
    "tpu.trace_stop"() : () -> ()
    %451 = vector.shape_cast %450 : vector<2x8x8xf32> to vector<16x8xf32>
    %452 = tpu.concatenate %403, %419, %435, %451 in 1 : vector<16x8xf32>, vector<16x8xf32>, vector<16x8xf32>, vector<16x8xf32> -> vector<16x32xf32>
    %cst_172 = arith.constant dense<0.000000e+00> : vector<16x32xf32>
    %453 = tpu.matmul %452, %370, %cst_172 {dimension_numbers = #tpu.dot_dimension_numbers<[1], [0], [0], [1], [0, 0, 1, 1], [], []>} : vector<16x32xf32>, vector<32x32xf32>, vector<16x32xf32> -> vector<16x32xf32>
    %454 = vector.broadcast %372 : vector<1x32xf32> to vector<16x32xf32>
    %455 = arith.addf %453, %454 : vector<16x32xf32>
    %456 = arith.addf %364, %455 : vector<16x32xf32>
    %c1_173 = arith.constant 1 : index
    %c0_174 = arith.constant 0 : index
    %c0_175 = arith.constant 0 : index
    %457 = vector.load %arg12[%c1_173, %c0_174, %c0_175] : memref<2x1x32xf32, #tpu.memory_space<vmem>>, vector<1x1x32xf32>
    %458 = vector.shape_cast %457 : vector<1x1x32xf32> to vector<1x32xf32>
    %c1_176 = arith.constant 1 : index
    %c0_177 = arith.constant 0 : index
    %c0_178 = arith.constant 0 : index
    %459 = vector.load %arg13[%c1_176, %c0_177, %c0_178] : memref<2x1x32xf32, #tpu.memory_space<vmem>>, vector<1x1x32xf32>
    %460 = vector.shape_cast %459 : vector<1x1x32xf32> to vector<1x32xf32>
    %cst_179 = arith.constant dense<0.000000e+00> : vector<16xf32>
    %461 = vector.multi_reduction <add>, %456, %cst_179 [1] : vector<16x32xf32> to vector<16xf32>
    %462 = vector.shape_cast %461 : vector<16xf32> to vector<16x1xf32>
    %cst_180 = arith.constant 3.200000e+01 : f32
    %463 = vector.broadcast %cst_180 : f32 to vector<16x1xf32>
    %464 = arith.divf %462, %463 : vector<16x1xf32>
    %465 = vector.broadcast %464 : vector<16x1xf32> to vector<16x32xf32>
    %466 = arith.subf %456, %465 : vector<16x32xf32>
    %467 = arith.mulf %466, %466 : vector<16x32xf32>
    %cst_181 = arith.constant dense<0.000000e+00> : vector<16xf32>
    %468 = vector.multi_reduction <add>, %467, %cst_181 [1] : vector<16x32xf32> to vector<16xf32>
    %469 = vector.shape_cast %468 : vector<16xf32> to vector<16x1xf32>
    %cst_182 = arith.constant 3.200000e+01 : f32
    %470 = vector.broadcast %cst_182 : f32 to vector<16x1xf32>
    %471 = arith.divf %469, %470 : vector<16x1xf32>
    %472 = vector.broadcast %464 : vector<16x1xf32> to vector<16x32xf32>
    %473 = arith.subf %456, %472 : vector<16x32xf32>
    %cst_183 = arith.constant 9.99999974E-6 : f32
    %474 = vector.broadcast %cst_183 : f32 to vector<16x1xf32>
    %475 = arith.addf %471, %474 : vector<16x1xf32>
    %476 = math.rsqrt %475 : vector<16x1xf32>
    %477 = vector.broadcast %476 : vector<16x1xf32> to vector<16x32xf32>
    %478 = arith.mulf %473, %477 : vector<16x32xf32>
    %479 = vector.broadcast %458 : vector<1x32xf32> to vector<16x32xf32>
    %480 = arith.mulf %478, %479 : vector<16x32xf32>
    %481 = vector.broadcast %460 : vector<1x32xf32> to vector<16x32xf32>
    %482 = arith.addf %480, %481 : vector<16x32xf32>
    %c1_184 = arith.constant 1 : index
    %c0_185 = arith.constant 0 : index
    %c0_186 = arith.constant 0 : index
    %483 = vector.load %arg14[%c1_184, %c0_185, %c0_186] : memref<2x32x64xf32, #tpu.memory_space<vmem>>, vector<1x32x64xf32>
    %484 = vector.shape_cast %483 : vector<1x32x64xf32> to vector<32x64xf32>
    %cst_187 = arith.constant dense<0.000000e+00> : vector<16x64xf32>
    %485 = tpu.matmul %482, %484, %cst_187 {dimension_numbers = #tpu.dot_dimension_numbers<[1], [0], [0], [1], [0, 0, 1, 1], [], []>} : vector<16x32xf32>, vector<32x64xf32>, vector<16x64xf32> -> vector<16x64xf32>
    %c1_188 = arith.constant 1 : index
    %c0_189 = arith.constant 0 : index
    %c0_190 = arith.constant 0 : index
    %486 = vector.load %arg15[%c1_188, %c0_189, %c0_190] : memref<2x1x64xf32, #tpu.memory_space<vmem>>, vector<1x1x64xf32>
    %487 = vector.shape_cast %486 : vector<1x1x64xf32> to vector<1x64xf32>
    %488 = vector.broadcast %487 : vector<1x64xf32> to vector<16x64xf32>
    %489 = arith.addf %485, %488 : vector<16x64xf32>
    %cst_191 = arith.constant 0.000000e+00 : f32
    %490 = vector.broadcast %cst_191 : f32 to vector<16x64xf32>
    %491 = arith.maximumf %489, %490 : vector<16x64xf32>
    %c1_192 = arith.constant 1 : index
    %c0_193 = arith.constant 0 : index
    %c0_194 = arith.constant 0 : index
    %492 = vector.load %arg16[%c1_192, %c0_193, %c0_194] : memref<2x64x32xf32, #tpu.memory_space<vmem>>, vector<1x64x32xf32>
    %493 = vector.shape_cast %492 : vector<1x64x32xf32> to vector<64x32xf32>
    %cst_195 = arith.constant dense<0.000000e+00> : vector<16x32xf32>
    %494 = tpu.matmul %491, %493, %cst_195 {dimension_numbers = #tpu.dot_dimension_numbers<[1], [0], [0], [1], [0, 0, 1, 1], [], []>} : vector<16x64xf32>, vector<64x32xf32>, vector<16x32xf32> -> vector<16x32xf32>
    %c1_196 = arith.constant 1 : index
    %c0_197 = arith.constant 0 : index
    %c0_198 = arith.constant 0 : index
    %495 = vector.load %arg17[%c1_196, %c0_197, %c0_198] : memref<2x1x32xf32, #tpu.memory_space<vmem>>, vector<1x1x32xf32>
    %496 = vector.shape_cast %495 : vector<1x1x32xf32> to vector<1x32xf32>
    %497 = vector.broadcast %496 : vector<1x32xf32> to vector<16x32xf32>
    %498 = arith.addf %494, %497 : vector<16x32xf32>
    %499 = arith.addf %482, %498 : vector<16x32xf32>
    %c0_199 = arith.constant 0 : index
    %c0_200 = arith.constant 0 : index
    %500 = vector.load %arg18[%c0_199, %c0_200] : memref<1x32xf32, #tpu.memory_space<vmem>>, vector<1x32xf32>
    %c0_201 = arith.constant 0 : index
    %c0_202 = arith.constant 0 : index
    %501 = vector.load %arg19[%c0_201, %c0_202] : memref<1x32xf32, #tpu.memory_space<vmem>>, vector<1x32xf32>
    %cst_203 = arith.constant dense<0.000000e+00> : vector<16xf32>
    %502 = vector.multi_reduction <add>, %499, %cst_203 [1] : vector<16x32xf32> to vector<16xf32>
    %503 = vector.shape_cast %502 : vector<16xf32> to vector<16x1xf32>
    %cst_204 = arith.constant 3.200000e+01 : f32
    %504 = vector.broadcast %cst_204 : f32 to vector<16x1xf32>
    %505 = arith.divf %503, %504 : vector<16x1xf32>
    %506 = vector.broadcast %505 : vector<16x1xf32> to vector<16x32xf32>
    %507 = arith.subf %499, %506 : vector<16x32xf32>
    %508 = arith.mulf %507, %507 : vector<16x32xf32>
    %cst_205 = arith.constant dense<0.000000e+00> : vector<16xf32>
    %509 = vector.multi_reduction <add>, %508, %cst_205 [1] : vector<16x32xf32> to vector<16xf32>
    %510 = vector.shape_cast %509 : vector<16xf32> to vector<16x1xf32>
    %cst_206 = arith.constant 3.200000e+01 : f32
    %511 = vector.broadcast %cst_206 : f32 to vector<16x1xf32>
    %512 = arith.divf %510, %511 : vector<16x1xf32>
    %513 = vector.broadcast %505 : vector<16x1xf32> to vector<16x32xf32>
    %514 = arith.subf %499, %513 : vector<16x32xf32>
    %cst_207 = arith.constant 9.99999974E-6 : f32
    %515 = vector.broadcast %cst_207 : f32 to vector<16x1xf32>
    %516 = arith.addf %512, %515 : vector<16x1xf32>
    %517 = math.rsqrt %516 : vector<16x1xf32>
    %518 = vector.broadcast %517 : vector<16x1xf32> to vector<16x32xf32>
    %519 = arith.mulf %514, %518 : vector<16x32xf32>
    %520 = vector.broadcast %500 : vector<1x32xf32> to vector<16x32xf32>
    %521 = arith.mulf %519, %520 : vector<16x32xf32>
    %522 = vector.broadcast %501 : vector<1x32xf32> to vector<16x32xf32>
    %523 = arith.addf %521, %522 : vector<16x32xf32>
    %524 = vector.shape_cast %523 : vector<16x32xf32> to vector<2x8x32xf32>
    %c0_208 = arith.constant 0 : index
    %c0_209 = arith.constant 0 : index
    %c0_210 = arith.constant 0 : index
    %525 = vector.load %arg20[%c0_208, %c0_209, %c0_210] : memref<2x8x32xf32, #tpu.memory_space<vmem>>, vector<2x8x32xf32>
    tpu.vector_store %arg20[%c0_208, %c0_209, %c0_210], %524 {strides = array<i32>} : memref<2x8x32xf32, #tpu.memory_space<vmem>>, vector<2x8x32xf32>,
    return
  }
}

</mosaic_0001>

<bundles_post_ra>
// kernel: performer_decoder.1
= control target key start
LH: loop header
LB: loop body
LE: loop exit
PB: predicated region body
PF: predicated region fallthrough
CT: control target
= control target key end

     0   :  { %s9242_s0 = inlined_call_operand.vmem [shape: f32[2,8,32], index: 0, kind: input, shape index: {}]   ;;  %s9243_s1 = inlined_call_operand.vmem [shape: f32[2,8,32], index: 1, kind: input, shape index: {}]   ;;  %s9244_s2 = inlined_call_operand.vmem [shape: f32[2,32,96], index: 2, kind: input, shape index: {}]   ;;  %s9245_s3 = inlined_call_operand.vmem [shape: f32[2,1,96], index: 3, kind: input, shape index: {}]   ;;  %s9246_s4 = inlined_call_operand.vmem [shape: f32[2,32,32], index: 4, kind: input, shape index: {}]   ;;  %s9247_s5 = inlined_call_operand.vmem [shape: f32[2,1,32], index: 5, kind: input, shape index: {}]   ;;  %s9248_s6 = inlined_call_operand.vmem [shape: f32[2,32,96], index: 6, kind: input, shape index: {}]   ;;  %s9249_s7 = inlined_call_operand.vmem [shape: f32[2,1,96], index: 7, kind: input, shape index: {}]   ;;  %s9250_s8 = inlined_call_operand.hbm [shape: f32[2,32,32], index: 8, kind: input, shape index: {}]   ;;  %s9251_s9 = inlined_call_operand.vmem [shape: f32[2,1,32], index: 9, kind: input, shape index: {}]   ;;  %s9252_s10 = inlined_call_operand.vmem [shape: f32[2,1,32], index: 10, kind: input, shape index: {}]   ;;  %s9253_s11 = inlined_call_operand.vmem [shape: f32[2,1,32], index: 11, kind: input, shape index: {}]   ;;  %s9254_s12 = inlined_call_operand.vmem [shape: f32[2,1,32], index: 12, kind: input, shape index: {}]   ;;  %s9255_s13 = inlined_call_operand.vmem [shape: f32[2,1,32], index: 13, kind: input, shape index: {}]   ;;  %s9256_s14 = inlined_call_operand.hbm [shape: f32[2,32,64], index: 14, kind: input, shape index: {}]   ;;  %s9257_s15 = inlined_call_operand.vmem [shape: f32[2,1,64], index: 15, kind: input, shape index: {}]   ;;  %s9258_s16 = inlined_call_operand.vmem [shape: f32[2,64,32], index: 16, kind: input, shape index: {}]   ;;  %s9259_s17 = inlined_call_operand.vmem [shape: f32[2,1,32], index: 17, kind: input, shape index: {}]   ;;  %s9260_s18 = inlined_call_operand.vmem [shape: f32[1,32], index: 18, kind: input, shape index: {}]   ;;  %s9261_s19 = inlined_call_operand.vmem [shape: f32[1,32], index: 19, kind: input, shape index: {}]   ;;  %s9262_s20 = inlined_call_operand.vmem [shape: f32[2,8,32], index: 20, kind: output, shape index: {}]  }
   0x1   :  { %9296 = sst [smem:[#allocation8_spill]] %s9242_s0 }
   0x2   :  { %9297 = sst [smem:[#allocation9_spill]] %s9243_s1 }
   0x3   :  { %9298 = sst [smem:[#allocation10_spill]] %s9244_s2 }
   0x4   :  { %9299 = sst [smem:[#allocation11_spill]] %s9245_s3 }
   0x5   :  { %9300 = sst [smem:[#allocation12_spill]] %s9246_s4 }
   0x6   :  { %25 = vsyncpa [#allocation3], 0 }
   0x7   :  { %26 = vsyncpa [#allocation5], 0  ;;  %s8156_s1 = smov [#allocation2]  }
   0x8   :  { %s48_s22 = sshll.u32 %s8156_s1, 4  ;;  %s49_s22 = int_to_ptr.vmem [resolvable:$true] %s48_s22 }
   0x9   :  { %s8120_s23 = scalar_lea.vmem %s49_s22, 1024  ;;  %p8125_p1 = scmp.lt.s32.totalorder %s49_s22, %s49_s22 }
   0xa   :  { %p8121_p0 = scmp.ne.s32.totalorder %s49_s22, %s8120_s23  ;;  %p8126_p2 = scmp.lt.s32.totalorder %s8120_s23, %s8120_s23 }
   0xc   :  { %p8127_p3 = por %p8126_p2, %p8125_p1 }
   0xe   :  { %p8128_p4 = pnand %p8127_p3, %p8121_p0 }
  0x10   :  { %8131 = shalt.err (!%p8128_p4)
}
  0x11   :  { %s8157_s24 = smov 128   ;;  %s9278_s2 = smov 8  }
  0x12   :  { %54 = dma.hbm_to_vmem [thread:$0]  %s9250_s8, 1024, %s49_s22, [#allocation3], %s8157_s24, %s8157_s24, %s9278_s2  }
  0x13   :  { %s8159_s26 = smov [#allocation4]  }
  0x14   :  { %s70_s27 = sshll.u32 %s8159_s26, 4  ;;  %s71_s27 = int_to_ptr.vmem [resolvable:$true] %s70_s27 }
  0x15   :  { %s8140_s28 = scalar_lea.vmem %s71_s27, 1024  ;;  %p8145_p6 = scmp.lt.s32.totalorder %s71_s27, %s71_s27 }
  0x16   :  { %p8141_p5 = scmp.ne.s32.totalorder %s71_s27, %s8140_s28  ;;  %p8146_p7 = scmp.lt.s32.totalorder %s8140_s28, %s8140_s28 }
  0x18   :  { %p8147_p8 = por %p8146_p7, %p8145_p6 }
  0x1a   :  { %p8148_p9 = pnand %p8147_p8, %p8141_p5 }
  0x1c   :  { %8151 = shalt.err (!%p8148_p9)
}
  0x1d   :  { %76 = dma.hbm_to_vmem [thread:$0]  %s9256_s14, 1024, %s71_s27, [#allocation5], %s8157_s24, %s8157_s24, %s9278_s2  }
  0x1e   :  { %8152 = dma.done.wait [#allocation3], 1024  }
  0x1f   :  { %8153 = vsyncadd [#allocation3], 4294966272 }
  0x20   :  { %8154 = dma.done.wait [#allocation5], 1024  }
  0x21   :  { %8155 = vsyncadd [#allocation5], 4294966272  ;;  %vm113_vm0 = vcmask 261120   ;;  %s9301_s0 = sld [smem:[#allocation10_spill]]  ;;  %v8160_v6 = vmov 0.0   ;;  %vm8161_vm1 = vmmov 0  }
  0x22   :  { %s9302_s25 = sld [smem:[#allocation8_spill]]  ;;  %7474 = vmatprep.subr.mxu0 %v8160_v6  ;;  %7476 = vmatprep.mubr.msk.f32.mxu0 %vm8161_vm1, %v8160_v6  ;;  %s9294_s30 = smov 96   ;;  %vm198_vm2 = vcmask 64512   ;;  %vm1543_vm3 = vcmask 195584   ;;  %vm1540_vm4 = vcmask 130048   ;;  %vm3465_vm5 = vcmask 523264  }
  0x23   :  { %s9303_s8 = sld [smem:[#allocation11_spill]]  ;;  %s9274_s21 = smov 64  }
  0x24   :  { %s9292_s1 = smov 88   ;;  %s9290_s22 = smov 120  }
  0x25   :  { %s9272_s23 = smov 56   ;;  %s9286_s14 = smov 112  }
  0x26   :  { %s9268_s24 = smov 48   ;;  %s9280_s3 = smov 72  }
  0x27   :  { %v100_v0 = vld [vmem:[%s9301_s0 + $0x18] sm:$0xff]  ;;  %v99_v1 = vld [vmem:[%s9301_s0 + $0x10] sm:$0xff]  ;;  %v98_v3 = vld [vmem:[%s9301_s0 + $0x8] sm:$0xff]  ;;  %s9284_s26 = smov 104   ;;  %s9270_s27 = smov 40  }
  0x28   :  { %7453 = vmatprep.subr.mxu1 %v100_v0  ;;  %v8297_v2 = vld [vmem:[%s9302_s25] sm:$0xff]  ;;  %v8310_v5 = vld [vmem:[%s9302_s25 + $0x8] sm:$0xff]  ;;  %s9288_s25 = smov 80   ;;  %s9276_s28 = smov 16  }
  0x29   :  { %7454 = vmatpush3.msra.mxu1 %v100_v0  ;;  %7461 = vmatprep.mubr.msk.f32.mxu1 %vm113_vm0, %v8297_v2  ;;  %v97_v4 = vld [vmem:[%s9301_s0] sm:$0xff]  ;;  %s9282_s4 = smov 24   ;;  %s9316_s29 = smov 40  }
  0x2a   :  { %7455 = vmatprep.subr.mxu1 %v99_v1  ;;  %v7057_v8 = vld [vmem:[%s9303_s8] ss:$0 sm:$0xff] }
  0x2b   :  { %7456 = vmatpush3.msra.mxu1 %v99_v1 }
  0x2c   :  { %7457 = vmatprep.subr.mxu1 %v98_v3 }
  0x2d   :  { %7458 = vmatpush3.msra.mxu1 %v98_v3 }
  0x2e   :  { %7459 = vmatprep.subr.mxu1 %v97_v4 }
  0x2f   :  { %7460 = vmatpush3.msra.mxu1 %v97_v4 }
  0x30   :  { %7462 = vmatmul.mubr.msk.f32.vlgmr.msra.gmra.mxu1 %vm113_vm0, %v8310_v5  ;;  %7464 = vmatprep.subr.mxu1 %v8160_v6 }
  0x31   :  { %7466 = vmatprep.mubr.msk.f32.mxu1 %vm8161_vm1, %v8160_v6 }
  0xf0   :  { %v7463_v7 = vpop.f32.mrf.mxu1 }
  0xf1   :  { %v8327_v11 = vadd.f32 %v7463_v7, %v7057_v8 }
  0xf2   :  { %v186_v9 = vpop.f32.mrf.mxu1 }
  0xf3   :  { %v8323_v10 = vadd.f32 %v7057_v8, %v186_v9 }
  0xf5   :  { %196 = vrot.lane.b32.xlu0 %v8323_v10, %s9294_s30 }
  0xf9   :  { %274 = vrot.lane.b32.xlu0 %v8327_v11, %s9294_s30 }
 0x167   :  { %v197_v12 = vpop.permute.xlu0 %196 }
 0x168   :  { %7465 = vmatpush3.xpose.msk.msra.mxu1 %vm198_vm2, %v197_v12 }
 0x169   :  { %7469 = vmatprep.subr.mxu1 %v8160_v6 }
 0x16b   :  { %7467 = vmatmul.mubr.msk.f32.vlgmr.msra.gmra.mxu1 %vm198_vm2, %v8323_v10  ;;  %v275_v13 = vpop.permute.xlu0 %274 }
 0x16c   :  { %7470 = vmatpush3.xpose.msk.msra.mxu1 %vm198_vm2, %v275_v13  ;;  %7471 = vmatprep.mubr.msk.f32.mxu1 %vm8161_vm1, %v8160_v6 }
 0x16d   :  { %7479 = vmatprep.subr.mxu1 %v8160_v6 }
 0x16f   :  { %7472 = vmatmul.mubr.msk.f32.vlgmr.msra.gmra.mxu1 %vm198_vm2, %v8327_v11 }
 0x170   :  { %7481 = vmatprep.mubr.msk.f32.mxu1 %vm8161_vm1, %v8160_v6 }
 0x22b   :  { %v269_v14 = vpop.f32.mrf.mxu1 }
 0x22c   :  { %v350_v15 = vsel %vm198_vm2, %v269_v14, -inf }
 0x22d   :  { %351 = vmax.xlane.f32.xlu1 %v350_v15  ;;  %v7468_v16 = vpop.f32.mrf.mxu1 }
 0x22f   :  { %v346_v17 = vpop.f32.mrf.mxu1 }
 0x230   :  { %v353_v18 = vsel %vm198_vm2, %v346_v17, -inf }
 0x231   :  { %354 = vmax.xlane.f32.xlu1 %v353_v18  ;;  %v7473_v19 = vpop.f32.mrf.mxu1 }
 0x242   :  { %372 = vrot.lane.b32.xlu1 %v8323_v10, %s9274_s21 }
 0x246   :  { %448 = vrot.lane.b32.xlu1 %v8327_v11, %s9274_s21  ;;  %s9306_s21 = smov 72  }
 0x24a   :  { %526 = vrot.lane.b32.xlu1 %v8323_v10, %s9292_s1 }
 0x24e   :  { %604 = vrot.lane.b32.xlu1 %v8327_v11, %s9292_s1 }
 0x2b6   :  { %v352_v20 = vpop.xlane.xlu1 %351 }
 0x2b7   :  { %v356_v21 = vsub.f32 %v269_v14, %v352_v20 }
 0x2b9   :  { %v358_v22 = vmul.f32 1.442695, %v356_v21 }
 0x2ba   :  { %v355_v23 = vpop.xlane.xlu1 %354 }
 0x2bb   :  { %7962 = vpow2.f32 %v358_v22  ;;  %v357_v24 = vsub.f32 %v346_v17, %v355_v23 }
 0x2bd   :  { %v360_v25 = vmul.f32 1.442695, %v357_v24 }
 0x2be   :  { %v373_v26 = vpop.permute.xlu1 %372 }
 0x2bf   :  { %7964 = vpow2.f32 %v360_v25  ;;  %7475 = vmatpush3.msra.mxu0 %v373_v26 }
 0x2c0   :  { %7484 = vmatprep.subr.mxu0 %v8160_v6 }
 0x2c2   :  { %v449_v27 = vpop.permute.xlu1 %448 }
 0x2c3   :  { %7480 = vmatpush3.msra.mxu1 %v449_v27 }
 0x2c4   :  { %7489 = vmatprep.subr.mxu1 %v8160_v6 }
 0x2c6   :  { %v527_v32 = vpop.permute.xlu1 %526 }
 0x2c8   :  { %v7963_v28 = vpop.eup %7962 }
 0x2c9   :  { %v362_v29 = vsel %vm198_vm2, %v7963_v28, 0.0 }
 0x2ca   :  { %363 = vadd.xlane.f32.xlu0 %v362_v29  ;;  %v605_v33 = vpop.permute.xlu1 %604 }
 0x2cc   :  { %v7965_v30 = vpop.eup %7964 }
 0x2cd   :  { %v365_v31 = vsel %vm198_vm2, %v7965_v30, 0.0 }
 0x2ce   :  { %366 = vadd.xlane.f32.xlu1 %v365_v31 }
 0x2df   :  { %602 = vrot.lane.b32.xlu1 %v8327_v11, %s9290_s22 }
 0x2e0   :  { %524 = vrot.lane.b32.xlu0 %v8323_v10, %s9290_s22 }
 0x353   :  { %v364_v34 = vpop.xlane.xlu0 %363 }
 0x354   :  { %7966 = vrcp.f32 %v364_v34 }
 0x357   :  { %v367_v35 = vpop.xlane.xlu1 %366  ;;  %v525_v40 = vpop.permute.xlu0 %524 }
 0x358   :  { %7968 = vrcp.f32 %v367_v35 }
 0x35b   :  { %v603_v41 = vpop.permute.xlu1 %602 }
 0x361   :  { %v7967_v36 = vpop.eup %7966 }
 0x362   :  { %v370_v37 = vmul.f32 %v7967_v36, %v7963_v28 }
 0x364   :  { %7477 = vmatmul.mubr.msk.f32.vlgmr.msra.gmra.mxu0 %vm198_vm2, %v370_v37 }
 0x365   :  { %v7969_v38 = vpop.eup %7968  ;;  %7485 = vmatpush3.xpose.msk.msra.mxu0 %vm198_vm2, %v527_v32  ;;  %7486 = vmatprep.mubr.msk.f32.mxu0 %vm8161_vm1, %v8160_v6 }
 0x366   :  { %v371_v39 = vmul.f32 %v7969_v38, %v7965_v30  ;;  %7494 = vmatprep.subr.mxu0 %v8160_v6 }
 0x368   :  { %7482 = vmatmul.mubr.msk.f32.vlgmr.msra.gmra.mxu1 %vm198_vm2, %v371_v39  ;;  %7487 = vmatmul.mubr.msk.f32.vlgmr.msra.gmra.mxu0 %vm198_vm2, %v525_v40 }
 0x369   :  { %7490 = vmatpush3.xpose.msk.msra.mxu1 %vm198_vm2, %v605_v33  ;;  %7491 = vmatprep.mubr.msk.f32.mxu1 %vm8161_vm1, %v8160_v6 }
 0x36a   :  { %7499 = vmatprep.subr.mxu1 %v8160_v6  ;;  %7496 = vmatprep.mubr.msk.f32.mxu0 %vm8161_vm1, %v8160_v6 }
 0x36c   :  { %7492 = vmatmul.mubr.msk.f32.vlgmr.msra.gmra.mxu1 %vm198_vm2, %v603_v41 }
 0x36d   :  { %7501 = vmatprep.mubr.msk.f32.mxu1 %vm8161_vm1, %v8160_v6 }
 0x424   :  { %v8377_v42 = vpop.f32.mrf.mxu0 }
 0x426   :  { %v7478_v43 = vpop.f32.mrf.mxu0 }
 0x428   :  { %v8379_v44 = vpop.f32.mrf.mxu1  ;;  %v598_v45 = vpop.f32.mrf.mxu0 }
 0x429   :  { %v680_v46 = vsel %vm198_vm2, %v598_v45, -inf }
 0x42a   :  { %v7483_v47 = vpop.f32.mrf.mxu1  ;;  %681 = vmax.xlane.f32.xlu1 %v680_v46  ;;  %v7488_v48 = vpop.f32.mrf.mxu0 }
 0x42c   :  { %v676_v49 = vpop.f32.mrf.mxu1 }
 0x42d   :  { %v683_v50 = vsel %vm198_vm2, %v676_v49, -inf }
 0x42e   :  { %684 = vmax.xlane.f32.xlu0 %v683_v50  ;;  %v7493_v51 = vpop.f32.mrf.mxu1 }
 0x43b   :  { %702 = vrot.lane.b32.xlu1 %v8323_v10, %s9272_s23 }
 0x43f   :  { %856 = vrot.lane.b32.xlu1 %v8323_v10, %s9288_s25 }
 0x443   :  { %934 = vrot.lane.b32.xlu1 %v8327_v11, %s9288_s25 }
 0x444   :  { %778 = vrot.lane.b32.xlu0 %v8327_v11, %s9272_s23  ;;  %s9307_s23 = smov 8  }
 0x448   :  { %854 = vrot.lane.b32.xlu0 %v8323_v10, %s9286_s14 }
 0x4b3   :  { %v682_v52 = vpop.xlane.xlu1 %681 }
 0x4b4   :  { %v686_v53 = vsub.f32 %v598_v45, %v682_v52 }
 0x4b6   :  { %v688_v54 = vmul.f32 1.442695, %v686_v53 }
 0x4b7   :  { %v703_v55 = vpop.permute.xlu1 %702  ;;  %v685_v56 = vpop.xlane.xlu0 %684 }
 0x4b8   :  { %7970 = vpow2.f32 %v688_v54  ;;  %v687_v57 = vsub.f32 %v676_v49, %v685_v56  ;;  %7495 = vmatpush3.msra.mxu0 %v703_v55 }
 0x4b9   :  { %7504 = vmatprep.subr.mxu0 %v8160_v6 }
 0x4ba   :  { %v690_v58 = vmul.f32 1.442695, %v687_v57 }
 0x4bb   :  { %v779_v59 = vpop.permute.xlu0 %778  ;;  %v857_v0 = vpop.permute.xlu1 %856 }
 0x4bc   :  { %7972 = vpow2.f32 %v690_v58  ;;  %7500 = vmatpush3.msra.mxu1 %v779_v59 }
 0x4bd   :  { %7509 = vmatprep.subr.mxu1 %v8160_v6 }
 0x4bf   :  { %v935_v1 = vpop.permute.xlu1 %934  ;;  %v855_v13 = vpop.permute.xlu0 %854 }
 0x4c5   :  { %v7971_v60 = vpop.eup %7970 }
 0x4c6   :  { %v692_v61 = vsel %vm198_vm2, %v7971_v60, 0.0 }
 0x4c7   :  { %693 = vadd.xlane.f32.xlu1 %v692_v61 }
 0x4c9   :  { %v7973_v62 = vpop.eup %7972 }
 0x4ca   :  { %v695_v63 = vsel %vm198_vm2, %v7973_v62, 0.0 }
 0x4cb   :  { %696 = vadd.xlane.f32.xlu1 %v695_v63 }
 0x4dc   :  { %932 = vrot.lane.b32.xlu1 %v8327_v11, %s9286_s14 }
 0x550   :  { %v694_v3 = vpop.xlane.xlu1 %693 }
 0x551   :  { %7974 = vrcp.f32 %v694_v3 }
 0x554   :  { %v697_v4 = vpop.xlane.xlu1 %696 }
 0x555   :  { %7976 = vrcp.f32 %v697_v4 }
 0x558   :  { %v933_v14 = vpop.permute.xlu1 %932 }
 0x55e   :  { %v7975_v7 = vpop.eup %7974 }
 0x55f   :  { %v700_v8 = vmul.f32 %v7975_v7, %v7971_v60 }
 0x561   :  { %7497 = vmatmul.mubr.msk.f32.vlgmr.msra.gmra.mxu0 %vm198_vm2, %v700_v8 }
 0x562   :  { %v7977_v9 = vpop.eup %7976  ;;  %7505 = vmatpush3.xpose.msk.msra.mxu0 %vm198_vm2, %v857_v0  ;;  %7506 = vmatprep.mubr.msk.f32.mxu0 %vm8161_vm1, %v8160_v6 }
 0x563   :  { %v701_v12 = vmul.f32 %v7977_v9, %v7973_v62  ;;  %7514 = vmatprep.subr.mxu0 %v8160_v6 }
 0x565   :  { %7502 = vmatmul.mubr.msk.f32.vlgmr.msra.gmra.mxu1 %vm198_vm2, %v701_v12  ;;  %7507 = vmatmul.mubr.msk.f32.vlgmr.msra.gmra.mxu0 %vm198_vm2, %v855_v13 }
 0x566   :  { %7510 = vmatpush3.xpose.msk.msra.mxu1 %vm198_vm2, %v935_v1  ;;  %7511 = vmatprep.mubr.msk.f32.mxu1 %vm8161_vm1, %v8160_v6 }
 0x567   :  { %7519 = vmatprep.subr.mxu1 %v8160_v6  ;;  %7516 = vmatprep.mubr.msk.f32.mxu0 %vm8161_vm1, %v8160_v6 }
 0x569   :  { %7512 = vmatmul.mubr.msk.f32.vlgmr.msra.gmra.mxu1 %vm198_vm2, %v933_v14 }
 0x56a   :  { %7521 = vmatprep.mubr.msk.f32.mxu1 %vm8161_vm1, %v8160_v6 }
 0x621   :  { %v8415_v15 = vpop.f32.mrf.mxu0 }
 0x623   :  { %v7498_v16 = vpop.f32.mrf.mxu0 }
 0x625   :  { %v8417_v17 = vpop.f32.mrf.mxu1  ;;  %v928_v18 = vpop.f32.mrf.mxu0 }
 0x626   :  { %v1010_v19 = vsel %vm198_vm2, %v928_v18, -inf }
 0x627   :  { %v7503_v20 = vpop.f32.mrf.mxu1  ;;  %1011 = vmax.xlane.f32.xlu0 %v1010_v19  ;;  %v7508_v21 = vpop.f32.mrf.mxu0 }
 0x629   :  { %v1006_v22 = vpop.f32.mrf.mxu1 }
 0x62a   :  { %v1013_v23 = vsel %vm198_vm2, %v1006_v22, -inf }
 0x62b   :  { %1014 = vmax.xlane.f32.xlu1 %v1013_v23  ;;  %v7513_v24 = vpop.f32.mrf.mxu1 }
 0x63c   :  { %1032 = vrot.lane.b32.xlu1 %v8323_v10, %s9268_s24 }
 0x63d   :  { %1108 = vrot.lane.b32.xlu0 %v8327_v11, %s9268_s24  ;;  %s9304_s24 = sld [smem:[#allocation12_spill]] }
 0x640   :  { %1186 = vrot.lane.b32.xlu1 %v8323_v10, %s9280_s3 }
 0x643   :  { %v102_v19 = vld [vmem:[%s9304_s24] sm:$0xff] }
 0x644   :  { %1264 = vrot.lane.b32.xlu1 %v8327_v11, %s9280_s3  ;;  %s9308_s3 = smov 16  }
 0x648   :  { %1262 = vrot.lane.b32.xlu1 %v8327_v11, %s9284_s26 }
 0x6b0   :  { %v1012_v25 = vpop.xlane.xlu0 %1011 }
 0x6b1   :  { %v1016_v26 = vsub.f32 %v928_v18, %v1012_v25  ;;  %v103_v18 = vld [vmem:[%s9304_s24 + $0x8] sm:$0xff] }
 0x6b3   :  { %v1018_v27 = vmul.f32 1.442695, %v1016_v26 }
 0x6b4   :  { %v1015_v28 = vpop.xlane.xlu1 %1014  ;;  %v1109_v29 = vpop.permute.xlu0 %1108 }
 0x6b5   :  { %7978 = vpow2.f32 %v1018_v27  ;;  %v1017_v30 = vsub.f32 %v1006_v22, %v1015_v28  ;;  %7520 = vmatpush3.msra.mxu1 %v1109_v29 }
 0x6b6   :  { %7529 = vmatprep.subr.mxu1 %v8160_v6 }
 0x6b7   :  { %v1020_v31 = vmul.f32 1.442695, %v1017_v30 }
 0x6b8   :  { %v1033_v32 = vpop.permute.xlu1 %1032 }
 0x6b9   :  { %7980 = vpow2.f32 %v1020_v31  ;;  %7515 = vmatpush3.msra.mxu0 %v1033_v32 }
 0x6ba   :  { %7524 = vmatprep.subr.mxu0 %v8160_v6 }
 0x6bc   :  { %v1187_v39 = vpop.permute.xlu1 %1186 }
 0x6c0   :  { %v1265_v45 = vpop.permute.xlu1 %1264 }
 0x6c2   :  { %v7979_v33 = vpop.eup %7978 }
 0x6c3   :  { %v1022_v34 = vsel %vm198_vm2, %v7979_v33, 0.0 }
 0x6c4   :  { %1023 = vadd.xlane.f32.xlu0 %v1022_v34  ;;  %v1263_v48 = vpop.permute.xlu1 %1262 }
 0x6c6   :  { %v7981_v35 = vpop.eup %7980 }
 0x6c7   :  { %v1025_v36 = vsel %vm198_vm2, %v7981_v35, 0.0 }
 0x6c8   :  { %1026 = vadd.xlane.f32.xlu0 %v1025_v36 }
 0x6de   :  { %1184 = vrot.lane.b32.xlu0 %v8323_v10, %s9284_s26 }
 0x74d   :  { %v1024_v37 = vpop.xlane.xlu0 %1023 }
 0x74e   :  { %7982 = vrcp.f32 %v1024_v37 }
 0x751   :  { %v1027_v38 = vpop.xlane.xlu0 %1026 }
 0x752   :  { %7984 = vrcp.f32 %v1027_v38 }
 0x755   :  { %v1185_v47 = vpop.permute.xlu0 %1184 }
 0x75b   :  { %v7983_v40 = vpop.eup %7982 }
 0x75c   :  { %v1030_v41 = vmul.f32 %v7983_v40, %v7979_v33 }
 0x75e   :  { %7517 = vmatmul.mubr.msk.f32.vlgmr.msra.gmra.mxu0 %vm198_vm2, %v1030_v41 }
 0x75f   :  { %v7985_v43 = vpop.eup %7984  ;;  %7525 = vmatpush3.xpose.msk.msra.mxu0 %vm198_vm2, %v1187_v39  ;;  %7526 = vmatprep.mubr.msk.f32.mxu0 %vm8161_vm1, %v8160_v6 }
 0x760   :  { %v1031_v46 = vmul.f32 %v7985_v43, %v7981_v35  ;;  %7534 = vmatprep.subr.mxu0 %v8160_v6 }
 0x762   :  { %7522 = vmatmul.mubr.msk.f32.vlgmr.msra.gmra.mxu1 %vm198_vm2, %v1031_v46  ;;  %7527 = vmatmul.mubr.msk.f32.vlgmr.msra.gmra.mxu0 %vm198_vm2, %v1185_v47  ;;  %v1682_v46 = vld [vmem:[%s9248_s6 + $0x10] sm:$0xff] }
 0x763   :  { %7530 = vmatpush3.xpose.msk.msra.mxu1 %vm198_vm2, %v1265_v45  ;;  %7531 = vmatprep.mubr.msk.f32.mxu1 %vm8161_vm1, %v8160_v6  ;;  %v1683_v45 = vld [vmem:[%s9248_s6 + $0x18] sm:$0xff] }
 0x764   :  { %7539 = vmatprep.subr.mxu1 %v8160_v6  ;;  %7536 = vmatprep.mubr.msk.f32.mxu0 %vm8161_vm1, %v8160_v6 }
 0x766   :  { %7532 = vmatmul.mubr.msk.f32.vlgmr.msra.gmra.mxu1 %vm198_vm2, %v1263_v48 }
 0x767   :  { %7541 = vmatprep.mubr.msk.f32.mxu1 %vm8161_vm1, %v8160_v6 }
 0x81e   :  { %v1104_v49 = vpop.f32.mrf.mxu0 }
 0x820   :  { %v7518_v50 = vpop.f32.mrf.mxu0 }
 0x822   :  { %v1180_v51 = vpop.f32.mrf.mxu1  ;;  %v1258_v52 = vpop.f32.mrf.mxu0 }
 0x823   :  { %v1340_v53 = vsel %vm198_vm2, %v1258_v52, -inf }
 0x824   :  { %v7523_v54 = vpop.f32.mrf.mxu1  ;;  %1341 = vmax.xlane.f32.xlu0 %v1340_v53  ;;  %v7528_v55 = vpop.f32.mrf.mxu0 }
 0x826   :  { %v1336_v56 = vpop.f32.mrf.mxu1 }
 0x827   :  { %v1343_v57 = vsel %vm198_vm2, %v1336_v56, -inf }
 0x828   :  { %1344 = vmax.xlane.f32.xlu1 %v1343_v57  ;;  %v7533_v58 = vpop.f32.mrf.mxu1 }
 0x839   :  { %1362 = vrot.lane.b32.xlu1 %v8323_v10, %s9270_s27 }
 0x83d   :  { %1516 = vrot.lane.b32.xlu1 %v8415_v15, %s9278_s2 }
 0x841   :  { %1518 = vrot.lane.b32.xlu1 %v8417_v17, %s9278_s2  ;;  %v104_v17 = vld [vmem:[%s9304_s24 + $0x10] sm:$0xff]  ;;  %s9314_s2 = smov 48  }
 0x845   :  { %1526 = vrot.lane.b32.xlu1 %v1180_v51, %s9276_s28 }
 0x8ad   :  { %v1342_v59 = vpop.xlane.xlu0 %1341 }
 0x8ae   :  { %v1346_v60 = vsub.f32 %v1258_v52, %v1342_v59  ;;  %v7089_v59 = vld [vmem:[%s9249_s7] ss:$0 sm:$0xff] }
 0x8b0   :  { %v1348_v61 = vmul.f32 1.442695, %v1346_v60 }
 0x8b1   :  { %v1345_v62 = vpop.xlane.xlu1 %1344 }
 0x8b2   :  { %7986 = vpow2.f32 %v1348_v61  ;;  %v1347_v63 = vsub.f32 %v1336_v56, %v1345_v62 }
 0x8b4   :  { %v1350_v0 = vmul.f32 1.442695, %v1347_v63 }
 0x8b5   :  { %v1363_v1 = vpop.permute.xlu1 %1362 }
 0x8b6   :  { %7988 = vpow2.f32 %v1350_v0  ;;  %7535 = vmatpush3.msra.mxu0 %v1363_v1 }
 0x8b9   :  { %v1517_v24 = vpop.permute.xlu1 %1516 }
 0x8ba   :  { %v1538_v27 = vsel %vm198_vm2, %v8377_v42, %v1517_v24  ;;  %v7084_v42 = vld [vmem:[%s9247_s5] ss:$0 sm:$0xff] }
 0x8bd   :  { %v1519_v25 = vpop.permute.xlu1 %1518 }
 0x8be   :  { %v1539_v32 = vsel %vm198_vm2, %v8379_v44, %v1519_v25 }
 0x8bf   :  { %v7987_v10 = vpop.eup %7986 }
 0x8c0   :  { %v1352_v3 = vsel %vm198_vm2, %v7987_v10, 0.0 }
 0x8c1   :  { %1353 = vadd.xlane.f32.xlu0 %v1352_v3  ;;  %v1527_v28 = vpop.permute.xlu1 %1526 }
 0x8c2   :  { %v1542_v33 = vsel %vm1540_vm4, %v1539_v32, %v1527_v28 }
 0x8c3   :  { %v7989_v4 = vpop.eup %7988 }
 0x8c4   :  { %v1355_v7 = vsel %vm198_vm2, %v7989_v4, 0.0 }
 0x8c5   :  { %1356 = vadd.xlane.f32.xlu0 %v1355_v7 }
 0x8db   :  { %1438 = vrot.lane.b32.xlu0 %v8327_v11, %s9270_s27  ;;  %v105_v11 = vld [vmem:[%s9304_s24 + $0x18] sm:$0xff]  ;;  %s9315_s27 = smov 104  }
 0x8dc   :  { %7544 = vmatprep.subr.mxu0 %v105_v11 }
 0x8df   :  { %1524 = vrot.lane.b32.xlu0 %v1104_v49, %s9276_s28  ;;  %s9305_s28 = sld [smem:[#allocation9_spill]] }
 0x8e5   :  { %v95_v58 = vld [vmem:[%s9305_s28] sm:$0xff]  ;;  %v96_v7 = vld [vmem:[%s9305_s28 + $0x8] sm:$0xff] }
 0x94a   :  { %v1354_v8 = vpop.xlane.xlu0 %1353 }
 0x94b   :  { %7990 = vrcp.f32 %v1354_v8 }
 0x94e   :  { %v1357_v9 = vpop.xlane.xlu0 %1356 }
 0x94f   :  { %7992 = vrcp.f32 %v1357_v9 }
 0x952   :  { %v1439_v12 = vpop.permute.xlu0 %1438 }
 0x953   :  { %7540 = vmatpush3.msra.mxu1 %v1439_v12  ;;  %v7087_v12 = vld [vmem:[%s9252_s10] ss:$0 sm:$0xff] }
 0x954   :  { %7555 = vmatprep.subr.mxu1 %v1683_v45 }
 0x956   :  { %v1525_v26 = vpop.permute.xlu0 %1524 }
 0x957   :  { %v1541_v29 = vsel %vm1540_vm4, %v1538_v27, %v1525_v26 }
 0x958   :  { %v7991_v13 = vpop.eup %7990 }
 0x959   :  { %v1360_v14 = vmul.f32 %v7991_v13, %v7987_v10 }
 0x95b   :  { %7537 = vmatmul.mubr.msk.f32.vlgmr.msra.gmra.mxu0 %vm198_vm2, %v1360_v14 }
 0x95c   :  { %v7993_v15 = vpop.eup %7992  ;;  %7545 = vmatpush3.msra.mxu0 %v105_v11 }
 0x95d   :  { %v1361_v16 = vmul.f32 %v7993_v15, %v7989_v4  ;;  %7546 = vmatprep.subr.mxu0 %v104_v17 }
 0x95e   :  { %7547 = vmatpush3.msra.mxu0 %v104_v17 }
 0x95f   :  { %7542 = vmatmul.mubr.msk.f32.vlgmr.msra.gmra.mxu1 %vm198_vm2, %v1361_v16  ;;  %7548 = vmatprep.subr.mxu0 %v103_v18  ;;  %v7088_v16 = vld [vmem:[%s9253_s11] ss:$0 sm:$0xff] }
 0x960   :  { %7549 = vmatpush3.msra.mxu0 %v103_v18  ;;  %7556 = vmatpush3.msra.mxu1 %v1683_v45 }
 0x961   :  { %7550 = vmatprep.subr.mxu0 %v102_v19  ;;  %7557 = vmatprep.subr.mxu1 %v1682_v46 }
 0x962   :  { %7551 = vmatpush3.msra.mxu0 %v102_v19  ;;  %7558 = vmatpush3.msra.mxu1 %v1682_v46 }
 0xa1b   :  { %v1434_v20 = vpop.f32.mrf.mxu0 }
 0xa1c   :  { %1532 = vrot.lane.b32.xlu0 %v1434_v20, %s9282_s4 }
 0xa1d   :  { %v7538_v21 = vpop.f32.mrf.mxu0 }
 0xa1f   :  { %v1510_v22 = vpop.f32.mrf.mxu1 }
 0xa20   :  { %1534 = vrot.lane.b32.xlu1 %v1510_v22, %s9282_s4 }
 0xa21   :  { %v7543_v23 = vpop.f32.mrf.mxu1 }
 0xa8e   :  { %v1533_v30 = vpop.permute.xlu0 %1532 }
 0xa8f   :  { %v1544_v31 = vsel %vm1543_vm3, %v1541_v29, %v1533_v30 }
 0xa90   :  { %7552 = vmatprep.mubr.msk.f32.mxu0 %vm113_vm0, %v1544_v31 }
 0xa92   :  { %v1535_v34 = vpop.permute.xlu1 %1534 }
 0xa93   :  { %v1545_v35 = vsel %vm1543_vm3, %v1542_v33, %v1535_v34 }
 0xa94   :  { %7553 = vmatmul.mubr.msk.f32.vlgmr.msra.gmra.mxu0 %vm113_vm0, %v1545_v35 }
 0xa95   :  { %7574 = vmatprep.mubr.msk.f32.mxu0 %vm113_vm0, %v95_v58 }
 0xb54   :  { %v7554_v36 = vpop.f32.mrf.mxu0 }
 0xb55   :  { %v1630_v37 = vadd.f32 %v7554_v36, %v7084_v42 }
 0xb56   :  { %v1624_v38 = vpop.f32.mrf.mxu0 }
 0xb57   :  { %v1625_v39 = vadd.f32 %v7084_v42, %v1624_v38  ;;  %v1634_v40 = vadd.f32 %v1630_v37, %v8310_v5  ;;  %v1680_v5 = vld [vmem:[%s9248_s6] sm:$0xff] }
 0xb59   :  { %v1640_v41 = vsel %vm113_vm0, %v1634_v40, 0.0  ;;  %v1633_v44 = vadd.f32 %v1625_v39, %v8297_v2  ;;  %v1681_v2 = vld [vmem:[%s9248_s6 + $0x8] sm:$0xff] }
 0xb5a   :  { %1641 = vadd.xlane.f32.xlu1 %v1640_v41  ;;  %7559 = vmatprep.subr.mxu1 %v1681_v2 }
 0xb5b   :  { %v1637_v43 = vsel %vm113_vm0, %v1633_v44, 0.0  ;;  %7560 = vmatpush3.msra.mxu1 %v1681_v2 }
 0xb5c   :  { %1638 = vadd.xlane.f32.xlu0 %v1637_v43  ;;  %7561 = vmatprep.subr.mxu1 %v1680_v5 }
 0xb5d   :  { %7562 = vmatpush3.msra.mxu1 %v1680_v5 }
 0xb5e   :  { %7577 = vmatprep.subr.mxu1 %v8160_v6 }
 0xb6b   :  { %1787 = vrot.lane.b32.xlu1 %v1683_v45, %s9294_s30 }
 0xb6f   :  { %1783 = vrot.lane.b32.xlu1 %v1681_v2, %s9294_s30 }
 0xb73   :  { %1781 = vrot.lane.b32.xlu1 %v1680_v5, %s9294_s30 }
 0xbe3   :  { %v1642_v47 = vpop.xlane.xlu1 %1641 }
 0xbe4   :  { %v1645_v48 = vmul.f32 0.03125, %v1642_v47 }
 0xbe5   :  { %v1639_v49 = vpop.xlane.xlu0 %1638 }
 0xbe6   :  { %v1647_v50 = vsub.f32 %v1634_v40, %v1645_v48  ;;  %v1644_v51 = vmul.f32 0.03125, %v1639_v49 }
 0xbe7   :  { %v1788_v57 = vpop.permute.xlu1 %1787 }
 0xbe8   :  { %v1646_v52 = vsub.f32 %v1633_v44, %v1644_v51  ;;  %v1649_v53 = vmul.f32 %v1647_v50, %v1647_v50  ;;  %7566 = vmatprep.subr.mxu0 %v1788_v57 }
 0xbe9   :  { %7567 = vmatpush3.msra.mxu0 %v1788_v57 }
 0xbea   :  { %v1653_v54 = vsel %vm113_vm0, %v1649_v53, 0.0  ;;  %v1648_v55 = vmul.f32 %v1646_v52, %v1646_v52 }
 0xbeb   :  { %1654 = vadd.xlane.f32.xlu0 %v1653_v54  ;;  %v1784_v0 = vpop.permute.xlu1 %1783 }
 0xbec   :  { %v1650_v56 = vsel %vm113_vm0, %v1648_v55, 0.0 }
 0xbef   :  { %1651 = vadd.xlane.f32.xlu0 %v1650_v56  ;;  %v1782_v4 = vpop.permute.xlu1 %1781 }
 0xc05   :  { %1785 = vrot.lane.b32.xlu0 %v1682_v46, %s9294_s30 }
 0xc09   :  { %1793 = vrot.lane.b32.xlu0 %v7089_v59, %s9294_s30 }
 0xc74   :  { %v1655_v60 = vpop.xlane.xlu0 %1654 }
 0xc75   :  { %v1657_v61 = vmul.f32 0.03125, %v1655_v60 }
 0xc77   :  { %v1659_v62 = vadd.f32 1e-05, %v1657_v61 }
 0xc78   :  { %v1652_v63 = vpop.xlane.xlu0 %1651 }
 0xc79   :  { %7994 = vrsqrt.f32 %v1659_v62  ;;  %v1656_v1 = vmul.f32 0.03125, %v1652_v63 }
 0xc7b   :  { %v1658_v10 = vadd.f32 1e-05, %v1656_v1 }
 0xc7c   :  { %v1786_v3 = vpop.permute.xlu0 %1785 }
 0xc7d   :  { %7996 = vrsqrt.f32 %v1658_v10  ;;  %7568 = vmatprep.subr.mxu0 %v1786_v3 }
 0xc7e   :  { %7569 = vmatpush3.msra.mxu0 %v1786_v3 }
 0xc7f   :  { %7570 = vmatprep.subr.mxu0 %v1784_v0 }
 0xc80   :  { %7571 = vmatpush3.msra.mxu0 %v1784_v0  ;;  %v1794_v20 = vpop.permute.xlu0 %1793 }
 0xc81   :  { %7572 = vmatprep.subr.mxu0 %v1782_v4 }
 0xc82   :  { %7573 = vmatpush3.msra.mxu0 %v1782_v4 }
 0xc83   :  { %7575 = vmatmul.mubr.msk.f32.vlgmr.msra.gmra.mxu0 %vm113_vm0, %v96_v7  ;;  %7587 = vmatprep.subr.mxu0 %v8160_v6 }
 0xc84   :  { %7589 = vmatprep.mubr.msk.f32.mxu0 %vm8161_vm1, %v8160_v6 }
 0xc86   :  { %v7995_v8 = vpop.eup %7994 }
 0xc87   :  { %v1663_v9 = vmul.f32 %v7995_v8, %v1647_v50 }
 0xc89   :  { %v1671_v15 = vmul.f32 %v7087_v12, %v1663_v9 }
 0xc8a   :  { %v7997_v13 = vpop.eup %7996 }
 0xc8b   :  { %v1662_v14 = vmul.f32 %v7997_v13, %v1646_v52  ;;  %v8542_v18 = vadd.f32 %v7088_v16, %v1671_v15 }
 0xc8d   :  { %v1670_v11 = vmul.f32 %v7087_v12, %v1662_v14 }
 0xc8f   :  { %v8540_v17 = vadd.f32 %v7088_v16, %v1670_v11 }
 0xc91   :  { %7563 = vmatprep.mubr.msk.f32.mxu1 %vm113_vm0, %v8540_v17 }
 0xc92   :  { %7564 = vmatmul.mubr.msk.f32.vlgmr.msra.gmra.mxu1 %vm113_vm0, %v8542_v18 }
 0xc93   :  { %7579 = vmatprep.mubr.msk.f32.mxu1 %vm8161_vm1, %v8160_v6 }
 0xd43   :  { %v7576_v19 = vpop.f32.mrf.mxu0 }
 0xd44   :  { %v8557_v26 = vadd.f32 %v7576_v19, %v1794_v20 }
 0xd45   :  { %v1868_v21 = vpop.f32.mrf.mxu0 }
 0xd46   :  { %v8550_v22 = vadd.f32 %v1868_v21, %v1794_v20 }
 0xd48   :  { %7578 = vmatpush3.xpose.msk.msra.mxu1 %vm198_vm2, %v8550_v22 }
 0xd49   :  { %7582 = vmatprep.subr.mxu1 %v8160_v6 }
 0xd52   :  { %v7565_v23 = vpop.f32.mrf.mxu1 }
 0xd53   :  { %v8565_v27 = vadd.f32 %v7565_v23, %v7089_v59 }
 0xd54   :  { %v1768_v24 = vpop.f32.mrf.mxu1 }
 0xd55   :  { %v8555_v25 = vadd.f32 %v7089_v59, %v1768_v24 }
 0xd57   :  { %7580 = vmatmul.mubr.msk.f32.vlgmr.msra.gmra.mxu1 %vm198_vm2, %v8555_v25 }
 0xd58   :  { %7583 = vmatpush3.xpose.msk.msra.mxu1 %vm198_vm2, %v8557_v26  ;;  %7584 = vmatprep.mubr.msk.f32.mxu1 %vm8161_vm1, %v8160_v6 }
 0xd59   :  { %7592 = vmatprep.subr.mxu1 %v8160_v6 }
 0xd5b   :  { %7585 = vmatmul.mubr.msk.f32.vlgmr.msra.gmra.mxu1 %vm198_vm2, %v8565_v27 }
 0xd5c   :  { %7594 = vmatprep.mubr.msk.f32.mxu1 %vm8161_vm1, %v8160_v6 }
 0xe17   :  { %v1949_v28 = vpop.f32.mrf.mxu1 }
 0xe18   :  { %v2029_v29 = vsel %vm198_vm2, %v1949_v28, -inf }
 0xe19   :  { %2030 = vmax.xlane.f32.xlu1 %v2029_v29  ;;  %v7581_v30 = vpop.f32.mrf.mxu1 }
 0xe1b   :  { %v2025_v31 = vpop.f32.mrf.mxu1 }
 0xe1c   :  { %v2032_v32 = vsel %vm198_vm2, %v2025_v31, -inf }
 0xe1d   :  { %2033 = vmax.xlane.f32.xlu0 %v2032_v32  ;;  %v7586_v33 = vpop.f32.mrf.mxu1 }
 0xe2a   :  { %2127 = vrot.lane.b32.xlu1 %v8557_v26, %s9294_s30 }
 0xe2e   :  { %2205 = vrot.lane.b32.xlu1 %v8550_v22, %s9290_s22 }
 0xe33   :  { %2051 = vrot.lane.b32.xlu0 %v8550_v22, %s9294_s30 }
 0xea2   :  { %v2031_v34 = vpop.xlane.xlu1 %2030 }
 0xea3   :  { %v2035_v35 = vsub.f32 %v1949_v28, %v2031_v34 }
 0xea5   :  { %v2037_v42 = vmul.f32 1.442695, %v2035_v35 }
 0xea6   :  { %v2128_v36 = vpop.permute.xlu1 %2127  ;;  %v2034_v37 = vpop.xlane.xlu0 %2033 }
 0xea7   :  { %7998 = vpow2.f32 %v2037_v42  ;;  %v2036_v38 = vsub.f32 %v2025_v31, %v2034_v37  ;;  %7593 = vmatpush3.msra.mxu1 %v2128_v36 }
 0xea8   :  { %7602 = vmatprep.subr.mxu1 %v8160_v6 }
 0xea9   :  { %v2039_v39 = vmul.f32 1.442695, %v2036_v38 }
 0xeaa   :  { %v2052_v40 = vpop.permute.xlu0 %2051  ;;  %v2206_v46 = vpop.permute.xlu1 %2205 }
 0xeab   :  { %8000 = vpow2.f32 %v2039_v39  ;;  %7588 = vmatpush3.msra.mxu0 %v2052_v40 }
 0xeac   :  { %7597 = vmatprep.subr.mxu0 %v8160_v6 }
 0xeb4   :  { %v7999_v41 = vpop.eup %7998 }
 0xeb5   :  { %v2041_v44 = vsel %vm198_vm2, %v7999_v41, 0.0 }
 0xeb6   :  { %2042 = vadd.xlane.f32.xlu0 %v2041_v44 }
 0xeb8   :  { %v8001_v43 = vpop.eup %8000 }
 0xeb9   :  { %v2044_v45 = vsel %vm198_vm2, %v8001_v43, 0.0 }
 0xeba   :  { %2045 = vadd.xlane.f32.xlu1 %v2044_v45 }
 0xecb   :  { %2203 = vrot.lane.b32.xlu1 %v8555_v25, %s9290_s22 }
 0xecc   :  { %2283 = vrot.lane.b32.xlu0 %v8557_v26, %s9290_s22 }
 0xed0   :  { %2281 = vrot.lane.b32.xlu0 %v8565_v27, %s9290_s22  ;;  %s9311_s22 = smov 56  }
 0xf3f   :  { %v2043_v2 = vpop.xlane.xlu0 %2042 }
 0xf40   :  { %8002 = vrcp.f32 %v2043_v2 }
 0xf43   :  { %v2046_v5 = vpop.xlane.xlu1 %2045  ;;  %v2284_v50 = vpop.permute.xlu0 %2283 }
 0xf44   :  { %8004 = vrcp.f32 %v2046_v5 }
 0xf47   :  { %v2204_v52 = vpop.permute.xlu1 %2203  ;;  %v2282_v53 = vpop.permute.xlu0 %2281 }
 0xf4d   :  { %v8003_v47 = vpop.eup %8002 }
 0xf4e   :  { %v2049_v48 = vmul.f32 %v8003_v47, %v7999_v41 }
 0xf50   :  { %7590 = vmatmul.mubr.msk.f32.vlgmr.msra.gmra.mxu0 %vm198_vm2, %v2049_v48 }
 0xf51   :  { %v8005_v49 = vpop.eup %8004  ;;  %7598 = vmatpush3.xpose.msk.msra.mxu0 %vm198_vm2, %v2206_v46  ;;  %7599 = vmatprep.mubr.msk.f32.mxu0 %vm8161_vm1, %v8160_v6 }
 0xf52   :  { %v2050_v51 = vmul.f32 %v8005_v49, %v8001_v43  ;;  %7607 = vmatprep.subr.mxu0 %v8160_v6 }
 0xf54   :  { %7595 = vmatmul.mubr.msk.f32.vlgmr.msra.gmra.mxu1 %vm198_vm2, %v2050_v51  ;;  %7600 = vmatmul.mubr.msk.f32.vlgmr.msra.gmra.mxu0 %vm198_vm2, %v2204_v52 }
 0xf55   :  { %7603 = vmatpush3.xpose.msk.msra.mxu1 %vm198_vm2, %v2284_v50  ;;  %7604 = vmatprep.mubr.msk.f32.mxu1 %vm8161_vm1, %v8160_v6 }
 0xf56   :  { %7612 = vmatprep.subr.mxu1 %v8160_v6  ;;  %7609 = vmatprep.mubr.msk.f32.mxu0 %vm8161_vm1, %v8160_v6 }
 0xf58   :  { %7605 = vmatmul.mubr.msk.f32.vlgmr.msra.gmra.mxu1 %vm198_vm2, %v2282_v53 }
 0xf59   :  { %7614 = vmatprep.mubr.msk.f32.mxu1 %vm8161_vm1, %v8160_v6 }
0x1010   :  { %v8606_v54 = vpop.f32.mrf.mxu0 }
0x1012   :  { %v7591_v55 = vpop.f32.mrf.mxu0 }
0x1014   :  { %v8608_v56 = vpop.f32.mrf.mxu1  ;;  %v2277_v57 = vpop.f32.mrf.mxu0 }
0x1015   :  { %v2359_v58 = vsel %vm198_vm2, %v2277_v57, -inf }
0x1016   :  { %2360 = vmax.xlane.f32.xlu1 %v2359_v58  ;;  %v7596_v59 = vpop.f32.mrf.mxu1  ;;  %v7601_v60 = vpop.f32.mrf.mxu0 }
0x1018   :  { %v2355_v61 = vpop.f32.mrf.mxu1 }
0x1019   :  { %v2362_v62 = vsel %vm198_vm2, %v2355_v61, -inf }
0x101a   :  { %2363 = vmax.xlane.f32.xlu0 %v2362_v62  ;;  %v7606_v63 = vpop.f32.mrf.mxu1 }
0x1027   :  { %2457 = vrot.lane.b32.xlu1 %v8557_v26, %s9292_s1 }
0x102b   :  { %2535 = vrot.lane.b32.xlu1 %v8550_v22, %s9286_s14 }
0x1030   :  { %2381 = vrot.lane.b32.xlu0 %v8550_v22, %s9292_s1 }
0x109f   :  { %v2361_v0 = vpop.xlane.xlu1 %2360 }
0x10a0   :  { %v2365_v1 = vsub.f32 %v2277_v57, %v2361_v0 }
0x10a2   :  { %v2367_v10 = vmul.f32 1.442695, %v2365_v1 }
0x10a3   :  { %v2458_v3 = vpop.permute.xlu1 %2457  ;;  %v2364_v4 = vpop.xlane.xlu0 %2363 }
0x10a4   :  { %8006 = vpow2.f32 %v2367_v10  ;;  %v2366_v7 = vsub.f32 %v2355_v61, %v2364_v4  ;;  %7613 = vmatpush3.msra.mxu1 %v2458_v3 }
0x10a5   :  { %7622 = vmatprep.subr.mxu1 %v8160_v6 }
0x10a6   :  { %v2369_v8 = vmul.f32 1.442695, %v2366_v7 }
0x10a7   :  { %v2382_v9 = vpop.permute.xlu0 %2381  ;;  %v2536_v16 = vpop.permute.xlu1 %2535 }
0x10a8   :  { %8008 = vpow2.f32 %v2369_v8  ;;  %7608 = vmatpush3.msra.mxu0 %v2382_v9 }
0x10a9   :  { %7617 = vmatprep.subr.mxu0 %v8160_v6 }
0x10b1   :  { %v8007_v12 = vpop.eup %8006 }
0x10b2   :  { %v2371_v13 = vsel %vm198_vm2, %v8007_v12, 0.0 }
0x10b3   :  { %2372 = vadd.xlane.f32.xlu0 %v2371_v13 }
0x10b5   :  { %v8009_v14 = vpop.eup %8008 }
0x10b6   :  { %v2374_v15 = vsel %vm198_vm2, %v8009_v14, 0.0 }
0x10b7   :  { %2375 = vadd.xlane.f32.xlu1 %v2374_v15 }
0x10c8   :  { %2533 = vrot.lane.b32.xlu1 %v8555_v25, %s9286_s14 }
0x10c9   :  { %2613 = vrot.lane.b32.xlu0 %v8557_v26, %s9286_s14 }
0x10cd   :  { %2611 = vrot.lane.b32.xlu0 %v8565_v27, %s9286_s14 }
0x113c   :  { %v2373_v11 = vpop.xlane.xlu0 %2372 }
0x113d   :  { %8010 = vrcp.f32 %v2373_v11 }
0x1140   :  { %v2376_v19 = vpop.xlane.xlu1 %2375  ;;  %v2614_v24 = vpop.permute.xlu0 %2613 }
0x1141   :  { %8012 = vrcp.f32 %v2376_v19 }
0x1144   :  { %v2534_v29 = vpop.permute.xlu1 %2533  ;;  %v2612_v30 = vpop.permute.xlu0 %2611 }
0x114a   :  { %v8011_v20 = vpop.eup %8010 }
0x114b   :  { %v2379_v21 = vmul.f32 %v8011_v20, %v8007_v12 }
0x114d   :  { %7610 = vmatmul.mubr.msk.f32.vlgmr.msra.gmra.mxu0 %vm198_vm2, %v2379_v21 }
0x114e   :  { %v8013_v23 = vpop.eup %8012  ;;  %7618 = vmatpush3.xpose.msk.msra.mxu0 %vm198_vm2, %v2536_v16  ;;  %7619 = vmatprep.mubr.msk.f32.mxu0 %vm8161_vm1, %v8160_v6 }
0x114f   :  { %v2380_v28 = vmul.f32 %v8013_v23, %v8009_v14  ;;  %7627 = vmatprep.subr.mxu0 %v8160_v6 }
0x1151   :  { %7615 = vmatmul.mubr.msk.f32.vlgmr.msra.gmra.mxu1 %vm198_vm2, %v2380_v28  ;;  %7620 = vmatmul.mubr.msk.f32.vlgmr.msra.gmra.mxu0 %vm198_vm2, %v2534_v29 }
0x1152   :  { %7623 = vmatpush3.xpose.msk.msra.mxu1 %vm198_vm2, %v2614_v24  ;;  %7624 = vmatprep.mubr.msk.f32.mxu1 %vm8161_vm1, %v8160_v6 }
0x1153   :  { %7632 = vmatprep.subr.mxu1 %v8160_v6  ;;  %7629 = vmatprep.mubr.msk.f32.mxu0 %vm8161_vm1, %v8160_v6 }
0x1155   :  { %7625 = vmatmul.mubr.msk.f32.vlgmr.msra.gmra.mxu1 %vm198_vm2, %v2612_v30 }
0x1156   :  { %7634 = vmatprep.mubr.msk.f32.mxu1 %vm8161_vm1, %v8160_v6 }
0x120d   :  { %v8644_v31 = vpop.f32.mrf.mxu0 }
0x120f   :  { %v7611_v32 = vpop.f32.mrf.mxu0 }
0x1210   :  { %v1688_v32 = vld [vmem:[#allocation2 + $0x18] sm:$0xff] }
0x1211   :  { %v8646_v33 = vpop.f32.mrf.mxu1  ;;  %v2607_v34 = vpop.f32.mrf.mxu0 }
0x1212   :  { %v2689_v35 = vsel %vm198_vm2, %v2607_v34, -inf }
0x1213   :  { %2690 = vmax.xlane.f32.xlu1 %v2689_v35  ;;  %v7616_v42 = vpop.f32.mrf.mxu1  ;;  %v7621_v36 = vpop.f32.mrf.mxu0  ;;  %v1685_v35 = vld [vmem:[#allocation2] sm:$0xff] }
0x1215   :  { %v2685_v37 = vpop.f32.mrf.mxu1 }
0x1216   :  { %v2692_v38 = vsel %vm198_vm2, %v2685_v37, -inf }
0x1217   :  { %2693 = vmax.xlane.f32.xlu0 %v2692_v38  ;;  %v7626_v39 = vpop.f32.mrf.mxu1 }
0x1224   :  { %2787 = vrot.lane.b32.xlu1 %v8557_v26, %s9288_s25 }
0x1228   :  { %2865 = vrot.lane.b32.xlu1 %v8550_v22, %s9284_s26 }
0x122d   :  { %2711 = vrot.lane.b32.xlu0 %v8550_v22, %s9288_s25  ;;  %s9312_s25 = smov 80  }
0x129c   :  { %v2691_v40 = vpop.xlane.xlu1 %2690 }
0x129d   :  { %v2695_v41 = vsub.f32 %v2607_v34, %v2691_v40  ;;  %v1686_v34 = vld [vmem:[#allocation2 + $0x8] sm:$0xff] }
0x129f   :  { %v2697_v44 = vmul.f32 1.442695, %v2695_v41 }
0x12a0   :  { %v2788_v43 = vpop.permute.xlu1 %2787  ;;  %v2694_v45 = vpop.xlane.xlu0 %2693 }
0x12a1   :  { %8014 = vpow2.f32 %v2697_v44  ;;  %v2696_v46 = vsub.f32 %v2685_v37, %v2694_v45  ;;  %7633 = vmatpush3.msra.mxu1 %v2788_v43 }
0x12a2   :  { %7642 = vmatprep.subr.mxu1 %v8160_v6 }
0x12a3   :  { %v2699_v2 = vmul.f32 1.442695, %v2696_v46 }
0x12a4   :  { %v2712_v5 = vpop.permute.xlu0 %2711  ;;  %v2866_v51 = vpop.permute.xlu1 %2865 }
0x12a5   :  { %8016 = vpow2.f32 %v2699_v2  ;;  %7628 = vmatpush3.msra.mxu0 %v2712_v5 }
0x12a6   :  { %7637 = vmatprep.subr.mxu0 %v8160_v6 }
0x12ae   :  { %v8015_v47 = vpop.eup %8014 }
0x12af   :  { %v2701_v48 = vsel %vm198_vm2, %v8015_v47, 0.0 }
0x12b0   :  { %2702 = vadd.xlane.f32.xlu0 %v2701_v48 }
0x12b2   :  { %v8017_v49 = vpop.eup %8016 }
0x12b3   :  { %v2704_v50 = vsel %vm198_vm2, %v8017_v49, 0.0 }
0x12b4   :  { %2705 = vadd.xlane.f32.xlu1 %v2704_v50 }
0x12c5   :  { %2863 = vrot.lane.b32.xlu1 %v8555_v25, %s9284_s26 }
0x12c6   :  { %2943 = vrot.lane.b32.xlu0 %v8557_v26, %s9284_s26 }
0x12ca   :  { %2941 = vrot.lane.b32.xlu0 %v8565_v27, %s9284_s26  ;;  %s9310_s26 = smov 120  }
0x1339   :  { %v2703_v52 = vpop.xlane.xlu0 %2702 }
0x133a   :  { %8018 = vrcp.f32 %v2703_v52 }
0x133d   :  { %v2706_v53 = vpop.xlane.xlu1 %2705  ;;  %v2944_v59 = vpop.permute.xlu0 %2943 }
0x133e   :  { %8020 = vrcp.f32 %v2706_v53 }
0x1341   :  { %v2864_v27 = vpop.permute.xlu1 %2863  ;;  %v2942_v60 = vpop.permute.xlu0 %2941 }
0x1347   :  { %v8019_v55 = vpop.eup %8018 }
0x1348   :  { %v2709_v57 = vmul.f32 %v8019_v55, %v8015_v47 }
0x134a   :  { %7630 = vmatmul.mubr.msk.f32.vlgmr.msra.gmra.mxu0 %vm198_vm2, %v2709_v57 }
0x134b   :  { %v8021_v58 = vpop.eup %8020  ;;  %7638 = vmatpush3.xpose.msk.msra.mxu0 %vm198_vm2, %v2866_v51  ;;  %7639 = vmatprep.mubr.msk.f32.mxu0 %vm8161_vm1, %v8160_v6 }
0x134c   :  { %v2710_v25 = vmul.f32 %v8021_v58, %v8017_v49  ;;  %7647 = vmatprep.subr.mxu0 %v8160_v6 }
0x134e   :  { %7635 = vmatmul.mubr.msk.f32.vlgmr.msra.gmra.mxu1 %vm198_vm2, %v2710_v25  ;;  %7640 = vmatmul.mubr.msk.f32.vlgmr.msra.gmra.mxu0 %vm198_vm2, %v2864_v27 }
0x134f   :  { %7643 = vmatpush3.xpose.msk.msra.mxu1 %vm198_vm2, %v2944_v59  ;;  %7644 = vmatprep.mubr.msk.f32.mxu1 %vm8161_vm1, %v8160_v6 }
0x1350   :  { %7652 = vmatprep.subr.mxu1 %v8160_v6  ;;  %7649 = vmatprep.mubr.msk.f32.mxu0 %vm8161_vm1, %v8160_v6 }
0x1352   :  { %7645 = vmatmul.mubr.msk.f32.vlgmr.msra.gmra.mxu1 %vm198_vm2, %v2942_v60 }
0x1353   :  { %7654 = vmatprep.mubr.msk.f32.mxu1 %vm8161_vm1, %v8160_v6 }
0x140a   :  { %v2783_v61 = vpop.f32.mrf.mxu0 }
0x140c   :  { %v7631_v62 = vpop.f32.mrf.mxu0 }
0x140e   :  { %v2859_v63 = vpop.f32.mrf.mxu1  ;;  %v2937_v0 = vpop.f32.mrf.mxu0 }
0x140f   :  { %v3019_v1 = vsel %vm198_vm2, %v2937_v0, -inf }
0x1410   :  { %3020 = vmax.xlane.f32.xlu1 %v3019_v1  ;;  %v7636_v10 = vpop.f32.mrf.mxu1  ;;  %v7641_v3 = vpop.f32.mrf.mxu0 }
0x1411   :  { %v3358_v10 = vld [vmem:[#allocation4 + $0x10] sm:$0xff]  ;;  %v3357_v3 = vld [vmem:[#allocation4 + $0x8] sm:$0xff] }
0x1412   :  { %v3015_v4 = vpop.f32.mrf.mxu1 }
0x1413   :  { %v3022_v7 = vsel %vm198_vm2, %v3015_v4, -inf }
0x1414   :  { %3023 = vmax.xlane.f32.xlu0 %v3022_v7  ;;  %v7646_v8 = vpop.f32.mrf.mxu1  ;;  %v3457_v7 = vld [vmem:[%s9258_s16 + $0x38] sm:$0xff] }
0x1415   :  { %v3456_v8 = vld [vmem:[%s9258_s16 + $0x30] sm:$0xff] }
0x1499   :  { %v3021_v9 = vpop.xlane.xlu1 %3020 }
0x149a   :  { %v3025_v12 = vsub.f32 %v2937_v0, %v3021_v9  ;;  %v3455_v9 = vld [vmem:[%s9258_s16 + $0x28] sm:$0xff] }
0x149c   :  { %v3027_v13 = vmul.f32 1.442695, %v3025_v12  ;;  %v3454_v12 = vld [vmem:[%s9258_s16 + $0x20] sm:$0xff] }
0x149d   :  { %v3024_v14 = vpop.xlane.xlu0 %3023 }
0x149e   :  { %8022 = vpow2.f32 %v3027_v13  ;;  %v3026_v15 = vsub.f32 %v3015_v4, %v3024_v14  ;;  %v3356_v4 = vld [vmem:[#allocation4] sm:$0xff] }
0x14a0   :  { %v3029_v16 = vmul.f32 1.442695, %v3026_v15 }
0x14a2   :  { %8024 = vpow2.f32 %v3029_v16 }
0x14ab   :  { %v8023_v11 = vpop.eup %8022 }
0x14ac   :  { %v3031_v19 = vsel %vm198_vm2, %v8023_v11, 0.0 }
0x14ad   :  { %3032 = vadd.xlane.f32.xlu0 %v3031_v19 }
0x14af   :  { %v8025_v20 = vpop.eup %8024 }
0x14b0   :  { %v3034_v21 = vsel %vm198_vm2, %v8025_v20, 0.0 }
0x14b1   :  { %3035 = vadd.xlane.f32.xlu1 %v3034_v21  ;;  %v7121_v21 = vld [vmem:[%s9254_s12] ss:$0 sm:$0xff] }
0x14c2   :  { %3117 = vrot.lane.b32.xlu1 %v8557_v26, %s9306_s21 }
0x14c3   :  { %3041 = vrot.lane.b32.xlu0 %v8550_v22, %s9306_s21 }
0x14c6   :  { %3195 = vrot.lane.b32.xlu1 %v8644_v31, %s9307_s23 }
0x14c7   :  { %3197 = vrot.lane.b32.xlu0 %v8646_v33, %s9307_s23  ;;  %v1687_v33 = vld [vmem:[#allocation2 + $0x10] sm:$0xff] }
0x14ca   :  { %3203 = vrot.lane.b32.xlu1 %v2783_v61, %s9308_s3 }
0x14cb   :  { %3205 = vrot.lane.b32.xlu0 %v2859_v63, %s9308_s3 }
0x1536   :  { %v3033_v23 = vpop.xlane.xlu0 %3032 }
0x1537   :  { %8026 = vrcp.f32 %v3033_v23 }
0x153a   :  { %v3036_v24 = vpop.xlane.xlu1 %3035  ;;  %v3042_v28 = vpop.permute.xlu0 %3041 }
0x153b   :  { %8028 = vrcp.f32 %v3036_v24  ;;  %7648 = vmatpush3.msra.mxu0 %v3042_v28 }
0x153c   :  { %7657 = vmatprep.subr.mxu0 %v1688_v32 }
0x153e   :  { %v3118_v26 = vpop.permute.xlu1 %3117  ;;  %v3198_v40 = vpop.permute.xlu0 %3197 }
0x153f   :  { %7653 = vmatpush3.msra.mxu1 %v3118_v26  ;;  %v3218_v5 = vsel %vm198_vm2, %v8608_v56, %v3198_v40 }
0x1542   :  { %v3196_v39 = vpop.permute.xlu1 %3195  ;;  %v3206_v43 = vpop.permute.xlu0 %3205 }
0x1543   :  { %v3217_v44 = vsel %vm198_vm2, %v8606_v54, %v3196_v39  ;;  %v3220_v47 = vsel %vm1540_vm4, %v3218_v5, %v3206_v43  ;;  %v7118_v54 = vld [vmem:[%s9251_s9] ss:$0 sm:$0xff]  ;;  %v7131_v43 = vld [vmem:[%s9301_s0 + $0x30] sm:$0xff] }
0x1544   :  { %v8027_v29 = vpop.eup %8026 }
0x1545   :  { %v3039_v22 = vmul.f32 %v8027_v29, %v8023_v11  ;;  %v7122_v29 = vld [vmem:[%s9255_s13] ss:$0 sm:$0xff] }
0x1546   :  { %v3204_v41 = vpop.permute.xlu1 %3203 }
0x1547   :  { %7650 = vmatmul.mubr.msk.f32.vlgmr.msra.gmra.mxu0 %vm198_vm2, %v3039_v22  ;;  %v3219_v45 = vsel %vm1540_vm4, %v3217_v44, %v3204_v41  ;;  %v7132_v44 = vld [vmem:[%s9301_s0 + $0x38] sm:$0xff] }
0x1548   :  { %v8029_v30 = vpop.eup %8028  ;;  %7658 = vmatpush3.msra.mxu0 %v1688_v32  ;;  %v3453_v32 = vld [vmem:[%s9258_s16 + $0x18] sm:$0xff] }
0x1549   :  { %v3040_v31 = vmul.f32 %v8029_v30, %v8025_v20  ;;  %7659 = vmatprep.subr.mxu0 %v1687_v33 }
0x154a   :  { %7660 = vmatpush3.msra.mxu0 %v1687_v33  ;;  %v3452_v33 = vld [vmem:[%s9258_s16 + $0x10] sm:$0xff] }
0x154b   :  { %7655 = vmatmul.mubr.msk.f32.vlgmr.msra.gmra.mxu1 %vm198_vm2, %v3040_v31  ;;  %7661 = vmatprep.subr.mxu0 %v1686_v34 }
0x154c   :  { %7662 = vmatpush3.msra.mxu0 %v1686_v34  ;;  %v3451_v34 = vld [vmem:[%s9258_s16 + $0x8] sm:$0xff] }
0x154d   :  { %7663 = vmatprep.subr.mxu0 %v1685_v35 }
0x154e   :  { %7664 = vmatpush3.msra.mxu0 %v1685_v35  ;;  %v3450_v35 = vld [vmem:[%s9258_s16] sm:$0xff] }
0x154f   :  { %7679 = vmatprep.subr.mxu0 %v3457_v7 }
0x1607   :  { %v3113_v42 = vpop.f32.mrf.mxu0 }
0x1608   :  { %3211 = vrot.lane.b32.xlu1 %v3113_v42, %s9282_s4  ;;  %v7123_v42 = vld [vmem:[%s9257_s15] ss:$0 sm:$0xff] }
0x1609   :  { %v7651_v36 = vpop.f32.mrf.mxu0 }
0x160b   :  { %v3189_v37 = vpop.f32.mrf.mxu1 }
0x160c   :  { %3213 = vrot.lane.b32.xlu0 %v3189_v37, %s9282_s4  ;;  %s9313_s4 = smov 112  }
0x160d   :  { %v7656_v38 = vpop.f32.mrf.mxu1 }
0x167a   :  { %v3212_v46 = vpop.permute.xlu1 %3211 }
0x167b   :  { %v3221_v2 = vsel %vm1543_vm3, %v3219_v45, %v3212_v46  ;;  %v7130_v45 = vld [vmem:[%s9301_s0 + $0x28] sm:$0xff]  ;;  %v7129_v46 = vld [vmem:[%s9301_s0 + $0x20] sm:$0xff]  ;;  %s9317_s0 = smov 24  }
0x167c   :  { %7665 = vmatprep.mubr.msk.f32.mxu0 %vm113_vm0, %v3221_v2  ;;  %v7126_v2 = vld [vmem:[%s9259_s17] ss:$0 sm:$0xff] }
0x167e   :  { %v3214_v48 = vpop.permute.xlu0 %3213 }
0x167f   :  { %v3222_v49 = vsel %vm1543_vm3, %v3220_v47, %v3214_v48 }
0x1680   :  { %7666 = vmatmul.mubr.msk.f32.vlgmr.msra.gmra.mxu0 %vm113_vm0, %v3222_v49 }
0x1681   :  { %7680 = vmatpush3.msra.mxu0 %v3457_v7 }
0x1682   :  { %7681 = vmatprep.subr.mxu0 %v3456_v8 }
0x1683   :  { %7682 = vmatpush3.msra.mxu0 %v3456_v8 }
0x1684   :  { %7683 = vmatprep.subr.mxu0 %v3455_v9 }
0x1685   :  { %7684 = vmatpush3.msra.mxu0 %v3455_v9 }
0x1686   :  { %7685 = vmatprep.subr.mxu0 %v3454_v12 }
0x1687   :  { %7686 = vmatpush3.msra.mxu0 %v3454_v12 }
0x1688   :  { %7687 = vmatprep.subr.mxu0 %v3453_v32 }
0x1689   :  { %7688 = vmatpush3.msra.mxu0 %v3453_v32 }
0x168a   :  { %7689 = vmatprep.subr.mxu0 %v3452_v33 }
0x168b   :  { %7690 = vmatpush3.msra.mxu0 %v3452_v33 }
0x168c   :  { %7691 = vmatprep.subr.mxu0 %v3451_v34 }
0x168d   :  { %7692 = vmatpush3.msra.mxu0 %v3451_v34 }
0x168e   :  { %7693 = vmatprep.subr.mxu0 %v3450_v35 }
0x168f   :  { %7694 = vmatpush3.msra.mxu0 %v3450_v35 }
0x1690   :  { %7719 = vmatprep.subr.mxu0 %v8160_v6 }
0x1740   :  { %v7667_v50 = vpop.f32.mrf.mxu0 }
0x1741   :  { %v3307_v51 = vadd.f32 %v7667_v50, %v7118_v54 }
0x1742   :  { %v3301_v52 = vpop.f32.mrf.mxu0 }
0x1743   :  { %v3302_v53 = vadd.f32 %v7118_v54, %v3301_v52  ;;  %v3311_v55 = vadd.f32 %v3307_v51, %v8542_v18  ;;  %v7139_v51 = vld [vmem:[%s9303_s8 + $0x1] ss:$0 sm:$0xff]  ;;  %s9309_s8 = smov 64  }
0x1745   :  { %v3310_v57 = vadd.f32 %v3302_v53, %v8540_v17  ;;  %v3317_v56 = vsel %vm113_vm0, %v3311_v55, 0.0  ;;  %v3359_v17 = vld [vmem:[#allocation4 + $0x18] sm:$0xff] }
0x1746   :  { %3318 = vadd.xlane.f32.xlu0 %v3317_v56  ;;  %7668 = vmatprep.subr.mxu1 %v3359_v17 }
0x1747   :  { %v3314_v58 = vsel %vm113_vm0, %v3310_v57, 0.0  ;;  %7669 = vmatpush3.msra.mxu1 %v3359_v17 }
0x1748   :  { %3315 = vadd.xlane.f32.xlu1 %v3314_v58  ;;  %7670 = vmatprep.subr.mxu1 %v3358_v10 }
0x1749   :  { %7671 = vmatpush3.msra.mxu1 %v3358_v10 }
0x174a   :  { %7672 = vmatprep.subr.mxu1 %v3357_v3 }
0x174b   :  { %7673 = vmatpush3.msra.mxu1 %v3357_v3 }
0x174c   :  { %7674 = vmatprep.subr.mxu1 %v3356_v4 }
0x174d   :  { %7675 = vmatpush3.msra.mxu1 %v3356_v4 }
0x174e   :  { %7698 = vmatprep.subr.mxu1 %v7132_v44 }
0x17cf   :  { %v3319_v59 = vpop.xlane.xlu0 %3318 }
0x17d0   :  { %v3321_v25 = vmul.f32 0.03125, %v3319_v59 }
0x17d1   :  { %v3316_v27 = vpop.xlane.xlu1 %3315 }
0x17d2   :  { %v3323_v60 = vsub.f32 %v3311_v55, %v3321_v25  ;;  %v3320_v61 = vmul.f32 0.03125, %v3316_v27 }
0x17d4   :  { %v3322_v62 = vsub.f32 %v3310_v57, %v3320_v61  ;;  %v3325_v63 = vmul.f32 %v3323_v60, %v3323_v60 }
0x17d6   :  { %v3329_v0 = vsel %vm113_vm0, %v3325_v63, 0.0  ;;  %v3324_v1 = vmul.f32 %v3322_v62, %v3322_v62 }
0x17d7   :  { %3330 = vadd.xlane.f32.xlu1 %v3329_v0 }
0x17d8   :  { %v3326_v18 = vsel %vm113_vm0, %v3324_v1, 0.0 }
0x17d9   :  { %3327 = vadd.xlane.f32.xlu0 %v3326_v18 }
0x1860   :  { %v3331_v13 = vpop.xlane.xlu1 %3330 }
0x1861   :  { %v3333_v14 = vmul.f32 0.03125, %v3331_v13 }
0x1862   :  { %v3328_v15 = vpop.xlane.xlu0 %3327 }
0x1863   :  { %v3335_v16 = vadd.f32 1e-05, %v3333_v14  ;;  %v3332_v11 = vmul.f32 0.03125, %v3328_v15 }
0x1865   :  { %8030 = vrsqrt.f32 %v3335_v16  ;;  %v3334_v19 = vadd.f32 1e-05, %v3332_v11 }
0x1867   :  { %8032 = vrsqrt.f32 %v3334_v19 }
0x1872   :  { %v8031_v20 = vpop.eup %8030 }
0x1873   :  { %v3339_v23 = vmul.f32 %v8031_v20, %v3323_v60 }
0x1874   :  { %v8033_v24 = vpop.eup %8032 }
0x1875   :  { %v3338_v28 = vmul.f32 %v8033_v24, %v3322_v62  ;;  %v3347_v26 = vmul.f32 %v7121_v21, %v3339_v23 }
0x1877   :  { %v3346_v22 = vmul.f32 %v7121_v21, %v3338_v28  ;;  %v3355_v31 = vadd.f32 %v7122_v29, %v3347_v26 }
0x1879   :  { %v3354_v30 = vadd.f32 %v7122_v29, %v3346_v22 }
0x187b   :  { %7676 = vmatprep.mubr.msk.f32.mxu1 %vm113_vm0, %v3354_v30 }
0x187c   :  { %7677 = vmatmul.mubr.msk.f32.vlgmr.msra.gmra.mxu1 %vm113_vm0, %v3355_v31 }
0x187d   :  { %7699 = vmatpush3.msra.mxu1 %v7132_v44 }
0x187e   :  { %7700 = vmatprep.subr.mxu1 %v7131_v43 }
0x187f   :  { %7701 = vmatpush3.msra.mxu1 %v7131_v43 }
0x1880   :  { %7702 = vmatprep.subr.mxu1 %v7130_v45 }
0x1881   :  { %7703 = vmatpush3.msra.mxu1 %v7130_v45 }
0x1882   :  { %7704 = vmatprep.subr.mxu1 %v7129_v46 }
0x1883   :  { %7705 = vmatpush3.msra.mxu1 %v7129_v46 }
0x1884   :  { %7709 = vmatprep.subr.mxu1 %v8160_v6 }
0x193c   :  { %v7678_v36 = vpop.f32.mrf.mxu1 }
0x193d   :  { %v3445_v37 = vadd.f32 %v7678_v36, %v7123_v42 }
0x193e   :  { %v3439_v38 = vpop.f32.mrf.mxu1 }
0x193f   :  { %v3440_v39 = vadd.f32 %v7123_v42, %v3439_v38  ;;  %v3449_v41 = vmax.f32 %v3445_v37, 0.0 }
0x1941   :  { %v3448_v40 = vmax.f32 %v3440_v39, 0.0 }
0x1943   :  { %7695 = vmatprep.mubr.msk.f32.mxu0 %vm3465_vm5, %v3448_v40 }
0x1944   :  { %7696 = vmatmul.mubr.msk.f32.vlgmr.msra.gmra.mxu0 %vm3465_vm5, %v3449_v41 }
0x1945   :  { %7721 = vmatprep.mubr.msk.f32.mxu0 %vm8161_vm1, %v8160_v6 }
0x1a04   :  { %v7697_v5 = vpop.f32.mrf.mxu0 }
0x1a05   :  { %v3544_v47 = vadd.f32 %v7697_v5, %v7126_v2 }
0x1a06   :  { %v3538_v48 = vpop.f32.mrf.mxu0 }
0x1a07   :  { %v3539_v49 = vadd.f32 %v7126_v2, %v3538_v48  ;;  %v8777_v50 = vadd.f32 %v3544_v47, %v3355_v31 }
0x1a09   :  { %v8775_v54 = vadd.f32 %v3539_v49, %v3354_v30 }
0x1a0b   :  { %7706 = vmatprep.mubr.msk.f32.mxu1 %vm113_vm0, %v8775_v54 }
0x1a0c   :  { %7707 = vmatmul.mubr.msk.f32.vlgmr.msra.gmra.mxu1 %vm113_vm0, %v8777_v50 }
0x1a0d   :  { %7711 = vmatprep.mubr.msk.f32.mxu1 %vm8161_vm1, %v8160_v6 }
0x1acc   :  { %v7708_v52 = vpop.f32.mrf.mxu1 }
0x1acd   :  { %v8788_v53 = vadd.f32 %v7708_v52, %v7139_v51 }
0x1ace   :  { %v3641_v55 = vpop.f32.mrf.mxu1 }
0x1acf   :  { %v8790_v57 = vadd.f32 %v7139_v51, %v3641_v55  ;;  %3728 = vrot.lane.b32.xlu1 %v8788_v53, %s9294_s30 }
0x1ad1   :  { %3651 = vrot.lane.b32.xlu0 %v8790_v57, %s9294_s30 }
0x1b41   :  { %v3729_v58 = vpop.permute.xlu1 %3728 }
0x1b43   :  { %v3652_v56 = vpop.permute.xlu0 %3651 }
0x1b44   :  { %7710 = vmatpush3.xpose.msk.msra.mxu1 %vm198_vm2, %v3652_v56 }
0x1b45   :  { %7714 = vmatprep.subr.mxu1 %v8160_v6 }
0x1b47   :  { %7712 = vmatmul.mubr.msk.f32.vlgmr.msra.gmra.mxu1 %vm198_vm2, %v8790_v57 }
0x1b48   :  { %7715 = vmatpush3.xpose.msk.msra.mxu1 %vm198_vm2, %v3729_v58  ;;  %7716 = vmatprep.mubr.msk.f32.mxu1 %vm8161_vm1, %v8160_v6 }
0x1b49   :  { %7724 = vmatprep.subr.mxu1 %v8160_v6 }
0x1b4b   :  { %7717 = vmatmul.mubr.msk.f32.vlgmr.msra.gmra.mxu1 %vm198_vm2, %v8788_v53 }
0x1b4c   :  { %7726 = vmatprep.mubr.msk.f32.mxu1 %vm8161_vm1, %v8160_v6 }
0x1c07   :  { %v3723_v59 = vpop.f32.mrf.mxu1 }
0x1c08   :  { %v3804_v25 = vsel %vm198_vm2, %v3723_v59, -inf }
0x1c09   :  { %3805 = vmax.xlane.f32.xlu1 %v3804_v25  ;;  %v7713_v27 = vpop.f32.mrf.mxu1 }
0x1c0b   :  { %v3800_v60 = vpop.f32.mrf.mxu1 }
0x1c0c   :  { %v3807_v61 = vsel %vm198_vm2, %v3800_v60, -inf }
0x1c0d   :  { %3808 = vmax.xlane.f32.xlu0 %v3807_v61  ;;  %v7718_v62 = vpop.f32.mrf.mxu1 }
0x1c1a   :  { %3902 = vrot.lane.b32.xlu1 %v8788_v53, %s9309_s8 }
0x1c1e   :  { %3980 = vrot.lane.b32.xlu1 %v8790_v57, %s9292_s1 }
0x1c23   :  { %3826 = vrot.lane.b32.xlu0 %v8790_v57, %s9309_s8 }
0x1c92   :  { %v3806_v63 = vpop.xlane.xlu1 %3805 }
0x1c93   :  { %v3810_v0 = vsub.f32 %v3723_v59, %v3806_v63 }
0x1c95   :  { %v3812_v1 = vmul.f32 1.442695, %v3810_v0 }
0x1c96   :  { %v3903_v18 = vpop.permute.xlu1 %3902  ;;  %v3809_v17 = vpop.xlane.xlu0 %3808 }
0x1c97   :  { %8034 = vpow2.f32 %v3812_v1  ;;  %v3811_v10 = vsub.f32 %v3800_v60, %v3809_v17  ;;  %7725 = vmatpush3.msra.mxu1 %v3903_v18 }
0x1c98   :  { %7734 = vmatprep.subr.mxu1 %v8160_v6 }
0x1c99   :  { %v3814_v3 = vmul.f32 1.442695, %v3811_v10 }
0x1c9a   :  { %v3827_v4 = vpop.permute.xlu0 %3826  ;;  %v3981_v13 = vpop.permute.xlu1 %3980 }
0x1c9b   :  { %8036 = vpow2.f32 %v3814_v3  ;;  %7720 = vmatpush3.msra.mxu0 %v3827_v4 }
0x1c9c   :  { %7729 = vmatprep.subr.mxu0 %v8160_v6 }
0x1ca4   :  { %v8035_v7 = vpop.eup %8034 }
0x1ca5   :  { %v3816_v8 = vsel %vm198_vm2, %v8035_v7, 0.0 }
0x1ca6   :  { %3817 = vadd.xlane.f32.xlu0 %v3816_v8 }
0x1ca8   :  { %v8037_v9 = vpop.eup %8036 }
0x1ca9   :  { %v3819_v12 = vsel %vm198_vm2, %v8037_v9, 0.0 }
0x1caa   :  { %3820 = vadd.xlane.f32.xlu1 %v3819_v12 }
0x1cbb   :  { %3978 = vrot.lane.b32.xlu1 %v8790_v57, %s9310_s26 }
0x1cbc   :  { %4058 = vrot.lane.b32.xlu0 %v8788_v53, %s9292_s1 }
0x1cc0   :  { %4056 = vrot.lane.b32.xlu0 %v8788_v53, %s9310_s26 }
0x1d2f   :  { %v3818_v14 = vpop.xlane.xlu0 %3817 }
0x1d30   :  { %8038 = vrcp.f32 %v3818_v14 }
0x1d33   :  { %v3821_v15 = vpop.xlane.xlu1 %3820  ;;  %v4059_v20 = vpop.permute.xlu0 %4058 }
0x1d34   :  { %8040 = vrcp.f32 %v3821_v15 }
0x1d37   :  { %v3979_v23 = vpop.permute.xlu1 %3978  ;;  %v4057_v24 = vpop.permute.xlu0 %4056 }
0x1d3d   :  { %v8039_v16 = vpop.eup %8038 }
0x1d3e   :  { %v3824_v11 = vmul.f32 %v8039_v16, %v8035_v7 }
0x1d40   :  { %7722 = vmatmul.mubr.msk.f32.vlgmr.msra.gmra.mxu0 %vm198_vm2, %v3824_v11 }
0x1d41   :  { %v8041_v19 = vpop.eup %8040  ;;  %7730 = vmatpush3.xpose.msk.msra.mxu0 %vm198_vm2, %v3981_v13  ;;  %7731 = vmatprep.mubr.msk.f32.mxu0 %vm8161_vm1, %v8160_v6 }
0x1d42   :  { %v3825_v21 = vmul.f32 %v8041_v19, %v8037_v9  ;;  %7739 = vmatprep.subr.mxu0 %v8160_v6 }
0x1d44   :  { %7727 = vmatmul.mubr.msk.f32.vlgmr.msra.gmra.mxu1 %vm198_vm2, %v3825_v21  ;;  %7732 = vmatmul.mubr.msk.f32.vlgmr.msra.gmra.mxu0 %vm198_vm2, %v3979_v23 }
0x1d45   :  { %7735 = vmatpush3.xpose.msk.msra.mxu1 %vm198_vm2, %v4059_v20  ;;  %7736 = vmatprep.mubr.msk.f32.mxu1 %vm8161_vm1, %v8160_v6 }
0x1d46   :  { %7744 = vmatprep.subr.mxu1 %v8160_v6  ;;  %7741 = vmatprep.mubr.msk.f32.mxu0 %vm8161_vm1, %v8160_v6 }
0x1d48   :  { %7737 = vmatmul.mubr.msk.f32.vlgmr.msra.gmra.mxu1 %vm198_vm2, %v4057_v24 }
0x1d49   :  { %7746 = vmatprep.mubr.msk.f32.mxu1 %vm8161_vm1, %v8160_v6 }
0x1e00   :  { %v8842_v28 = vpop.f32.mrf.mxu0 }
0x1e02   :  { %v7723_v26 = vpop.f32.mrf.mxu0 }
0x1e04   :  { %v8844_v29 = vpop.f32.mrf.mxu1  ;;  %v4052_v22 = vpop.f32.mrf.mxu0 }
0x1e05   :  { %v4134_v30 = vsel %vm198_vm2, %v4052_v22, -inf }
0x1e06   :  { %4135 = vmax.xlane.f32.xlu1 %v4134_v30  ;;  %v7728_v31 = vpop.f32.mrf.mxu1  ;;  %v7733_v32 = vpop.f32.mrf.mxu0 }
0x1e08   :  { %v4130_v33 = vpop.f32.mrf.mxu1 }
0x1e09   :  { %v4137_v34 = vsel %vm198_vm2, %v4130_v33, -inf }
0x1e0a   :  { %4138 = vmax.xlane.f32.xlu0 %v4137_v34  ;;  %v7738_v35 = vpop.f32.mrf.mxu1 }
0x1e17   :  { %4232 = vrot.lane.b32.xlu1 %v8788_v53, %s9311_s22 }
0x1e1b   :  { %4310 = vrot.lane.b32.xlu1 %v8790_v57, %s9312_s25 }
0x1e20   :  { %4156 = vrot.lane.b32.xlu0 %v8790_v57, %s9311_s22 }
0x1e8f   :  { %v4136_v42 = vpop.xlane.xlu1 %4135 }
0x1e90   :  { %v4140_v36 = vsub.f32 %v4052_v22, %v4136_v42 }
0x1e92   :  { %v4142_v37 = vmul.f32 1.442695, %v4140_v36 }
0x1e93   :  { %v4233_v38 = vpop.permute.xlu1 %4232  ;;  %v4139_v39 = vpop.xlane.xlu0 %4138 }
0x1e94   :  { %8042 = vpow2.f32 %v4142_v37  ;;  %v4141_v40 = vsub.f32 %v4130_v33, %v4139_v39  ;;  %7745 = vmatpush3.msra.mxu1 %v4233_v38 }
0x1e95   :  { %7754 = vmatprep.subr.mxu1 %v8160_v6 }
0x1e96   :  { %v4144_v41 = vmul.f32 1.442695, %v4141_v40 }
0x1e97   :  { %v4157_v44 = vpop.permute.xlu0 %4156  ;;  %v4311_v5 = vpop.permute.xlu1 %4310 }
0x1e98   :  { %8044 = vpow2.f32 %v4144_v41  ;;  %7740 = vmatpush3.msra.mxu0 %v4157_v44 }
0x1e99   :  { %7749 = vmatprep.subr.mxu0 %v8160_v6 }
0x1ea1   :  { %v8043_v43 = vpop.eup %8042 }
0x1ea2   :  { %v4146_v45 = vsel %vm198_vm2, %v8043_v43, 0.0 }
0x1ea3   :  { %4147 = vadd.xlane.f32.xlu0 %v4146_v45 }
0x1ea5   :  { %v8045_v46 = vpop.eup %8044 }
0x1ea6   :  { %v4149_v2 = vsel %vm198_vm2, %v8045_v46, 0.0 }
0x1ea7   :  { %4150 = vadd.xlane.f32.xlu1 %v4149_v2 }
0x1eb8   :  { %4308 = vrot.lane.b32.xlu1 %v8790_v57, %s9313_s4 }
0x1eb9   :  { %4388 = vrot.lane.b32.xlu0 %v8788_v53, %s9312_s25 }
0x1ebd   :  { %4386 = vrot.lane.b32.xlu0 %v8788_v53, %s9313_s4 }
0x1f2c   :  { %v4148_v47 = vpop.xlane.xlu0 %4147 }
0x1f2d   :  { %8046 = vrcp.f32 %v4148_v47 }
0x1f30   :  { %v4151_v48 = vpop.xlane.xlu1 %4150  ;;  %v4389_v55 = vpop.permute.xlu0 %4388 }
0x1f31   :  { %8048 = vrcp.f32 %v4151_v48 }
0x1f34   :  { %v4309_v58 = vpop.permute.xlu1 %4308  ;;  %v4387_v59 = vpop.permute.xlu0 %4386 }
0x1f3a   :  { %v8047_v49 = vpop.eup %8046 }
0x1f3b   :  { %v4154_v51 = vmul.f32 %v8047_v49, %v8043_v43 }
0x1f3d   :  { %7742 = vmatmul.mubr.msk.f32.vlgmr.msra.gmra.mxu0 %vm198_vm2, %v4154_v51 }
0x1f3e   :  { %v8049_v52 = vpop.eup %8048  ;;  %7750 = vmatpush3.xpose.msk.msra.mxu0 %vm198_vm2, %v4311_v5  ;;  %7751 = vmatprep.mubr.msk.f32.mxu0 %vm8161_vm1, %v8160_v6 }
0x1f3f   :  { %v4155_v56 = vmul.f32 %v8049_v52, %v8045_v46  ;;  %7759 = vmatprep.subr.mxu0 %v8160_v6 }
0x1f41   :  { %7747 = vmatmul.mubr.msk.f32.vlgmr.msra.gmra.mxu1 %vm198_vm2, %v4155_v56  ;;  %7752 = vmatmul.mubr.msk.f32.vlgmr.msra.gmra.mxu0 %vm198_vm2, %v4309_v58 }
0x1f42   :  { %7755 = vmatpush3.xpose.msk.msra.mxu1 %vm198_vm2, %v4389_v55  ;;  %7756 = vmatprep.mubr.msk.f32.mxu1 %vm8161_vm1, %v8160_v6 }
0x1f43   :  { %7764 = vmatprep.subr.mxu1 %v8160_v6  ;;  %7761 = vmatprep.mubr.msk.f32.mxu0 %vm8161_vm1, %v8160_v6 }
0x1f45   :  { %7757 = vmatmul.mubr.msk.f32.vlgmr.msra.gmra.mxu1 %vm198_vm2, %v4387_v59 }
0x1f46   :  { %7766 = vmatprep.mubr.msk.f32.mxu1 %vm8161_vm1, %v8160_v6 }
0x1ffd   :  { %v8880_v25 = vpop.f32.mrf.mxu0 }
0x1fff   :  { %v7743_v27 = vpop.f32.mrf.mxu0 }
0x2000   :  { %v7137_v27 = vld [vmem:[%s9304_s24 + $0x38] sm:$0xff] }
0x2001   :  { %v8882_v60 = vpop.f32.mrf.mxu1  ;;  %v4382_v61 = vpop.f32.mrf.mxu0 }
0x2002   :  { %v4464_v62 = vsel %vm198_vm2, %v4382_v61, -inf }
0x2003   :  { %4465 = vmax.xlane.f32.xlu1 %v4464_v62  ;;  %v7748_v63 = vpop.f32.mrf.mxu1  ;;  %v7753_v0 = vpop.f32.mrf.mxu0  ;;  %v7134_v62 = vld [vmem:[%s9304_s24 + $0x20] sm:$0xff] }
0x2005   :  { %v4460_v1 = vpop.f32.mrf.mxu1 }
0x2006   :  { %v4467_v18 = vsel %vm198_vm2, %v4460_v1, -inf }
0x2007   :  { %4468 = vmax.xlane.f32.xlu0 %v4467_v18  ;;  %v7758_v17 = vpop.f32.mrf.mxu1 }
0x2014   :  { %4562 = vrot.lane.b32.xlu1 %v8788_v53, %s9314_s2 }
0x2018   :  { %4640 = vrot.lane.b32.xlu1 %v8790_v57, %s9306_s21 }
0x201d   :  { %4486 = vrot.lane.b32.xlu0 %v8790_v57, %s9314_s2 }
0x208c   :  { %v4466_v10 = vpop.xlane.xlu1 %4465 }
0x208d   :  { %v4470_v3 = vsub.f32 %v4382_v61, %v4466_v10  ;;  %v7135_v61 = vld [vmem:[%s9304_s24 + $0x28] sm:$0xff] }
0x208f   :  { %v4472_v4 = vmul.f32 1.442695, %v4470_v3 }
0x2090   :  { %v4563_v7 = vpop.permute.xlu1 %4562  ;;  %v4469_v8 = vpop.xlane.xlu0 %4468 }
0x2091   :  { %8050 = vpow2.f32 %v4472_v4  ;;  %v4471_v9 = vsub.f32 %v4460_v1, %v4469_v8  ;;  %7765 = vmatpush3.msra.mxu1 %v4563_v7 }
0x2092   :  { %7774 = vmatprep.subr.mxu1 %v8160_v6 }
0x2093   :  { %v4474_v12 = vmul.f32 1.442695, %v4471_v9 }
0x2094   :  { %v4487_v13 = vpop.permute.xlu0 %4486  ;;  %v4641_v19 = vpop.permute.xlu1 %4640 }
0x2095   :  { %8052 = vpow2.f32 %v4474_v12  ;;  %7760 = vmatpush3.msra.mxu0 %v4487_v13 }
0x2096   :  { %7769 = vmatprep.subr.mxu0 %v8160_v6 }
0x209e   :  { %v8051_v14 = vpop.eup %8050 }
0x209f   :  { %v4476_v15 = vsel %vm198_vm2, %v8051_v14, 0.0 }
0x20a0   :  { %4477 = vadd.xlane.f32.xlu0 %v4476_v15 }
0x20a2   :  { %v8053_v16 = vpop.eup %8052 }
0x20a3   :  { %v4479_v11 = vsel %vm198_vm2, %v8053_v16, 0.0 }
0x20a4   :  { %4480 = vadd.xlane.f32.xlu1 %v4479_v11  ;;  %v7166_v11 = vld [vmem:[%s9247_s5 + $0x1] ss:$0 sm:$0xff] }
0x20b5   :  { %4638 = vrot.lane.b32.xlu1 %v8790_v57, %s9315_s27 }
0x20b6   :  { %4718 = vrot.lane.b32.xlu0 %v8788_v53, %s9306_s21 }
0x20ba   :  { %4716 = vrot.lane.b32.xlu0 %v8788_v53, %s9315_s27 }
0x2129   :  { %v4478_v20 = vpop.xlane.xlu0 %4477 }
0x212a   :  { %8054 = vrcp.f32 %v4478_v20 }
0x212d   :  { %v4481_v21 = vpop.xlane.xlu1 %4480  ;;  %v4719_v22 = vpop.permute.xlu0 %4718 }
0x212e   :  { %8056 = vrcp.f32 %v4481_v21 }
0x2131   :  { %v4639_v31 = vpop.permute.xlu1 %4638  ;;  %v4717_v32 = vpop.permute.xlu0 %4716 }
0x2137   :  { %v8055_v23 = vpop.eup %8054 }
0x2138   :  { %v4484_v24 = vmul.f32 %v8055_v23, %v8051_v14 }
0x213a   :  { %7762 = vmatmul.mubr.msk.f32.vlgmr.msra.gmra.mxu0 %vm198_vm2, %v4484_v24 }
0x213b   :  { %v8057_v26 = vpop.eup %8056  ;;  %7770 = vmatpush3.xpose.msk.msra.mxu0 %vm198_vm2, %v4641_v19  ;;  %7771 = vmatprep.mubr.msk.f32.mxu0 %vm8161_vm1, %v8160_v6 }
0x213c   :  { %v4485_v30 = vmul.f32 %v8057_v26, %v8053_v16  ;;  %7779 = vmatprep.subr.mxu0 %v8160_v6 }
0x213e   :  { %7767 = vmatmul.mubr.msk.f32.vlgmr.msra.gmra.mxu1 %vm198_vm2, %v4485_v30  ;;  %7772 = vmatmul.mubr.msk.f32.vlgmr.msra.gmra.mxu0 %vm198_vm2, %v4639_v31  ;;  %v7176_v30 = vld [vmem:[%s9248_s6 + $0x38] sm:$0xff]  ;;  %v7175_v31 = vld [vmem:[%s9248_s6 + $0x30] sm:$0xff] }
0x213f   :  { %7775 = vmatpush3.xpose.msk.msra.mxu1 %vm198_vm2, %v4719_v22  ;;  %7776 = vmatprep.mubr.msk.f32.mxu1 %vm8161_vm1, %v8160_v6 }
0x2140   :  { %7784 = vmatprep.subr.mxu1 %v8160_v6  ;;  %7781 = vmatprep.mubr.msk.f32.mxu0 %vm8161_vm1, %v8160_v6 }
0x2142   :  { %7777 = vmatmul.mubr.msk.f32.vlgmr.msra.gmra.mxu1 %vm198_vm2, %v4717_v32 }
0x2143   :  { %7786 = vmatprep.mubr.msk.f32.mxu1 %vm8161_vm1, %v8160_v6 }
0x21fa   :  { %v4558_v33 = vpop.f32.mrf.mxu0 }
0x21fc   :  { %v7763_v34 = vpop.f32.mrf.mxu0 }
0x21fe   :  { %v4634_v35 = vpop.f32.mrf.mxu1  ;;  %v4712_v42 = vpop.f32.mrf.mxu0 }
0x21ff   :  { %v4794_v36 = vsel %vm198_vm2, %v4712_v42, -inf }
0x2200   :  { %4795 = vmax.xlane.f32.xlu1 %v4794_v36  ;;  %v7768_v37 = vpop.f32.mrf.mxu1  ;;  %v7773_v38 = vpop.f32.mrf.mxu0 }
0x2202   :  { %v4790_v39 = vpop.f32.mrf.mxu1 }
0x2203   :  { %v4797_v40 = vsel %vm198_vm2, %v4790_v39, -inf }
0x2204   :  { %4798 = vmax.xlane.f32.xlu0 %v4797_v40  ;;  %v7778_v41 = vpop.f32.mrf.mxu1 }
0x2205   :  { %v7179_v41 = vld [vmem:[%s9249_s7 + $0x1] ss:$0 sm:$0xff] }
0x2289   :  { %v4796_v44 = vpop.xlane.xlu1 %4795 }
0x228a   :  { %v4800_v43 = vsub.f32 %v4712_v42, %v4796_v44 }
0x228c   :  { %v4802_v45 = vmul.f32 1.442695, %v4800_v43 }
0x228d   :  { %v4799_v46 = vpop.xlane.xlu0 %4798 }
0x228e   :  { %8058 = vpow2.f32 %v4802_v45  ;;  %v4801_v2 = vsub.f32 %v4790_v39, %v4799_v46 }
0x2290   :  { %v4804_v5 = vmul.f32 1.442695, %v4801_v2 }
0x2292   :  { %8060 = vpow2.f32 %v4804_v5 }
0x229b   :  { %v8059_v47 = vpop.eup %8058 }
0x229c   :  { %v4806_v48 = vsel %vm198_vm2, %v8059_v47, 0.0 }
0x229d   :  { %4807 = vadd.xlane.f32.xlu0 %v4806_v48 }
0x229f   :  { %v8061_v49 = vpop.eup %8060 }
0x22a0   :  { %v4809_v51 = vsel %vm198_vm2, %v8061_v49, 0.0 }
0x22a1   :  { %4810 = vadd.xlane.f32.xlu1 %v4809_v51 }
0x22b2   :  { %4892 = vrot.lane.b32.xlu1 %v8788_v53, %s9316_s29 }
0x22b3   :  { %4816 = vrot.lane.b32.xlu0 %v8790_v57, %s9316_s29 }
0x22b6   :  { %4970 = vrot.lane.b32.xlu1 %v8880_v25, %s9307_s23 }
0x22b7   :  { %4972 = vrot.lane.b32.xlu0 %v8882_v60, %s9307_s23  ;;  %v7136_v60 = vld [vmem:[%s9304_s24 + $0x30] sm:$0xff] }
0x22ba   :  { %4978 = vrot.lane.b32.xlu1 %v4558_v33, %s9308_s3 }
0x22bb   :  { %4980 = vrot.lane.b32.xlu0 %v4634_v35, %s9308_s3 }
0x2326   :  { %v4808_v52 = vpop.xlane.xlu0 %4807 }
0x2327   :  { %8062 = vrcp.f32 %v4808_v52  ;;  %v8111_v52 = vld [vmem:[%s9305_s28 + $0x8] sm:$0xff] }
0x232a   :  { %v4811_v55 = vpop.xlane.xlu1 %4810  ;;  %v4817_v56 = vpop.permute.xlu0 %4816 }
0x232b   :  { %8064 = vrcp.f32 %v4811_v55  ;;  %7780 = vmatpush3.msra.mxu0 %v4817_v56  ;;  %v7171_v56 = vld [vmem:[%s9252_s10 + $0x1] ss:$0 sm:$0xff]  ;;  %s9319_s10 = smov 88  }
0x232c   :  { %7789 = vmatprep.subr.mxu0 %v7137_v27 }
0x232e   :  { %v4893_v53 = vpop.permute.xlu1 %4892  ;;  %v4973_v10 = vpop.permute.xlu0 %4972 }
0x232f   :  { %7785 = vmatpush3.msra.mxu1 %v4893_v53  ;;  %v4993_v13 = vsel %vm198_vm2, %v8844_v29, %v4973_v10 }
0x2330   :  { %7800 = vmatprep.subr.mxu1 %v7176_v30 }
0x2332   :  { %v4971_v17 = vpop.permute.xlu1 %4970  ;;  %v4981_v7 = vpop.permute.xlu0 %4980 }
0x2333   :  { %v4992_v4 = vsel %vm198_vm2, %v8842_v28, %v4971_v17  ;;  %v4995_v14 = vsel %vm1540_vm4, %v4993_v13, %v4981_v7  ;;  %v8110_v28 = vld [vmem:[%s9305_s28] sm:$0xff] }
0x2334   :  { %v8063_v58 = vpop.eup %8062 }
0x2335   :  { %v4814_v57 = vmul.f32 %v8063_v58, %v8059_v47 }
0x2336   :  { %v4979_v3 = vpop.permute.xlu1 %4978 }
0x2337   :  { %7782 = vmatmul.mubr.msk.f32.vlgmr.msra.gmra.mxu0 %vm198_vm2, %v4814_v57  ;;  %v4994_v8 = vsel %vm1540_vm4, %v4992_v4, %v4979_v3 }
0x2338   :  { %v8065_v59 = vpop.eup %8064  ;;  %7790 = vmatpush3.msra.mxu0 %v7137_v27 }
0x2339   :  { %v4815_v25 = vmul.f32 %v8065_v59, %v8061_v49  ;;  %7791 = vmatprep.subr.mxu0 %v7136_v60 }
0x233a   :  { %7792 = vmatpush3.msra.mxu0 %v7136_v60 }
0x233b   :  { %7787 = vmatmul.mubr.msk.f32.vlgmr.msra.gmra.mxu1 %vm198_vm2, %v4815_v25  ;;  %7793 = vmatprep.subr.mxu0 %v7135_v61  ;;  %v7172_v25 = vld [vmem:[%s9253_s11 + $0x1] ss:$0 sm:$0xff] }
0x233c   :  { %7794 = vmatpush3.msra.mxu0 %v7135_v61  ;;  %7801 = vmatpush3.msra.mxu1 %v7176_v30 }
0x233d   :  { %7795 = vmatprep.subr.mxu0 %v7134_v62  ;;  %7802 = vmatprep.subr.mxu1 %v7175_v31 }
0x233e   :  { %7796 = vmatpush3.msra.mxu0 %v7134_v62  ;;  %7803 = vmatpush3.msra.mxu1 %v7175_v31 }
0x23f7   :  { %v4888_v63 = vpop.f32.mrf.mxu0 }
0x23f8   :  { %4986 = vrot.lane.b32.xlu1 %v4888_v63, %s9317_s0 }
0x23f9   :  { %v7783_v0 = vpop.f32.mrf.mxu0 }
0x23fb   :  { %v4964_v1 = vpop.f32.mrf.mxu1 }
0x23fc   :  { %4988 = vrot.lane.b32.xlu0 %v4964_v1, %s9317_s0 }
0x23fd   :  { %v7788_v18 = vpop.f32.mrf.mxu1 }
0x246a   :  { %v4987_v9 = vpop.permute.xlu1 %4986 }
0x246b   :  { %v4996_v12 = vsel %vm1543_vm3, %v4994_v8, %v4987_v9 }
0x246c   :  { %7797 = vmatprep.mubr.msk.f32.mxu0 %vm113_vm0, %v4996_v12 }
0x246e   :  { %v4989_v15 = vpop.permute.xlu0 %4988 }
0x246f   :  { %v4997_v16 = vsel %vm1543_vm3, %v4995_v14, %v4989_v15 }
0x2470   :  { %7798 = vmatmul.mubr.msk.f32.vlgmr.msra.gmra.mxu0 %vm113_vm0, %v4997_v16 }
0x2471   :  { %7819 = vmatprep.mubr.msk.f32.mxu0 %vm113_vm0, %v8110_v28 }
0x2530   :  { %v7799_v19 = vpop.f32.mrf.mxu0 }
0x2531   :  { %v5082_v20 = vadd.f32 %v7799_v19, %v7166_v11 }
0x2532   :  { %v5076_v29 = vpop.f32.mrf.mxu0 }
0x2533   :  { %v5086_v21 = vadd.f32 %v5082_v20, %v8777_v50  ;;  %v5077_v23 = vadd.f32 %v7166_v11, %v5076_v29  ;;  %v7173_v50 = vld [vmem:[%s9248_s6 + $0x20] sm:$0xff] }
0x2535   :  { %v5085_v24 = vadd.f32 %v5077_v23, %v8775_v54  ;;  %v5094_v26 = vsel %vm113_vm0, %v5086_v21, 0.0  ;;  %v7174_v54 = vld [vmem:[%s9248_s6 + $0x28] sm:$0xff]  ;;  %s9318_s6 = smov 96  }
0x2536   :  { %5095 = vadd.xlane.f32.xlu0 %v5094_v26  ;;  %7804 = vmatprep.subr.mxu1 %v7174_v54 }
0x2537   :  { %v5091_v22 = vsel %vm113_vm0, %v5085_v24, 0.0  ;;  %7805 = vmatpush3.msra.mxu1 %v7174_v54 }
0x2538   :  { %5092 = vadd.xlane.f32.xlu1 %v5091_v22  ;;  %7806 = vmatprep.subr.mxu1 %v7173_v50 }
0x2539   :  { %7807 = vmatpush3.msra.mxu1 %v7173_v50 }
0x253a   :  { %7822 = vmatprep.subr.mxu1 %v8160_v6 }
0x25bf   :  { %v5096_v32 = vpop.xlane.xlu0 %5095 }
0x25c0   :  { %v5098_v33 = vmul.f32 0.03125, %v5096_v32 }
0x25c1   :  { %v5093_v34 = vpop.xlane.xlu1 %5092 }
0x25c2   :  { %v5100_v35 = vsub.f32 %v5086_v21, %v5098_v33  ;;  %v5097_v42 = vmul.f32 0.03125, %v5093_v34 }
0x25c4   :  { %v5099_v36 = vsub.f32 %v5085_v24, %v5097_v42  ;;  %v5102_v37 = vmul.f32 %v5100_v35, %v5100_v35 }
0x25c6   :  { %v5106_v38 = vsel %vm113_vm0, %v5102_v37, 0.0  ;;  %v5101_v39 = vmul.f32 %v5099_v36, %v5099_v36 }
0x25c7   :  { %5107 = vadd.xlane.f32.xlu1 %v5106_v38 }
0x25c8   :  { %v5103_v40 = vsel %vm113_vm0, %v5101_v39, 0.0 }
0x25c9   :  { %5104 = vadd.xlane.f32.xlu0 %v5103_v40 }
0x25d8   :  { %5242 = vrot.lane.b32.xlu1 %v7175_v31, %s9318_s6 }
0x25dc   :  { %5240 = vrot.lane.b32.xlu1 %v7174_v54, %s9318_s6 }
0x25df   :  { %5244 = vrot.lane.b32.xlu0 %v7176_v30, %s9318_s6 }
0x25e0   :  { %5250 = vrot.lane.b32.xlu1 %v7179_v41, %s9318_s6 }
0x25e3   :  { %5238 = vrot.lane.b32.xlu0 %v7173_v50, %s9318_s6 }
0x2650   :  { %v5108_v44 = vpop.xlane.xlu1 %5107 }
0x2651   :  { %v5110_v43 = vmul.f32 0.03125, %v5108_v44 }
0x2652   :  { %v5105_v45 = vpop.xlane.xlu0 %5104 }
0x2653   :  { %v5112_v46 = vadd.f32 1e-05, %v5110_v43  ;;  %v5109_v2 = vmul.f32 0.03125, %v5105_v45 }
0x2654   :  { %v5243_v5 = vpop.permute.xlu1 %5242 }
0x2655   :  { %8066 = vrsqrt.f32 %v5112_v46  ;;  %v5111_v47 = vadd.f32 1e-05, %v5109_v2 }
0x2656   :  { %v5245_v48 = vpop.permute.xlu0 %5244 }
0x2657   :  { %8068 = vrsqrt.f32 %v5111_v47  ;;  %7811 = vmatprep.subr.mxu0 %v5245_v48 }
0x2658   :  { %7812 = vmatpush3.msra.mxu0 %v5245_v48  ;;  %v5241_v49 = vpop.permute.xlu1 %5240 }
0x2659   :  { %7813 = vmatprep.subr.mxu0 %v5243_v5 }
0x265a   :  { %7814 = vmatpush3.msra.mxu0 %v5243_v5  ;;  %v5239_v51 = vpop.permute.xlu0 %5238 }
0x265b   :  { %7815 = vmatprep.subr.mxu0 %v5241_v49 }
0x265c   :  { %7816 = vmatpush3.msra.mxu0 %v5241_v49  ;;  %v5251_v63 = vpop.permute.xlu1 %5250 }
0x265d   :  { %7817 = vmatprep.subr.mxu0 %v5239_v51 }
0x265e   :  { %7818 = vmatpush3.msra.mxu0 %v5239_v51 }
0x265f   :  { %7820 = vmatmul.mubr.msk.f32.vlgmr.msra.gmra.mxu0 %vm113_vm0, %v8111_v52  ;;  %7832 = vmatprep.subr.mxu0 %v8160_v6 }
0x2660   :  { %7834 = vmatprep.mubr.msk.f32.mxu0 %vm8161_vm1, %v8160_v6 }
0x2662   :  { %v8067_v55 = vpop.eup %8066 }
0x2663   :  { %v5116_v53 = vmul.f32 %v8067_v55, %v5100_v35 }
0x2664   :  { %v8069_v58 = vpop.eup %8068 }
0x2665   :  { %v5115_v57 = vmul.f32 %v8069_v58, %v5099_v36  ;;  %v5124_v59 = vmul.f32 %v7171_v56, %v5116_v53 }
0x2667   :  { %v5123_v27 = vmul.f32 %v7171_v56, %v5115_v57  ;;  %v9007_v61 = vadd.f32 %v7172_v25, %v5124_v59 }
0x2669   :  { %v9005_v60 = vadd.f32 %v7172_v25, %v5123_v27 }
0x266b   :  { %7808 = vmatprep.mubr.msk.f32.mxu1 %vm113_vm0, %v9005_v60 }
0x266c   :  { %7809 = vmatmul.mubr.msk.f32.vlgmr.msra.gmra.mxu1 %vm113_vm0, %v9007_v61 }
0x266d   :  { %7824 = vmatprep.mubr.msk.f32.mxu1 %vm8161_vm1, %v8160_v6 }
0x271f   :  { %v7821_v62 = vpop.f32.mrf.mxu0 }
0x2720   :  { %v9022_v3 = vadd.f32 %v7821_v62, %v5251_v63 }
0x2721   :  { %v5319_v0 = vpop.f32.mrf.mxu0 }
0x2722   :  { %v9015_v1 = vadd.f32 %v5319_v0, %v5251_v63 }
0x2724   :  { %7823 = vmatpush3.xpose.msk.msra.mxu1 %vm198_vm2, %v9015_v1 }
0x2725   :  { %7827 = vmatprep.subr.mxu1 %v8160_v6 }
0x272c   :  { %v7810_v18 = vpop.f32.mrf.mxu1 }
0x272d   :  { %v9030_v4 = vadd.f32 %v7810_v18, %v7179_v41 }
0x272e   :  { %v5225_v17 = vpop.f32.mrf.mxu1 }
0x272f   :  { %v9020_v10 = vadd.f32 %v7179_v41, %v5225_v17 }
0x2731   :  { %7825 = vmatmul.mubr.msk.f32.vlgmr.msra.gmra.mxu1 %vm198_vm2, %v9020_v10 }
0x2732   :  { %7828 = vmatpush3.xpose.msk.msra.mxu1 %vm198_vm2, %v9022_v3  ;;  %7829 = vmatprep.mubr.msk.f32.mxu1 %vm8161_vm1, %v8160_v6 }
0x2733   :  { %7837 = vmatprep.subr.mxu1 %v8160_v6 }
0x2735   :  { %7830 = vmatmul.mubr.msk.f32.vlgmr.msra.gmra.mxu1 %vm198_vm2, %v9030_v4 }
0x2736   :  { %7839 = vmatprep.mubr.msk.f32.mxu1 %vm8161_vm1, %v8160_v6 }
0x27f1   :  { %v5400_v7 = vpop.f32.mrf.mxu1 }
0x27f2   :  { %v5480_v8 = vsel %vm198_vm2, %v5400_v7, -inf }
0x27f3   :  { %5481 = vmax.xlane.f32.xlu0 %v5480_v8  ;;  %v7826_v9 = vpop.f32.mrf.mxu1 }
0x27f5   :  { %v5476_v12 = vpop.f32.mrf.mxu1 }
0x27f6   :  { %v5483_v13 = vsel %vm198_vm2, %v5476_v12, -inf }
0x27f7   :  { %5484 = vmax.xlane.f32.xlu1 %v5483_v13  ;;  %v7831_v14 = vpop.f32.mrf.mxu1 }
0x2808   :  { %5502 = vrot.lane.b32.xlu1 %v9015_v1, %s9318_s6 }
0x2809   :  { %5578 = vrot.lane.b32.xlu0 %v9022_v3, %s9318_s6 }
0x280c   :  { %5656 = vrot.lane.b32.xlu1 %v9015_v1, %s9310_s26 }
0x2810   :  { %5734 = vrot.lane.b32.xlu1 %v9022_v3, %s9310_s26 }
0x2814   :  { %5732 = vrot.lane.b32.xlu1 %v9030_v4, %s9310_s26 }
0x287c   :  { %v5482_v15 = vpop.xlane.xlu0 %5481 }
0x287d   :  { %v5486_v16 = vsub.f32 %v5400_v7, %v5482_v15 }
0x287f   :  { %v5488_v28 = vmul.f32 1.442695, %v5486_v16 }
0x2880   :  { %v5579_v11 = vpop.permute.xlu0 %5578  ;;  %v5485_v19 = vpop.xlane.xlu1 %5484 }
0x2881   :  { %8070 = vpow2.f32 %v5488_v28  ;;  %v5487_v20 = vsub.f32 %v5476_v12, %v5485_v19  ;;  %7838 = vmatpush3.msra.mxu1 %v5579_v11 }
0x2882   :  { %7847 = vmatprep.subr.mxu1 %v8160_v6 }
0x2883   :  { %v5490_v29 = vmul.f32 1.442695, %v5487_v20 }
0x2884   :  { %v5503_v21 = vpop.permute.xlu1 %5502 }
0x2885   :  { %8072 = vpow2.f32 %v5490_v29  ;;  %7833 = vmatpush3.msra.mxu0 %v5503_v21 }
0x2886   :  { %7842 = vmatprep.subr.mxu0 %v8160_v6 }
0x2888   :  { %v5657_v54 = vpop.permute.xlu1 %5656 }
0x288c   :  { %v5735_v34 = vpop.permute.xlu1 %5734 }
0x288e   :  { %v8071_v23 = vpop.eup %8070 }
0x288f   :  { %v5492_v24 = vsel %vm198_vm2, %v8071_v23, 0.0 }
0x2890   :  { %5493 = vadd.xlane.f32.xlu0 %v5492_v24  ;;  %v5733_v36 = vpop.permute.xlu1 %5732 }
0x2892   :  { %v8073_v26 = vpop.eup %8072 }
0x2893   :  { %v5495_v22 = vsel %vm198_vm2, %v8073_v26, 0.0 }
0x2894   :  { %5496 = vadd.xlane.f32.xlu0 %v5495_v22 }
0x28aa   :  { %5654 = vrot.lane.b32.xlu0 %v9020_v10, %s9310_s26 }
0x2919   :  { %v5494_v30 = vpop.xlane.xlu0 %5493 }
0x291a   :  { %8074 = vrcp.f32 %v5494_v30 }
0x291d   :  { %v5497_v31 = vpop.xlane.xlu0 %5496 }
0x291e   :  { %8076 = vrcp.f32 %v5497_v31 }
0x2921   :  { %v5655_v42 = vpop.permute.xlu0 %5654 }
0x2927   :  { %v8075_v50 = vpop.eup %8074 }
0x2928   :  { %v5500_v32 = vmul.f32 %v8075_v50, %v8071_v23 }
0x292a   :  { %7835 = vmatmul.mubr.msk.f32.vlgmr.msra.gmra.mxu0 %vm198_vm2, %v5500_v32 }
0x292b   :  { %v8077_v33 = vpop.eup %8076  ;;  %7843 = vmatpush3.xpose.msk.msra.mxu0 %vm198_vm2, %v5657_v54  ;;  %7844 = vmatprep.mubr.msk.f32.mxu0 %vm8161_vm1, %v8160_v6 }
0x292c   :  { %v5501_v35 = vmul.f32 %v8077_v33, %v8073_v26  ;;  %7852 = vmatprep.subr.mxu0 %v8160_v6 }
0x292e   :  { %7840 = vmatmul.mubr.msk.f32.vlgmr.msra.gmra.mxu1 %vm198_vm2, %v5501_v35  ;;  %7845 = vmatmul.mubr.msk.f32.vlgmr.msra.gmra.mxu0 %vm198_vm2, %v5655_v42 }
0x292f   :  { %7848 = vmatpush3.xpose.msk.msra.mxu1 %vm198_vm2, %v5735_v34  ;;  %7849 = vmatprep.mubr.msk.f32.mxu1 %vm8161_vm1, %v8160_v6 }
0x2930   :  { %7857 = vmatprep.subr.mxu1 %v8160_v6  ;;  %7854 = vmatprep.mubr.msk.f32.mxu0 %vm8161_vm1, %v8160_v6 }
0x2932   :  { %7850 = vmatmul.mubr.msk.f32.vlgmr.msra.gmra.mxu1 %vm198_vm2, %v5733_v36 }
0x2933   :  { %7859 = vmatprep.mubr.msk.f32.mxu1 %vm8161_vm1, %v8160_v6 }
0x29ea   :  { %v9071_v37 = vpop.f32.mrf.mxu0 }
0x29ec   :  { %v7836_v38 = vpop.f32.mrf.mxu0 }
0x29ee   :  { %v9073_v39 = vpop.f32.mrf.mxu1  ;;  %v5728_v40 = vpop.f32.mrf.mxu0 }
0x29ef   :  { %v5810_v41 = vsel %vm198_vm2, %v5728_v40, -inf }
0x29f0   :  { %5811 = vmax.xlane.f32.xlu0 %v5810_v41  ;;  %v7841_v44 = vpop.f32.mrf.mxu1  ;;  %v7846_v43 = vpop.f32.mrf.mxu0 }
0x29f2   :  { %v5806_v45 = vpop.f32.mrf.mxu1 }
0x29f3   :  { %v5813_v46 = vsel %vm198_vm2, %v5806_v45, -inf }
0x29f4   :  { %5814 = vmax.xlane.f32.xlu1 %v5813_v46  ;;  %v7851_v2 = vpop.f32.mrf.mxu1 }
0x2a05   :  { %5832 = vrot.lane.b32.xlu1 %v9015_v1, %s9319_s10 }
0x2a06   :  { %5908 = vrot.lane.b32.xlu0 %v9022_v3, %s9319_s10 }
0x2a09   :  { %5986 = vrot.lane.b32.xlu1 %v9015_v1, %s9313_s4 }
0x2a0d   :  { %6064 = vrot.lane.b32.xlu1 %v9022_v3, %s9313_s4 }
0x2a11   :  { %6062 = vrot.lane.b32.xlu1 %v9030_v4, %s9313_s4 }
0x2a79   :  { %v5812_v5 = vpop.xlane.xlu0 %5811 }
0x2a7a   :  { %v5816_v47 = vsub.f32 %v5728_v40, %v5812_v5 }
0x2a7c   :  { %v5818_v48 = vmul.f32 1.442695, %v5816_v47 }
0x2a7d   :  { %v5909_v49 = vpop.permute.xlu0 %5908  ;;  %v5815_v51 = vpop.xlane.xlu1 %5814 }
0x2a7e   :  { %8078 = vpow2.f32 %v5818_v48  ;;  %v5817_v52 = vsub.f32 %v5806_v45, %v5815_v51  ;;  %7858 = vmatpush3.msra.mxu1 %v5909_v49 }
0x2a7f   :  { %7867 = vmatprep.subr.mxu1 %v8160_v6 }
0x2a80   :  { %v5820_v55 = vmul.f32 1.442695, %v5817_v52 }
0x2a81   :  { %v5833_v56 = vpop.permute.xlu1 %5832 }
0x2a82   :  { %8080 = vpow2.f32 %v5820_v55  ;;  %7853 = vmatpush3.msra.mxu0 %v5833_v56 }
0x2a83   :  { %7862 = vmatprep.subr.mxu0 %v8160_v6 }
0x2a85   :  { %v5987_v62 = vpop.permute.xlu1 %5986 }
0x2a89   :  { %v6065_v17 = vpop.permute.xlu1 %6064 }
0x2a8b   :  { %v8079_v53 = vpop.eup %8078 }
0x2a8c   :  { %v5822_v58 = vsel %vm198_vm2, %v8079_v53, 0.0 }
0x2a8d   :  { %5823 = vadd.xlane.f32.xlu0 %v5822_v58  ;;  %v6063_v9 = vpop.permute.xlu1 %6062 }
0x2a8f   :  { %v8081_v57 = vpop.eup %8080 }
0x2a90   :  { %v5825_v59 = vsel %vm198_vm2, %v8081_v57, 0.0 }
0x2a91   :  { %5826 = vadd.xlane.f32.xlu0 %v5825_v59 }
0x2aa7   :  { %5984 = vrot.lane.b32.xlu0 %v9020_v10, %s9313_s4 }
0x2b16   :  { %v5824_v25 = vpop.xlane.xlu0 %5823 }
0x2b17   :  { %8082 = vrcp.f32 %v5824_v25 }
0x2b1a   :  { %v5827_v27 = vpop.xlane.xlu0 %5826 }
0x2b1b   :  { %8084 = vrcp.f32 %v5827_v27 }
0x2b1e   :  { %v5985_v8 = vpop.permute.xlu0 %5984 }
0x2b24   :  { %v8083_v63 = vpop.eup %8082 }
0x2b25   :  { %v5830_v0 = vmul.f32 %v8083_v63, %v8079_v53 }
0x2b27   :  { %7855 = vmatmul.mubr.msk.f32.vlgmr.msra.gmra.mxu0 %vm198_vm2, %v5830_v0 }
0x2b28   :  { %v8085_v18 = vpop.eup %8084  ;;  %7863 = vmatpush3.xpose.msk.msra.mxu0 %vm198_vm2, %v5987_v62  ;;  %7864 = vmatprep.mubr.msk.f32.mxu0 %vm8161_vm1, %v8160_v6 }
0x2b29   :  { %v5831_v7 = vmul.f32 %v8085_v18, %v8081_v57  ;;  %7872 = vmatprep.subr.mxu0 %v8160_v6 }
0x2b2b   :  { %7860 = vmatmul.mubr.msk.f32.vlgmr.msra.gmra.mxu1 %vm198_vm2, %v5831_v7  ;;  %7865 = vmatmul.mubr.msk.f32.vlgmr.msra.gmra.mxu0 %vm198_vm2, %v5985_v8 }
0x2b2c   :  { %7868 = vmatpush3.xpose.msk.msra.mxu1 %vm198_vm2, %v6065_v17  ;;  %7869 = vmatprep.mubr.msk.f32.mxu1 %vm8161_vm1, %v8160_v6 }
0x2b2d   :  { %7877 = vmatprep.subr.mxu1 %v8160_v6  ;;  %7874 = vmatprep.mubr.msk.f32.mxu0 %vm8161_vm1, %v8160_v6 }
0x2b2f   :  { %7870 = vmatmul.mubr.msk.f32.vlgmr.msra.gmra.mxu1 %vm198_vm2, %v6063_v9 }
0x2b30   :  { %7879 = vmatprep.mubr.msk.f32.mxu1 %vm8161_vm1, %v8160_v6 }
0x2be7   :  { %v9109_v12 = vpop.f32.mrf.mxu0 }
0x2be9   :  { %v7856_v13 = vpop.f32.mrf.mxu0 }
0x2bea   :  { %v5144_v13 = vld [vmem:[#allocation2 + $0x38] sm:$0xff] }
0x2beb   :  { %v9111_v14 = vpop.f32.mrf.mxu1  ;;  %v6058_v15 = vpop.f32.mrf.mxu0 }
0x2bec   :  { %v6140_v16 = vsel %vm198_vm2, %v6058_v15, -inf }
0x2bed   :  { %6141 = vmax.xlane.f32.xlu0 %v6140_v16  ;;  %v7861_v28 = vpop.f32.mrf.mxu1  ;;  %v7866_v11 = vpop.f32.mrf.mxu0 }
0x2bef   :  { %v6136_v19 = vpop.f32.mrf.mxu1 }
0x2bf0   :  { %v6143_v20 = vsel %vm198_vm2, %v6136_v19, -inf }
0x2bf1   :  { %6144 = vmax.xlane.f32.xlu1 %v6143_v20  ;;  %v7871_v29 = vpop.f32.mrf.mxu1 }
0x2c02   :  { %6162 = vrot.lane.b32.xlu1 %v9015_v1, %s9312_s25 }
0x2c03   :  { %6238 = vrot.lane.b32.xlu0 %v9022_v3, %s9312_s25 }
0x2c06   :  { %6316 = vrot.lane.b32.xlu1 %v9015_v1, %s9315_s27 }
0x2c0a   :  { %6394 = vrot.lane.b32.xlu1 %v9022_v3, %s9315_s27 }
0x2c0e   :  { %6392 = vrot.lane.b32.xlu1 %v9030_v4, %s9315_s27 }
0x2c76   :  { %v6142_v21 = vpop.xlane.xlu0 %6141 }
0x2c77   :  { %v6146_v23 = vsub.f32 %v6058_v15, %v6142_v21  ;;  %v5141_v15 = vld [vmem:[#allocation2 + $0x20] sm:$0xff] }
0x2c79   :  { %v6148_v24 = vmul.f32 1.442695, %v6146_v23 }
0x2c7a   :  { %v6239_v26 = vpop.permute.xlu0 %6238  ;;  %v6145_v22 = vpop.xlane.xlu1 %6144 }
0x2c7b   :  { %8086 = vpow2.f32 %v6148_v24  ;;  %v6147_v30 = vsub.f32 %v6136_v19, %v6145_v22  ;;  %7878 = vmatpush3.msra.mxu1 %v6239_v26 }
0x2c7c   :  { %7887 = vmatprep.subr.mxu1 %v8160_v6 }
0x2c7d   :  { %v6150_v31 = vmul.f32 1.442695, %v6147_v30 }
0x2c7e   :  { %v6163_v54 = vpop.permute.xlu1 %6162 }
0x2c7f   :  { %8088 = vpow2.f32 %v6150_v31  ;;  %7873 = vmatpush3.msra.mxu0 %v6163_v54 }
0x2c80   :  { %7882 = vmatprep.subr.mxu0 %v8160_v6 }
0x2c82   :  { %v6317_v42 = vpop.permute.xlu1 %6316 }
0x2c86   :  { %v6395_v41 = vpop.permute.xlu1 %6394 }
0x2c88   :  { %v8087_v50 = vpop.eup %8086 }
0x2c89   :  { %v6152_v32 = vsel %vm198_vm2, %v8087_v50, 0.0 }
0x2c8a   :  { %6153 = vadd.xlane.f32.xlu0 %v6152_v32  ;;  %v6393_v43 = vpop.permute.xlu1 %6392 }
0x2c8c   :  { %v8089_v4 = vpop.eup %8088 }
0x2c8d   :  { %v6155_v33 = vsel %vm198_vm2, %v8089_v4, 0.0 }
0x2c8e   :  { %6156 = vadd.xlane.f32.xlu0 %v6155_v33 }
0x2ca4   :  { %6314 = vrot.lane.b32.xlu0 %v9020_v10, %s9315_s27 }
0x2d13   :  { %v6154_v34 = vpop.xlane.xlu0 %6153 }
0x2d14   :  { %8090 = vrcp.f32 %v6154_v34 }
0x2d17   :  { %v6157_v35 = vpop.xlane.xlu0 %6156 }
0x2d18   :  { %8092 = vrcp.f32 %v6157_v35 }
0x2d1b   :  { %v6315_v10 = vpop.permute.xlu0 %6314 }
0x2d21   :  { %v8091_v36 = vpop.eup %8090 }
0x2d22   :  { %v6160_v38 = vmul.f32 %v8091_v36, %v8087_v50 }
0x2d24   :  { %7875 = vmatmul.mubr.msk.f32.vlgmr.msra.gmra.mxu0 %vm198_vm2, %v6160_v38 }
0x2d25   :  { %v8093_v40 = vpop.eup %8092  ;;  %7883 = vmatpush3.xpose.msk.msra.mxu0 %vm198_vm2, %v6317_v42  ;;  %7884 = vmatprep.mubr.msk.f32.mxu0 %vm8161_vm1, %v8160_v6 }
0x2d26   :  { %v6161_v44 = vmul.f32 %v8093_v40, %v8089_v4  ;;  %7892 = vmatprep.subr.mxu0 %v8160_v6 }
0x2d28   :  { %7880 = vmatmul.mubr.msk.f32.vlgmr.msra.gmra.mxu1 %vm198_vm2, %v6161_v44  ;;  %7885 = vmatmul.mubr.msk.f32.vlgmr.msra.gmra.mxu0 %vm198_vm2, %v6315_v10 }
0x2d29   :  { %7888 = vmatpush3.xpose.msk.msra.mxu1 %vm198_vm2, %v6395_v41  ;;  %7889 = vmatprep.mubr.msk.f32.mxu1 %vm8161_vm1, %v8160_v6 }
0x2d2a   :  { %7897 = vmatprep.subr.mxu1 %v8160_v6  ;;  %7894 = vmatprep.mubr.msk.f32.mxu0 %vm8161_vm1, %v8160_v6 }
0x2d2c   :  { %7890 = vmatmul.mubr.msk.f32.vlgmr.msra.gmra.mxu1 %vm198_vm2, %v6393_v43 }
0x2d2d   :  { %7899 = vmatprep.mubr.msk.f32.mxu1 %vm8161_vm1, %v8160_v6 }
0x2de4   :  { %v6234_v45 = vpop.f32.mrf.mxu0 }
0x2de6   :  { %v7876_v46 = vpop.f32.mrf.mxu0 }
0x2de8   :  { %v6310_v2 = vpop.f32.mrf.mxu1  ;;  %v6388_v5 = vpop.f32.mrf.mxu0 }
0x2de9   :  { %v6470_v47 = vsel %vm198_vm2, %v6388_v5, -inf }
0x2dea   :  { %6471 = vmax.xlane.f32.xlu0 %v6470_v47  ;;  %v7881_v48 = vpop.f32.mrf.mxu1  ;;  %v7886_v49 = vpop.f32.mrf.mxu0  ;;  %v6812_v47 = vld [vmem:[#allocation4 + $0x30] sm:$0xff] }
0x2deb   :  { %v6811_v48 = vld [vmem:[#allocation4 + $0x28] sm:$0xff]  ;;  %v6810_v49 = vld [vmem:[#allocation4 + $0x20] sm:$0xff] }
0x2dec   :  { %v6466_v51 = vpop.f32.mrf.mxu1 }
0x2ded   :  { %v6473_v52 = vsel %vm198_vm2, %v6466_v51, -inf }
0x2dee   :  { %6474 = vmax.xlane.f32.xlu1 %v6473_v52  ;;  %v7891_v55 = vpop.f32.mrf.mxu1  ;;  %v7225_v52 = vld [vmem:[%s9258_s16 + $0x70] sm:$0xff] }
0x2def   :  { %v7224_v55 = vld [vmem:[%s9258_s16 + $0x68] sm:$0xff] }
0x2dff   :  { %6492 = vrot.lane.b32.xlu1 %v9015_v1, %s9306_s21 }
0x2e03   :  { %6646 = vrot.lane.b32.xlu1 %v9109_v12, %s9307_s23 }
0x2e07   :  { %6648 = vrot.lane.b32.xlu1 %v9111_v14, %s9307_s23  ;;  %v5143_v14 = vld [vmem:[#allocation2 + $0x30] sm:$0xff] }
0x2e0b   :  { %6656 = vrot.lane.b32.xlu1 %v6310_v2, %s9308_s3 }
0x2e73   :  { %v6472_v6 = vpop.xlane.xlu0 %6471 }
0x2e74   :  { %v6476_v56 = vsub.f32 %v6388_v5, %v6472_v6  ;;  %v7223_v6 = vld [vmem:[%s9258_s16 + $0x60] sm:$0xff] }
0x2e76   :  { %v6478_v53 = vmul.f32 1.442695, %v6476_v56 }
0x2e77   :  { %v6475_v58 = vpop.xlane.xlu1 %6474 }
0x2e78   :  { %8094 = vpow2.f32 %v6478_v53  ;;  %v6477_v57 = vsub.f32 %v6466_v51, %v6475_v58  ;;  %v7226_v51 = vld [vmem:[%s9258_s16 + $0x78] sm:$0xff] }
0x2e7a   :  { %v6480_v59 = vmul.f32 1.442695, %v6477_v57 }
0x2e7b   :  { %v6493_v25 = vpop.permute.xlu1 %6492 }
0x2e7c   :  { %8096 = vpow2.f32 %v6480_v59  ;;  %7893 = vmatpush3.msra.mxu0 %v6493_v25 }
0x2e7d   :  { %7902 = vmatprep.subr.mxu0 %v5144_v13 }
0x2e7f   :  { %v6647_v20 = vpop.permute.xlu1 %6646 }
0x2e80   :  { %v6668_v23 = vsel %vm198_vm2, %v9071_v37, %v6647_v20  ;;  %v7208_v37 = vld [vmem:[%s9251_s9 + $0x1] ss:$0 sm:$0xff] }
0x2e83   :  { %v6649_v29 = vpop.permute.xlu1 %6648 }
0x2e84   :  { %v6669_v31 = vsel %vm198_vm2, %v9073_v39, %v6649_v29 }
0x2e85   :  { %v8095_v27 = vpop.eup %8094 }
0x2e86   :  { %v6482_v1 = vsel %vm198_vm2, %v8095_v27, 0.0 }
0x2e87   :  { %6483 = vadd.xlane.f32.xlu0 %v6482_v1  ;;  %v6657_v24 = vpop.permute.xlu1 %6656  ;;  %v7213_v1 = vld [vmem:[%s9254_s12 + $0x1] ss:$0 sm:$0xff] }
0x2e88   :  { %v6671_v54 = vsel %vm1540_vm4, %v6669_v31, %v6657_v24 }
0x2e89   :  { %v8097_v62 = vpop.eup %8096 }
0x2e8a   :  { %v6485_v63 = vsel %vm198_vm2, %v8097_v62, 0.0 }
0x2e8b   :  { %6486 = vadd.xlane.f32.xlu0 %v6485_v63  ;;  %v7214_v63 = vld [vmem:[%s9255_s13 + $0x1] ss:$0 sm:$0xff] }
0x2ea1   :  { %6568 = vrot.lane.b32.xlu0 %v9022_v3, %s9306_s21  ;;  %v5142_v3 = vld [vmem:[#allocation2 + $0x28] sm:$0xff] }
0x2ea5   :  { %6654 = vrot.lane.b32.xlu0 %v6234_v45, %s9308_s3 }
0x2f10   :  { %v6484_v0 = vpop.xlane.xlu0 %6483 }
0x2f11   :  { %8098 = vrcp.f32 %v6484_v0 }
0x2f14   :  { %v6487_v18 = vpop.xlane.xlu0 %6486 }
0x2f15   :  { %8100 = vrcp.f32 %v6487_v18 }
0x2f18   :  { %v6569_v17 = vpop.permute.xlu0 %6568 }
0x2f19   :  { %7898 = vmatpush3.msra.mxu1 %v6569_v17 }
0x2f1c   :  { %v6655_v21 = vpop.permute.xlu0 %6654 }
0x2f1d   :  { %v6670_v26 = vsel %vm1540_vm4, %v6668_v23, %v6655_v21  ;;  %v7228_v21 = vld [vmem:[%s9259_s17 + $0x1] ss:$0 sm:$0xff] }
0x2f1e   :  { %v8099_v7 = vpop.eup %8098 }
0x2f1f   :  { %v6490_v8 = vmul.f32 %v8099_v7, %v8095_v27 }
0x2f21   :  { %7895 = vmatmul.mubr.msk.f32.vlgmr.msra.gmra.mxu0 %vm198_vm2, %v6490_v8 }
0x2f22   :  { %v8101_v9 = vpop.eup %8100  ;;  %7903 = vmatpush3.msra.mxu0 %v5144_v13  ;;  %v7221_v13 = vld [vmem:[%s9258_s16 + $0x50] sm:$0xff] }
0x2f23   :  { %v6491_v12 = vmul.f32 %v8101_v9, %v8097_v62  ;;  %7904 = vmatprep.subr.mxu0 %v5143_v14 }
0x2f24   :  { %7905 = vmatpush3.msra.mxu0 %v5143_v14  ;;  %v7220_v14 = vld [vmem:[%s9258_s16 + $0x48] sm:$0xff] }
0x2f25   :  { %7900 = vmatmul.mubr.msk.f32.vlgmr.msra.gmra.mxu1 %vm198_vm2, %v6491_v12  ;;  %7906 = vmatprep.subr.mxu0 %v5142_v3  ;;  %v7222_v12 = vld [vmem:[%s9258_s16 + $0x58] sm:$0xff] }
0x2f26   :  { %7907 = vmatpush3.msra.mxu0 %v5142_v3  ;;  %v7219_v3 = vld [vmem:[%s9258_s16 + $0x40] sm:$0xff] }
0x2f27   :  { %7908 = vmatprep.subr.mxu0 %v5141_v15 }
0x2f28   :  { %7909 = vmatpush3.msra.mxu0 %v5141_v15  ;;  %v7216_v15 = vld [vmem:[%s9257_s15 + $0x1] ss:$0 sm:$0xff] }
0x2f29   :  { %7924 = vmatprep.subr.mxu0 %v7226_v51 }
0x2fe1   :  { %v6564_v16 = vpop.f32.mrf.mxu0 }
0x2fe2   :  { %6662 = vrot.lane.b32.xlu0 %v6564_v16, %s9317_s0 }
0x2fe3   :  { %v7896_v28 = vpop.f32.mrf.mxu0 }
0x2fe5   :  { %v6640_v11 = vpop.f32.mrf.mxu1 }
0x2fe6   :  { %6664 = vrot.lane.b32.xlu1 %v6640_v11, %s9317_s0 }
0x2fe7   :  { %v7901_v19 = vpop.f32.mrf.mxu1 }
0x3054   :  { %v6663_v22 = vpop.permute.xlu0 %6662 }
0x3055   :  { %v6672_v30 = vsel %vm1543_vm3, %v6670_v26, %v6663_v22 }
0x3056   :  { %7910 = vmatprep.mubr.msk.f32.mxu0 %vm113_vm0, %v6672_v30 }
0x3058   :  { %v6665_v50 = vpop.permute.xlu1 %6664 }
0x3059   :  { %v6673_v32 = vsel %vm1543_vm3, %v6671_v54, %v6665_v50 }
0x305a   :  { %7911 = vmatmul.mubr.msk.f32.vlgmr.msra.gmra.mxu0 %vm113_vm0, %v6673_v32 }
0x305b   :  { %7925 = vmatpush3.msra.mxu0 %v7226_v51 }
0x305c   :  { %7926 = vmatprep.subr.mxu0 %v7225_v52 }
0x305d   :  { %7927 = vmatpush3.msra.mxu0 %v7225_v52 }
0x305e   :  { %7928 = vmatprep.subr.mxu0 %v7224_v55 }
0x305f   :  { %7929 = vmatpush3.msra.mxu0 %v7224_v55 }
0x3060   :  { %7930 = vmatprep.subr.mxu0 %v7223_v6 }
0x3061   :  { %7931 = vmatpush3.msra.mxu0 %v7223_v6 }
0x3062   :  { %7932 = vmatprep.subr.mxu0 %v7222_v12 }
0x3063   :  { %7933 = vmatpush3.msra.mxu0 %v7222_v12 }
0x3064   :  { %7934 = vmatprep.subr.mxu0 %v7221_v13 }
0x3065   :  { %7935 = vmatpush3.msra.mxu0 %v7221_v13 }
0x3066   :  { %7936 = vmatprep.subr.mxu0 %v7220_v14 }
0x3067   :  { %7937 = vmatpush3.msra.mxu0 %v7220_v14 }
0x3068   :  { %7938 = vmatprep.subr.mxu0 %v7219_v3 }
0x3069   :  { %7939 = vmatpush3.msra.mxu0 %v7219_v3 }
0x311a   :  { %v7912_v4 = vpop.f32.mrf.mxu0 }
0x311b   :  { %v6758_v33 = vadd.f32 %v7912_v4, %v7208_v37 }
0x311c   :  { %v6752_v34 = vpop.f32.mrf.mxu0 }
0x311d   :  { %v6762_v35 = vadd.f32 %v6758_v33, %v9007_v61  ;;  %v6753_v42 = vadd.f32 %v7208_v37, %v6752_v34 }
0x311f   :  { %v6761_v36 = vadd.f32 %v6753_v42, %v9005_v60  ;;  %v6770_v39 = vsel %vm113_vm0, %v6762_v35, 0.0  ;;  %v6813_v60 = vld [vmem:[#allocation4 + $0x38] sm:$0xff] }
0x3120   :  { %6771 = vadd.xlane.f32.xlu1 %v6770_v39  ;;  %7913 = vmatprep.subr.mxu1 %v6813_v60 }
0x3121   :  { %v6767_v38 = vsel %vm113_vm0, %v6761_v36, 0.0  ;;  %7914 = vmatpush3.msra.mxu1 %v6813_v60  ;;  %v7232_v60 = vld [vmem:[%s9261_s19] ss:$0 sm:$0xff] }
0x3122   :  { %6768 = vadd.xlane.f32.xlu0 %v6767_v38  ;;  %7915 = vmatprep.subr.mxu1 %v6812_v47 }
0x3123   :  { %7916 = vmatpush3.msra.mxu1 %v6812_v47 }
0x3124   :  { %7917 = vmatprep.subr.mxu1 %v6811_v48 }
0x3125   :  { %7918 = vmatpush3.msra.mxu1 %v6811_v48 }
0x3126   :  { %7919 = vmatprep.subr.mxu1 %v6810_v49 }
0x3127   :  { %7920 = vmatpush3.msra.mxu1 %v6810_v49 }
0x31a9   :  { %v6772_v40 = vpop.xlane.xlu1 %6771 }
0x31aa   :  { %v6774_v41 = vmul.f32 0.03125, %v6772_v40 }
0x31ab   :  { %v6769_v44 = vpop.xlane.xlu0 %6768 }
0x31ac   :  { %v6773_v10 = vmul.f32 0.03125, %v6769_v44  ;;  %v6776_v43 = vsub.f32 %v6762_v35, %v6774_v41 }
0x31ae   :  { %v6775_v45 = vsub.f32 %v6761_v36, %v6773_v10  ;;  %v6778_v5 = vmul.f32 %v6776_v43, %v6776_v43 }
0x31b0   :  { %v6777_v46 = vmul.f32 %v6775_v45, %v6775_v45  ;;  %v6782_v61 = vsel %vm113_vm0, %v6778_v5, 0.0 }
0x31b2   :  { %v6779_v2 = vsel %vm113_vm0, %v6777_v46, 0.0 }
0x31b3   :  { %6780 = vadd.xlane.f32.xlu0 %v6779_v2  ;;  %v7231_v2 = vld [vmem:[%s9260_s18] ss:$0 sm:$0xff] }
0x31b7   :  { %6783 = vadd.xlane.f32.xlu0 %v6782_v61 }
0x323c   :  { %v6781_v56 = vpop.xlane.xlu0 %6780 }
0x323d   :  { %v6785_v53 = vmul.f32 0.03125, %v6781_v56 }
0x323f   :  { %v6787_v58 = vadd.f32 1e-05, %v6785_v53 }
0x3240   :  { %v6784_v57 = vpop.xlane.xlu0 %6783 }
0x3241   :  { %8102 = vrsqrt.f32 %v6787_v58  ;;  %v6786_v59 = vmul.f32 0.03125, %v6784_v57 }
0x3243   :  { %v6788_v25 = vadd.f32 1e-05, %v6786_v59 }
0x3245   :  { %8104 = vrsqrt.f32 %v6788_v25 }
0x324e   :  { %v8103_v27 = vpop.eup %8102 }
0x324f   :  { %v6791_v62 = vmul.f32 %v8103_v27, %v6775_v45 }
0x3251   :  { %v6799_v0 = vmul.f32 %v7213_v1, %v6791_v62 }
0x3252   :  { %v8105_v18 = vpop.eup %8104 }
0x3253   :  { %v6792_v17 = vmul.f32 %v8105_v18, %v6776_v43  ;;  %v6807_v7 = vadd.f32 %v7214_v63, %v6799_v0 }
0x3255   :  { %v6800_v8 = vmul.f32 %v7213_v1, %v6792_v17  ;;  %7921 = vmatprep.mubr.msk.f32.mxu1 %vm113_vm0, %v6807_v7 }
0x3257   :  { %v6808_v9 = vadd.f32 %v7214_v63, %v6800_v8 }
0x3259   :  { %7922 = vmatmul.mubr.msk.f32.vlgmr.msra.gmra.mxu1 %vm113_vm0, %v6808_v9 }
0x3319   :  { %v7923_v16 = vpop.f32.mrf.mxu1 }
0x331a   :  { %v6900_v28 = vadd.f32 %v7923_v16, %v7216_v15 }
0x331b   :  { %v6894_v11 = vpop.f32.mrf.mxu1 }
0x331c   :  { %v6895_v19 = vadd.f32 %v7216_v15, %v6894_v11  ;;  %v6904_v29 = vmax.f32 %v6900_v28, 0.0 }
0x331e   :  { %v6903_v20 = vmax.f32 %v6895_v19, 0.0 }
0x3320   :  { %7940 = vmatprep.mubr.msk.f32.mxu0 %vm3465_vm5, %v6903_v20 }
0x3321   :  { %7941 = vmatmul.mubr.msk.f32.vlgmr.msra.gmra.mxu0 %vm3465_vm5, %v6904_v29 }
0x33e1   :  { %v7942_v23 = vpop.f32.mrf.mxu0 }
0x33e2   :  { %v7000_v24 = vadd.f32 %v7942_v23, %v7228_v21 }
0x33e3   :  { %v6994_v26 = vpop.f32.mrf.mxu0 }
0x33e4   :  { %v7004_v22 = vadd.f32 %v7000_v24, %v6808_v9  ;;  %v6995_v30 = vadd.f32 %v7228_v21, %v6994_v26 }
0x33e6   :  { %v7003_v31 = vadd.f32 %v6995_v30, %v6807_v7  ;;  %v7010_v54 = vsel %vm113_vm0, %v7004_v22, 0.0 }
0x33e7   :  { %7011 = vadd.xlane.f32.xlu0 %v7010_v54 }
0x33e8   :  { %v7007_v50 = vsel %vm113_vm0, %v7003_v31, 0.0 }
0x33e9   :  { %7008 = vadd.xlane.f32.xlu1 %v7007_v50 }
0x3470   :  { %v7012_v32 = vpop.xlane.xlu0 %7011 }
0x3471   :  { %v7014_v37 = vmul.f32 0.03125, %v7012_v32 }
0x3472   :  { %v7009_v4 = vpop.xlane.xlu1 %7008 }
0x3473   :  { %v7016_v33 = vsub.f32 %v7004_v22, %v7014_v37  ;;  %v7013_v34 = vmul.f32 0.03125, %v7009_v4 }
0x3475   :  { %v7015_v35 = vsub.f32 %v7003_v31, %v7013_v34  ;;  %v7018_v42 = vmul.f32 %v7016_v33, %v7016_v33 }
0x3477   :  { %v7022_v36 = vsel %vm113_vm0, %v7018_v42, 0.0  ;;  %v7017_v39 = vmul.f32 %v7015_v35, %v7015_v35 }
0x3478   :  { %7023 = vadd.xlane.f32.xlu0 %v7022_v36 }
0x3479   :  { %v7019_v38 = vsel %vm113_vm0, %v7017_v39, 0.0 }
0x347a   :  { %7020 = vadd.xlane.f32.xlu1 %v7019_v38 }
0x3501   :  { %v7024_v40 = vpop.xlane.xlu0 %7023 }
0x3502   :  { %v7026_v41 = vmul.f32 0.03125, %v7024_v40 }
0x3503   :  { %v7021_v44 = vpop.xlane.xlu1 %7020 }
0x3504   :  { %v7028_v10 = vadd.f32 1e-05, %v7026_v41  ;;  %v7025_v43 = vmul.f32 0.03125, %v7021_v44 }
0x3506   :  { %8106 = vrsqrt.f32 %v7028_v10  ;;  %v7027_v45 = vadd.f32 1e-05, %v7025_v43 }
0x3508   :  { %8108 = vrsqrt.f32 %v7027_v45 }
0x3513   :  { %v8107_v46 = vpop.eup %8106 }
0x3514   :  { %v7032_v5 = vmul.f32 %v8107_v46, %v7016_v33 }
0x3515   :  { %v8109_v61 = vpop.eup %8108 }
0x3516   :  { %v7040_v47 = vmul.f32 %v7231_v2, %v7032_v5  ;;  %v7031_v48 = vmul.f32 %v8109_v61, %v7015_v35 }
0x3518   :  { %v7048_v49 = vadd.f32 %v7232_v60, %v7040_v47  ;;  %v7039_v51 = vmul.f32 %v7231_v2, %v7031_v48 }
0x351a   :  { %7050 = vst.msk [vmem:[%s9262_s20 + $0x8] sm:$0xff] %vm113_vm0, %v7048_v49  ;;  %v7047_v52 = vadd.f32 %v7232_v60, %v7039_v51 }
0x351c   :  { %7049 = vst.msk [vmem:[%s9262_s20] sm:$0xff] %vm113_vm0, %v7047_v52 }
0x351d   :  { %7055 = vsyncpa [#allocation3], 1 }
0x351e   :  { %7056 = vsyncpa [#allocation5], 1 }

</bundles_post_ra>
